<compile_context>
chip_gen: v6e
topology: v6e:2x2x1
jax: 0.10.0
libtpu: 0.0.40
codegen_flags: <defaults>
</compile_context>

<pallas_src>
import functools
import math

import jax
import jax.numpy as jnp
from jax.experimental import pallas as pl
from jax.experimental.pallas import tpu as pltpu


_VMEM = pl.BlockSpec(memory_space=pltpu.MemorySpace.VMEM)


# ------------------------------ Pallas kernel -------------------------------


def _feature_enhancer_kernel(face_ref, body_ref, w_qkv_ref, b_qkv_ref,
                             mask_ref, w_out_ref, b_out_ref, bn_sel_ref,
                             gamma_ref, beta_ref, out_ref, *,
                             width, n_stat, eps):
    # face/body: (R, W) with rows ordered (batch, channel, height), i.e. the
    # native NCHW memory order.  All 1x1-conv channel mixes use Kronecker /
    # block expanded weights so the kernel never needs a transpose or a
    # layout-changing reshape.
    x = jnp.concatenate([face_ref[...], body_ref[...]], axis=0)          # (2R, W)

    qkv = (
        jnp.dot(w_qkv_ref[...], x, preferred_element_type=jnp.float32)
        + b_qkv_ref[...]
    )                                                                    # (6R, W)
    rows = x.shape[0]
    q = qkv[:rows]
    k = qkv[rows:2 * rows]
    v = qkv[2 * rows:]

    # One masked attention covering every (H, W) slice of BOTH cross-attention
    # blocks: scores are block-diagonal (additive -1e9 mask off-block), the
    # softmax runs on a lane-dense (2R, 2R) tile, and off-block attention
    # weights underflow to exactly 0, so attn @ v reproduces the per-(b, c)
    # attention of the reference.
    s = jax.lax.dot_general(q, k, (((1,), (1,)), ((), ())),
                            preferred_element_type=jnp.float32)          # (2R, 2R)
    s = s * (1.0 / math.sqrt(width)) + mask_ref[...]
    m = jnp.max(s, axis=-1, keepdims=True)
    p = jnp.exp(s - m)
    denom = jnp.sum(p, axis=-1, keepdims=True)
    inv = pl.reciprocal(denom, approx=True)          # EUP slot (otherwise idle)
    inv = inv * (2.0 - denom * inv)                  # one Newton step -> f32
    o = jnp.dot(p * inv, v, preferred_element_type=jnp.float32)          # (2R, W)

    # Output projections of both blocks folded into the 1x1 fuse conv
    # (folding done once at prepare time).
    y = (
        jnp.dot(w_out_ref[...], o, preferred_element_type=jnp.float32)
        + b_out_ref[...]
    )                                                                    # (R, W)

    # Train-mode BatchNorm over (B, H, W): per-channel statistics gathered
    # with a precomputed 0/1 channel-selector matmul (keeps everything 2-D).
    mean = jnp.sum(jnp.dot(bn_sel_ref[...], y,
                           preferred_element_type=jnp.float32),
                   axis=1, keepdims=True) / n_stat                       # (R, 1)
    d = y - mean
    var = jnp.sum(jnp.dot(bn_sel_ref[...], d * d,
                          preferred_element_type=jnp.float32),
                  axis=1, keepdims=True) / n_stat
    yn = d * jax.lax.rsqrt(var + eps)
    yn = yn * gamma_ref[...] + beta_ref[...]
    out_ref[...] = jnp.maximum(yn, 0.0)              # rows stay in NCHW order


# ------------------------------- wrapper -------------------------------------


def prepare_params(params, input_shape):
    """One-time host-side preprocessing (hoisted out of the per-call path)."""
    B, C, H, W = input_shape
    R = B * C * H
    f2b, b2f = params["f2b"], params["b2f"]
    eye_b = jnp.eye(B, dtype=jnp.float32)
    eye_h = jnp.eye(H, dtype=jnp.float32)

    def kron3(m):                       # (C,C) channel mix -> (R,R) block weight
        return jnp.kron(jnp.kron(eye_b, m.astype(jnp.float32)), eye_h)

    def col(vec):                       # per-channel (C,) -> per-row (R,1)
        return jnp.tile(jnp.repeat(vec.astype(jnp.float32), H), B)[:, None]

    zero = jnp.zeros((R, R), jnp.float32)
    # x_cat rows: [face(0:R) ; body(R:2R)].  qkv rows: [Q ; K ; V], each block
    # ordered [f2b ; b2f].  f2b takes Q from face, K/V from body; b2f swaps.
    w_q = jnp.block([[kron3(f2b["wq"]), zero], [zero, kron3(b2f["wq"])]])
    w_k = jnp.block([[zero, kron3(f2b["wk"])], [kron3(b2f["wk"]), zero]])
    w_v = jnp.block([[zero, kron3(f2b["wv"])], [kron3(b2f["wv"]), zero]])
    w_qkv = jnp.concatenate([w_q, w_k, w_v], axis=0)                     # (6R, 2R)
    b_qkv = jnp.concatenate(
        [col(f2b["bq"]), col(b2f["bq"]),
         col(f2b["bk"]), col(b2f["bk"]),
         col(f2b["bv"]), col(b2f["bv"])], axis=0)                        # (6R, 1)

    # Fold W_o of both attention blocks into the 1x1 fuse conv.
    fuse1 = params["fuse_w"][:, :C]
    fuse2 = params["fuse_w"][:, C:]
    w_out = jnp.concatenate(
        [kron3(fuse1 @ f2b["wo"]), kron3(fuse2 @ b2f["wo"])], axis=1)    # (R, 2R)
    b_out = col(fuse1 @ f2b["bo"] + fuse2 @ b2f["bo"])                   # (R, 1)

    # Additive block-diagonal attention mask: row r attends col c iff they
    # belong to the same (block, batch, channel) slice, i.e. r//H == c//H.
    gid = jnp.arange(2 * R) // H
    attn_mask = jnp.where(gid[:, None] == gid[None, :], 0.0, -1e9
                          ).astype(jnp.float32)                          # (2R, 2R)

    # BatchNorm channel selector: sel[r, r'] == 1 iff rows share a channel.
    ch = (jnp.arange(R) // H) % C
    bn_sel = (ch[:, None] == ch[None, :]).astype(jnp.float32)            # (R, R)

    return {
        "w_qkv": w_qkv, "b_qkv": b_qkv, "attn_mask": attn_mask,
        "w_out": w_out, "b_out": b_out, "bn_sel": bn_sel,
        "gamma_col": col(params["gamma"]), "beta_col": col(params["beta"]),
    }


def feature_enhancer(face, body, prep):
    B, C, H, W = face.shape
    R = B * C * H
    two_r = 2 * R
    # Metadata-only reshapes: (B,C,H,W) row-major == (B*C*H, W) row-major.
    face2 = face.reshape(R, W)
    body2 = body.reshape(R, W)

    flops = 2 * (
        3 * two_r * two_r * W        # fused QKV projections
        + two_r * W * two_r          # Q @ K^T
        + two_r * two_r * W          # attn @ V
        + R * two_r * W              # folded out-proj + fuse conv
        + 2 * R * R * W              # BatchNorm selector matmuls
    ) + 8 * two_r * two_r            # softmax / mask elementwise
    transcendentals = two_r * two_r + two_r + R
    param_elems = (6 * R * two_r + 6 * R + two_r * two_r + R * two_r + R
                   + R * R + 2 * R)
    bytes_accessed = 4 * (3 * R * W + param_elems)

    kernel = functools.partial(
        _feature_enhancer_kernel, width=W, n_stat=float(B * H * W), eps=1e-5)

    out2 = pl.pallas_call(
        kernel,
        out_shape=jax.ShapeDtypeStruct((R, W), jnp.float32),
        in_specs=[_VMEM] * 10,
        out_specs=_VMEM,
        cost_estimate=pl.CostEstimate(
            flops=int(flops),
            transcendentals=int(transcendentals),
            bytes_accessed=int(bytes_accessed)),
    )(face2, body2, prep["w_qkv"], prep["b_qkv"], prep["attn_mask"],
      prep["w_out"], prep["b_out"], prep["bn_sel"], prep["gamma_col"],
      prep["beta_col"])

    return out2.reshape(B, C, H, W)   # metadata-only reshape back to NCHW


# --------------------------- pure-JAX reference -----------------------------


def _reference(face, body, params):
    hi = jax.lax.Precision.HIGHEST

    def conv1x1(x, w, b=None):
        y = jnp.einsum("bchw,oc->bohw", x, w, precision=hi)
        if b is not None:
            y = y + b[None, :, None, None]
        return y

    def mha(xq, xk, xv, p, nh):
        B, C, H, W = xq.shape
        hd = C // nh
        q = conv1x1(xq, p["wq"], p["bq"]).reshape(B, nh, hd, H, W)
        k = conv1x1(xk, p["wk"], p["bk"]).reshape(B, nh, hd, H, W)
        v = conv1x1(xv, p["wv"], p["bv"]).reshape(B, nh, hd, H, W)
        s = jnp.einsum("...ij,...kj->...ik", q, k, precision=hi) / jnp.sqrt(
            jnp.float32(W))
        a = jax.nn.softmax(s, axis=-1)
        o = jnp.einsum("...ik,...kj->...ij", a, v, precision=hi)
        return conv1x1(o.reshape(B, C, H, W), p["wo"], p["bo"])

    nh = params["num_heads"]
    face_out = mha(face, body, body, params["f2b"], nh)
    body_out = mha(body, face, face, params["b2f"], nh)
    cat = jnp.concatenate([face_out, body_out], axis=1)
    y = conv1x1(cat, params["fuse_w"])
    mean = jnp.mean(y, axis=(0, 2, 3), keepdims=True)
    var = jnp.mean((y - mean) ** 2, axis=(0, 2, 3), keepdims=True)
    y = (y - mean) / jnp.sqrt(var + 1e-5)
    y = y * params["gamma"][None, :, None, None] + params["beta"][None, :, None, None]
    return jnp.maximum(y, 0.0)


# --------------------------------- main --------------------------------------


def _init_params(key, C, num_heads):
    def mha_params(key):
        ks = jax.random.split(key, 8)
        scale = 1.0 / math.sqrt(C)
        return {
            "wq": jax.random.normal(ks[0], (C, C), jnp.float32) * scale,
            "bq": jax.random.normal(ks[1], (C,), jnp.float32) * 0.1,
            "wk": jax.random.normal(ks[2], (C, C), jnp.float32) * scale,
            "bk": jax.random.normal(ks[3], (C,), jnp.float32) * 0.1,
            "wv": jax.random.normal(ks[4], (C, C), jnp.float32) * scale,
            "bv": jax.random.normal(ks[5], (C,), jnp.float32) * 0.1,
            "wo": jax.random.normal(ks[6], (C, C), jnp.float32) * scale,
            "bo": jax.random.normal(ks[7], (C,), jnp.float32) * 0.1,
        }

    k1, k2, k3, k4, k5 = jax.random.split(key, 5)
    return {
        # Note: num_heads only re-groups channels in the reference; the math is
        # identical per (batch, channel) slice since d_k == W in this module.
        "num_heads": num_heads,
        "f2b": mha_params(k1),
        "b2f": mha_params(k2),
        "fuse_w": jax.random.normal(k3, (C, 2 * C), jnp.float32)
        / math.sqrt(2 * C),
        "gamma": 1.0 + 0.1 * jax.random.normal(k4, (C,), jnp.float32),
        "beta": 0.1 * jax.random.normal(k5, (C,), jnp.float32),
    }


if __name__ == "__main__":
    B, C, H, W = 2, 8, 8, 8
    num_heads = 2

    key = jax.random.PRNGKey(0)
    k_face, k_body, k_par = jax.random.split(key, 3)
    face = jax.random.normal(k_face, (B, C, H, W), jnp.float32)
    body = jax.random.normal(k_body, (B, C, H, W), jnp.float32)
    params = _init_params(k_par, C, num_heads)
    prep = prepare_params(params, (B, C, H, W))   # one-time, outside hot path

    fe = jax.jit(feature_enhancer)
    out = jax.block_until_ready(fe(face, body, prep))

    ref = jax.block_until_ready(_reference(face, body, params))
    assert out.shape == (B, C, H, W), out.shape
    err = float(jnp.max(jnp.abs(out - ref)))
    assert jnp.allclose(out, ref, atol=2e-4, rtol=2e-4), err

    print("KERNEL_OK")
</pallas_src>

<mosaic_0001>
module attributes {stable_mosaic.version = 11 : i64} {
  func.func @_feature_enhancer_kernel(%arg0: memref<128x8xf32, #tpu.memory_space<vmem>>, %arg1: memref<128x8xf32, #tpu.memory_space<vmem>>, %arg2: memref<768x256xf32, #tpu.memory_space<vmem>>, %arg3: memref<768x1xf32, #tpu.memory_space<vmem>>, %arg4: memref<256x256xf32, #tpu.memory_space<vmem>>, %arg5: memref<128x256xf32, #tpu.memory_space<vmem>>, %arg6: memref<128x1xf32, #tpu.memory_space<vmem>>, %arg7: memref<128x128xf32, #tpu.memory_space<vmem>>, %arg8: memref<128x1xf32, #tpu.memory_space<vmem>>, %arg9: memref<128x1xf32, #tpu.memory_space<vmem>>, %arg10: memref<128x8xf32, #tpu.memory_space<vmem>>) attributes {dimension_semantics = [], scalar_prefetch = 0 : i64, scratch_operands = 0 : i64, tpu.core_type = #tpu.core_type<tc>} {
    %c0 = arith.constant 0 : index
    %c0_0 = arith.constant 0 : index
    %0 = vector.load %arg0[%c0, %c0_0] : memref<128x8xf32, #tpu.memory_space<vmem>>, vector<128x8xf32>
    %c0_1 = arith.constant 0 : index
    %c0_2 = arith.constant 0 : index
    %1 = vector.load %arg1[%c0_1, %c0_2] : memref<128x8xf32, #tpu.memory_space<vmem>>, vector<128x8xf32>
    %2 = tpu.concatenate %0, %1 in 0 : vector<128x8xf32>, vector<128x8xf32> -> vector<256x8xf32>
    %c0_3 = arith.constant 0 : index
    %c0_4 = arith.constant 0 : index
    %3 = vector.load %arg2[%c0_3, %c0_4] : memref<768x256xf32, #tpu.memory_space<vmem>>, vector<768x256xf32>
    %cst = arith.constant dense<0.000000e+00> : vector<768x8xf32>
    %4 = tpu.matmul %3, %2, %cst {dimension_numbers = #tpu.dot_dimension_numbers<[1], [0], [0], [1], [0, 0, 1, 1], [], []>} : vector<768x256xf32>, vector<256x8xf32>, vector<768x8xf32> -> vector<768x8xf32>
    %c0_5 = arith.constant 0 : index
    %c0_6 = arith.constant 0 : index
    %5 = vector.load %arg3[%c0_5, %c0_6] : memref<768x1xf32, #tpu.memory_space<vmem>>, vector<768x1xf32>
    %6 = vector.broadcast %5 : vector<768x1xf32> to vector<768x8xf32>
    %7 = arith.addf %4, %6 : vector<768x8xf32>
    %8 = vector.extract_strided_slice %7 {offsets = [0, 0], sizes = [256, 8], strides = [1, 1]} : vector<768x8xf32> to vector<256x8xf32>
    %9 = vector.extract_strided_slice %7 {offsets = [256, 0], sizes = [256, 8], strides = [1, 1]} : vector<768x8xf32> to vector<256x8xf32>
    %10 = vector.extract_strided_slice %7 {offsets = [512, 0], sizes = [256, 8], strides = [1, 1]} : vector<768x8xf32> to vector<256x8xf32>
    %cst_7 = arith.constant dense<0.000000e+00> : vector<256x256xf32>
    %11 = tpu.matmul %8, %9, %cst_7 {dimension_numbers = #tpu.dot_dimension_numbers<[1], [1], [0], [0], [0, 0, 1, 0], [], []>} : vector<256x8xf32>, vector<256x8xf32>, vector<256x256xf32> -> vector<256x256xf32>
    %cst_8 = arith.constant 0.353553385 : f32
    %12 = vector.broadcast %cst_8 : f32 to vector<256x256xf32>
    %13 = arith.mulf %11, %12 : vector<256x256xf32>
    %c0_9 = arith.constant 0 : index
    %c0_10 = arith.constant 0 : index
    %14 = vector.load %arg4[%c0_9, %c0_10] : memref<256x256xf32, #tpu.memory_space<vmem>>, vector<256x256xf32>
    %15 = arith.addf %13, %14 : vector<256x256xf32>
    %cst_11 = arith.constant dense<0xFF800000> : vector<256xf32>
    %16 = vector.multi_reduction <maximumf>, %15, %cst_11 [1] : vector<256x256xf32> to vector<256xf32>
    %17 = vector.shape_cast %16 : vector<256xf32> to vector<256x1xf32>
    %18 = vector.broadcast %17 : vector<256x1xf32> to vector<256x256xf32>
    %19 = arith.subf %15, %18 : vector<256x256xf32>
    %20 = math.exp %19 : vector<256x256xf32>
    %cst_12 = arith.constant dense<0.000000e+00> : vector<256xf32>
    %21 = vector.multi_reduction <add>, %20, %cst_12 [1] : vector<256x256xf32> to vector<256xf32>
    %22 = vector.shape_cast %21 : vector<256xf32> to vector<256x1xf32>
    %23 = tpu.reciprocal %22 {approx = true} : vector<256x1xf32> -> vector<256x1xf32>
    %24 = arith.mulf %22, %23 : vector<256x1xf32>
    %cst_13 = arith.constant 2.000000e+00 : f32
    %25 = vector.broadcast %cst_13 : f32 to vector<256x1xf32>
    %26 = arith.subf %25, %24 : vector<256x1xf32>
    %27 = arith.mulf %23, %26 : vector<256x1xf32>
    %28 = vector.broadcast %27 : vector<256x1xf32> to vector<256x256xf32>
    %29 = arith.mulf %20, %28 : vector<256x256xf32>
    %cst_14 = arith.constant dense<0.000000e+00> : vector<256x8xf32>
    %30 = tpu.matmul %29, %10, %cst_14 {dimension_numbers = #tpu.dot_dimension_numbers<[1], [0], [0], [1], [0, 0, 1, 1], [], []>} : vector<256x256xf32>, vector<256x8xf32>, vector<256x8xf32> -> vector<256x8xf32>
    %c0_15 = arith.constant 0 : index
    %c0_16 = arith.constant 0 : index
    %31 = vector.load %arg5[%c0_15, %c0_16] : memref<128x256xf32, #tpu.memory_space<vmem>>, vector<128x256xf32>
    %cst_17 = arith.constant dense<0.000000e+00> : vector<128x8xf32>
    %32 = tpu.matmul %31, %30, %cst_17 {dimension_numbers = #tpu.dot_dimension_numbers<[1], [0], [0], [1], [0, 0, 1, 1], [], []>} : vector<128x256xf32>, vector<256x8xf32>, vector<128x8xf32> -> vector<128x8xf32>
    %c0_18 = arith.constant 0 : index
    %c0_19 = arith.constant 0 : index
    %33 = vector.load %arg6[%c0_18, %c0_19] : memref<128x1xf32, #tpu.memory_space<vmem>>, vector<128x1xf32>
    %34 = vector.broadcast %33 : vector<128x1xf32> to vector<128x8xf32>
    %35 = arith.addf %32, %34 : vector<128x8xf32>
    %c0_20 = arith.constant 0 : index
    %c0_21 = arith.constant 0 : index
    %36 = vector.load %arg7[%c0_20, %c0_21] : memref<128x128xf32, #tpu.memory_space<vmem>>, vector<128x128xf32>
    %cst_22 = arith.constant dense<0.000000e+00> : vector<128x8xf32>
    %37 = tpu.matmul %36, %35, %cst_22 {dimension_numbers = #tpu.dot_dimension_numbers<[1], [0], [0], [1], [0, 0, 1, 1], [], []>} : vector<128x128xf32>, vector<128x8xf32>, vector<128x8xf32> -> vector<128x8xf32>
    %cst_23 = arith.constant dense<0.000000e+00> : vector<128xf32>
    %38 = vector.multi_reduction <add>, %37, %cst_23 [1] : vector<128x8xf32> to vector<128xf32>
    %39 = vector.shape_cast %38 : vector<128xf32> to vector<128x1xf32>
    %cst_24 = arith.constant 1.280000e+02 : f32
    %40 = vector.broadcast %cst_24 : f32 to vector<128x1xf32>
    %41 = arith.divf %39, %40 : vector<128x1xf32>
    %42 = vector.broadcast %41 : vector<128x1xf32> to vector<128x8xf32>
    %43 = arith.subf %35, %42 : vector<128x8xf32>
    %c0_25 = arith.constant 0 : index
    %c0_26 = arith.constant 0 : index
    %44 = vector.load %arg7[%c0_25, %c0_26] : memref<128x128xf32, #tpu.memory_space<vmem>>, vector<128x128xf32>
    %45 = arith.mulf %43, %43 : vector<128x8xf32>
    %cst_27 = arith.constant dense<0.000000e+00> : vector<128x8xf32>
    %46 = tpu.matmul %44, %45, %cst_27 {dimension_numbers = #tpu.dot_dimension_numbers<[1], [0], [0], [1], [0, 0, 1, 1], [], []>} : vector<128x128xf32>, vector<128x8xf32>, vector<128x8xf32> -> vector<128x8xf32>
    %cst_28 = arith.constant dense<0.000000e+00> : vector<128xf32>
    %47 = vector.multi_reduction <add>, %46, %cst_28 [1] : vector<128x8xf32> to vector<128xf32>
    %48 = vector.shape_cast %47 : vector<128xf32> to vector<128x1xf32>
    %cst_29 = arith.constant 1.280000e+02 : f32
    %49 = vector.broadcast %cst_29 : f32 to vector<128x1xf32>
    %50 = arith.divf %48, %49 : vector<128x1xf32>
    %cst_30 = arith.constant 9.99999974E-6 : f32
    %51 = vector.broadcast %cst_30 : f32 to vector<128x1xf32>
    %52 = arith.addf %50, %51 : vector<128x1xf32>
    %53 = math.rsqrt %52 : vector<128x1xf32>
    %54 = vector.broadcast %53 : vector<128x1xf32> to vector<128x8xf32>
    %55 = arith.mulf %43, %54 : vector<128x8xf32>
    %c0_31 = arith.constant 0 : index
    %c0_32 = arith.constant 0 : index
    %56 = vector.load %arg8[%c0_31, %c0_32] : memref<128x1xf32, #tpu.memory_space<vmem>>, vector<128x1xf32>
    %57 = vector.broadcast %56 : vector<128x1xf32> to vector<128x8xf32>
    %58 = arith.mulf %55, %57 : vector<128x8xf32>
    %c0_33 = arith.constant 0 : index
    %c0_34 = arith.constant 0 : index
    %59 = vector.load %arg9[%c0_33, %c0_34] : memref<128x1xf32, #tpu.memory_space<vmem>>, vector<128x1xf32>
    %60 = vector.broadcast %59 : vector<128x1xf32> to vector<128x8xf32>
    %61 = arith.addf %58, %60 : vector<128x8xf32>
    %cst_35 = arith.constant 0.000000e+00 : f32
    %62 = vector.broadcast %cst_35 : f32 to vector<128x8xf32>
    %63 = arith.maximumf %61, %62 : vector<128x8xf32>
    %c0_36 = arith.constant 0 : index
    %c0_37 = arith.constant 0 : index
    %64 = vector.load %arg10[%c0_36, %c0_37] : memref<128x8xf32, #tpu.memory_space<vmem>>, vector<128x8xf32>
    tpu.vector_store %arg10[%c0_36, %c0_37], %63 {strides = array<i32>} : memref<128x8xf32, #tpu.memory_space<vmem>>, vector<128x8xf32>,
    return
  }
}

</mosaic_0001>

<bundles_post_ra>
// kernel: feature_enhancer.1
= control target key start
LH: loop header
LB: loop body
LE: loop exit
PB: predicated region body
PF: predicated region fallthrough
CT: control target
= control target key end

     0   :  { %15 = vsyncpa [#allocation3], 0  ;;  %s7032_s0 = inlined_call_operand.vmem [shape: f32[128,8], index: 0, kind: input, shape index: {}]   ;;  %s7033_s1 = inlined_call_operand.vmem [shape: f32[128,8], index: 1, kind: input, shape index: {}]   ;;  %s7034_s2 = inlined_call_operand.hbm [shape: f32[768,256], index: 2, kind: input, shape index: {}]   ;;  %s7035_s3 = inlined_call_operand.vmem [shape: f32[768,1], index: 3, kind: input, shape index: {}]   ;;  %s7036_s4 = inlined_call_operand.vmem [shape: f32[256,256], index: 4, kind: input, shape index: {}]   ;;  %s7037_s5 = inlined_call_operand.vmem [shape: f32[128,256], index: 5, kind: input, shape index: {}]   ;;  %s7038_s6 = inlined_call_operand.vmem [shape: f32[128,1], index: 6, kind: input, shape index: {}]   ;;  %s7039_s7 = inlined_call_operand.vmem [shape: f32[128,128], index: 7, kind: input, shape index: {}]   ;;  %s7040_s8 = inlined_call_operand.vmem [shape: f32[128,1], index: 8, kind: input, shape index: {}]   ;;  %s7041_s9 = inlined_call_operand.vmem [shape: f32[128,1], index: 9, kind: input, shape index: {}]   ;;  %s7042_s10 = inlined_call_operand.hbm [shape: f32[128,8], index: 10, kind: output, shape index: {}]  }
   0x1   :  { %16 = vsyncpa [#allocation4], 0  ;;  %s4593_s13 = smov [#allocation2]  }
   0x2   :  { %s26_s14 = sshll.u32 %s4593_s13, 4  ;;  %s27_s14 = int_to_ptr.vmem [resolvable:$true] %s26_s14 }
   0x3   :  { %s4557_s15 = scalar_lea.vmem %s27_s14, 24576  ;;  %p4562_p1 = scmp.lt.s32.totalorder %s27_s14, %s27_s14 }
   0x4   :  { %p4558_p0 = scmp.ne.s32.totalorder %s27_s14, %s4557_s15  ;;  %p4563_p2 = scmp.lt.s32.totalorder %s4557_s15, %s4557_s15 }
   0x6   :  { %p4564_p3 = por %p4563_p2, %p4562_p1 }
   0x8   :  { %p4565_p4 = pnand %p4564_p3, %p4558_p0 }
   0xa   :  { %4568 = shalt.err (!%p4565_p4)
}
   0xb   :  { %s4594_s16 = smov 256   ;;  %s4595_s17 = smov 16  }
   0xc   :  { %32 = dma.hbm_to_vmem [thread:$0]  %s7034_s2, 24576, %s27_s14, [#allocation3], %s4594_s16, %s4594_s16, %s4595_s17  }
   0xd   :  { %4589 = dma.done.wait [#allocation3], 24576  }
   0xe   :  { %4590 = vsyncadd [#allocation3], 4294942720  ;;  %v7043_v0 = vmov 0.0   ;;  %v4597_v1 = vmov 0   ;;  %v65_v2 = vld [vmem:[%s7032_s0 + $0x78] sm:$0xff]  ;;  %v64_v3 = vld [vmem:[%s7032_s0 + $0x70] sm:$0xff] }
   0xf   :  { %850 = vmatprep.subr.mxu0 %v7043_v0  ;;  %4323 = vset.pattern.permute.xlu0 %v4597_v1  ;;  %v63_v4 = vld [vmem:[%s7032_s0 + $0x68] sm:$0xff]  ;;  %v62_v5 = vld [vmem:[%s7032_s0 + $0x60] sm:$0xff]  ;;  %v61_v6 = vld [vmem:[%s7032_s0 + $0x58] sm:$0xff]  ;;  %vm1395_vm0 = vcmask 64512  }
  0x10   :  { %4324 = vset.pattern.permute.xlu1 %v4597_v1  ;;  %851 = vmatpush1.msra.mxu0 %v65_v2  ;;  %v60_v7 = vld [vmem:[%s7032_s0 + $0x50] sm:$0xff]  ;;  %v59_v8 = vld [vmem:[%s7032_s0 + $0x48] sm:$0xff]  ;;  %v58_v10 = vld [vmem:[%s7032_s0 + $0x40] sm:$0xff] }
  0x11   :  { %852 = vmatprep.subr.mxu0 %v7043_v0  ;;  %v83_v9 = vld [vmem:[#allocation2 + $0x8] sm:$0xff]  ;;  %v337_v11 = vld [vmem:[%s7035_s3 + $0x1f8] sm:$0xff]  ;;  %v336_v12 = vld [vmem:[%s7035_s3 + $0x1f0] sm:$0xff] }
  0x12   :  { %853 = vmatpush1.msra.mxu0 %v64_v3  ;;  %914 = vmatprep.mubr.f32.mxu0 %v83_v9  ;;  %v57_v13 = vld [vmem:[%s7032_s0 + $0x38] sm:$0xff]  ;;  %v320_v15 = vld [vmem:[%s7035_s3 + $0x170] sm:$0xff]  ;;  %v55_v17 = vld [vmem:[%s7032_s0 + $0x28] sm:$0xff] }
  0x13   :  { %854 = vmatprep.subr.mxu0 %v7043_v0  ;;  %687 = vperm.xlu0 %4323, %v337_v11   ;;  %v321_v14 = vld [vmem:[%s7035_s3 + $0x178] sm:$0xff]  ;;  %v56_v16 = vld [vmem:[%s7032_s0 + $0x30] sm:$0xff]  ;;  %v335_v18 = vld [vmem:[%s7035_s3 + $0x1e8] sm:$0xff] }
  0x14   :  { %855 = vmatpush1.msra.mxu0 %v63_v4  ;;  %682 = vperm.xlu1 %4324, %v336_v12   ;;  %v319_v19 = vld [vmem:[%s7035_s3 + $0x168] sm:$0xff]  ;;  %v54_v20 = vld [vmem:[%s7032_s0 + $0x20] sm:$0xff]  ;;  %v53_v21 = vld [vmem:[%s7032_s0 + $0x18] sm:$0xff] }
  0x15   :  { %856 = vmatprep.subr.mxu0 %v7043_v0  ;;  %v334_v22 = vld [vmem:[%s7035_s3 + $0x1e0] sm:$0xff]  ;;  %v52_v24 = vld [vmem:[%s7032_s0 + $0x10] sm:$0xff]  ;;  %v51_v25 = vld [vmem:[%s7032_s0 + $0x8] sm:$0xff] }
  0x16   :  { %857 = vmatpush1.msra.mxu0 %v62_v5  ;;  %v318_v23 = vld [vmem:[%s7035_s3 + $0x160] sm:$0xff]  ;;  %v333_v26 = vld [vmem:[%s7035_s3 + $0x1d8] sm:$0xff]  ;;  %v332_v30 = vld [vmem:[%s7035_s3 + $0x1d0] sm:$0xff] }
  0x17   :  { %858 = vmatprep.subr.mxu0 %v7043_v0  ;;  %607 = vperm.xlu0 %4323, %v321_v14   ;;  %v317_v27 = vld [vmem:[%s7035_s3 + $0x158] sm:$0xff]  ;;  %v50_v28 = vld [vmem:[%s7032_s0] sm:$0xff]  ;;  %v316_v31 = vld [vmem:[%s7035_s3 + $0x150] sm:$0xff] }
  0x18   :  { %859 = vmatpush1.msra.mxu0 %v61_v6  ;;  %602 = vperm.xlu1 %4324, %v320_v15   ;;  %v81_v29 = vld [vmem:[%s7033_s1 + $0x78] sm:$0xff]  ;;  %v80_v32 = vld [vmem:[%s7033_s1 + $0x70] sm:$0xff]  ;;  %v79_v33 = vld [vmem:[%s7033_s1 + $0x68] sm:$0xff] }
  0x19   :  { %860 = vmatprep.subr.mxu0 %v7043_v0  ;;  %v331_v34 = vld [vmem:[%s7035_s3 + $0x1c8] sm:$0xff]  ;;  %v78_v36 = vld [vmem:[%s7033_s1 + $0x60] sm:$0xff]  ;;  %v77_v37 = vld [vmem:[%s7033_s1 + $0x58] sm:$0xff] }
  0x1a   :  { %861 = vmatpush1.msra.mxu0 %v60_v7  ;;  %v315_v35 = vld [vmem:[%s7035_s3 + $0x148] sm:$0xff]  ;;  %v330_v38 = vld [vmem:[%s7035_s3 + $0x1c0] sm:$0xff]  ;;  %v76_v40 = vld [vmem:[%s7033_s1 + $0x50] sm:$0xff] }
  0x1b   :  { %862 = vmatprep.subr.mxu0 %v7043_v0  ;;  %677 = vperm.xlu0 %4323, %v335_v18   ;;  %v314_v39 = vld [vmem:[%s7035_s3 + $0x140] sm:$0xff]  ;;  %v75_v41 = vld [vmem:[%s7033_s1 + $0x48] sm:$0xff]  ;;  %v329_v42 = vld [vmem:[%s7035_s3 + $0x1b8] sm:$0xff] }
  0x1c   :  { %863 = vmatpush1.msra.mxu0 %v59_v8  ;;  %597 = vperm.xlu1 %4324, %v319_v19   ;;  %v313_v43 = vld [vmem:[%s7035_s3 + $0x138] sm:$0xff]  ;;  %v74_v44 = vld [vmem:[%s7033_s1 + $0x40] sm:$0xff]  ;;  %v328_v46 = vld [vmem:[%s7035_s3 + $0x1b0] sm:$0xff] }
  0x1d   :  { %864 = vmatprep.subr.mxu0 %v7043_v0  ;;  %v73_v45 = vld [vmem:[%s7033_s1 + $0x38] sm:$0xff]  ;;  %v312_v47 = vld [vmem:[%s7035_s3 + $0x130] sm:$0xff]  ;;  %v71_v49 = vld [vmem:[%s7033_s1 + $0x28] sm:$0xff] }
  0x1e   :  { %865 = vmatpush1.msra.mxu0 %v58_v10  ;;  %v72_v48 = vld [vmem:[%s7033_s1 + $0x30] sm:$0xff]  ;;  %v327_v50 = vld [vmem:[%s7035_s3 + $0x1a8] sm:$0xff]  ;;  %v70_v52 = vld [vmem:[%s7033_s1 + $0x20] sm:$0xff] }
  0x1f   :  { %866 = vmatprep.subr.mxu0 %v7043_v0  ;;  %672 = vperm.xlu0 %4323, %v334_v22   ;;  %v311_v51 = vld [vmem:[%s7035_s3 + $0x128] sm:$0xff]  ;;  %v69_v53 = vld [vmem:[%s7033_s1 + $0x18] sm:$0xff]  ;;  %v326_v54 = vld [vmem:[%s7035_s3 + $0x1a0] sm:$0xff] }
  0x20   :  { %867 = vmatpush1.msra.mxu0 %v57_v13  ;;  %592 = vperm.xlu1 %4324, %v318_v23   ;;  %v310_v55 = vld [vmem:[%s7035_s3 + $0x120] sm:$0xff]  ;;  %v68_v56 = vld [vmem:[%s7033_s1 + $0x10] sm:$0xff]  ;;  %v67_v57 = vld [vmem:[%s7033_s1 + $0x8] sm:$0xff] }
  0x21   :  { %868 = vmatprep.subr.mxu0 %v7043_v0  ;;  %v325_v58 = vld [vmem:[%s7035_s3 + $0x198] sm:$0xff]  ;;  %v66_v60 = vld [vmem:[%s7033_s1] sm:$0xff]  ;;  %v324_v63 = vld [vmem:[%s7035_s3 + $0x190] sm:$0xff] }
  0x22   :  { %869 = vmatpush1.msra.mxu0 %v56_v16  ;;  %v309_v59 = vld [vmem:[%s7035_s3 + $0x118] sm:$0xff]  ;;  %v82_v61 = vld [vmem:[#allocation2] sm:$0xff]  ;;  %v308_v1 = vld [vmem:[%s7035_s3 + $0x110] sm:$0xff] }
  0x23   :  { %870 = vmatprep.subr.mxu0 %v7043_v0  ;;  %667 = vperm.xlu0 %4323, %v333_v26   ;;  %v85_v62 = vld [vmem:[#allocation2 + $0x18] sm:$0xff]  ;;  %v84_v2 = vld [vmem:[#allocation2 + $0x10] sm:$0xff]  ;;  %v87_v3 = vld [vmem:[#allocation2 + $0x28] sm:$0xff] }
  0x24   :  { %871 = vmatpush1.msra.mxu0 %v55_v17  ;;  %587 = vperm.xlu1 %4324, %v317_v27   ;;  %v323_v4 = vld [vmem:[%s7035_s3 + $0x188] sm:$0xff]  ;;  %v86_v6 = vld [vmem:[#allocation2 + $0x20] sm:$0xff]  ;;  %v89_v7 = vld [vmem:[#allocation2 + $0x38] sm:$0xff] }
  0x25   :  { %872 = vmatprep.subr.mxu0 %v7043_v0  ;;  %v307_v5 = vld [vmem:[%s7035_s3 + $0x108] sm:$0xff]  ;;  %v322_v8 = vld [vmem:[%s7035_s3 + $0x180] sm:$0xff]  ;;  %v88_v10 = vld [vmem:[#allocation2 + $0x30] sm:$0xff] }
  0x26   :  { %873 = vmatpush1.msra.mxu0 %v54_v20  ;;  %v306_v9 = vld [vmem:[%s7035_s3 + $0x100] sm:$0xff]  ;;  %v91_v11 = vld [vmem:[#allocation2 + $0x48] sm:$0xff]  ;;  %v93_v15 = vld [vmem:[#allocation2 + $0x58] sm:$0xff] }
  0x27   :  { %874 = vmatprep.subr.mxu0 %v7043_v0  ;;  %662 = vperm.xlu0 %4323, %v332_v30   ;;  %v274_v12 = vld [vmem:[%s7035_s3] sm:$0xff]  ;;  %v275_v13 = vld [vmem:[%s7035_s3 + $0x8] sm:$0xff]  ;;  %v276_v16 = vld [vmem:[%s7035_s3 + $0x10] sm:$0xff] }
  0x28   :  { %875 = vmatpush1.msra.mxu0 %v53_v21  ;;  %582 = vperm.xlu1 %4324, %v316_v31   ;;  %v90_v14 = vld [vmem:[#allocation2 + $0x40] sm:$0xff]  ;;  %v277_v17 = vld [vmem:[%s7035_s3 + $0x18] sm:$0xff]  ;;  %v92_v18 = vld [vmem:[#allocation2 + $0x50] sm:$0xff] }
  0x29   :  { %876 = vmatprep.subr.mxu0 %v7043_v0  ;;  %v95_v19 = vld [vmem:[#allocation2 + $0x68] sm:$0xff]  ;;  %v278_v20 = vld [vmem:[%s7035_s3 + $0x20] sm:$0xff]  ;;  %v97_v23 = vld [vmem:[#allocation2 + $0x78] sm:$0xff] }
  0x2a   :  { %877 = vmatpush1.msra.mxu0 %v52_v24  ;;  %v279_v21 = vld [vmem:[%s7035_s3 + $0x28] sm:$0xff]  ;;  %v94_v22 = vld [vmem:[#allocation2 + $0x60] sm:$0xff]  ;;  %v280_v24 = vld [vmem:[%s7035_s3 + $0x30] sm:$0xff] }
  0x2b   :  { %878 = vmatprep.subr.mxu0 %v7043_v0  ;;  %657 = vperm.xlu0 %4323, %v331_v34   ;;  %v96_v26 = vld [vmem:[#allocation2 + $0x70] sm:$0xff]  ;;  %v99_v27 = vld [vmem:[#allocation2 + $0x88] sm:$0xff]  ;;  %v98_v30 = vld [vmem:[#allocation2 + $0x80] sm:$0xff] }
  0x2c   :  { %879 = vmatpush1.msra.mxu0 %v51_v25  ;;  %577 = vperm.xlu1 %4324, %v315_v35   ;;  %v281_v25 = vld [vmem:[%s7035_s3 + $0x38] sm:$0xff]  ;;  %v100_v34 = vld [vmem:[#allocation2 + $0x90] sm:$0xff]  ;;  %v103_v35 = vld [vmem:[#allocation2 + $0xa8] sm:$0xff] }
  0x2d   :  { %880 = vmatprep.subr.mxu0 %v7043_v0  ;;  %v101_v31 = vld [vmem:[#allocation2 + $0x98] sm:$0xff] }
  0x2e   :  { %881 = vmatpush1.msra.mxu0 %v50_v28  ;;  %v282_v28 = vld [vmem:[%s7035_s3 + $0x40] sm:$0xff] }
  0x2f   :  { %882 = vmatprep.subr.mxu0 %v7043_v0  ;;  %652 = vperm.xlu0 %4323, %v330_v38   ;;  %v102_v38 = vld [vmem:[#allocation2 + $0xa0] sm:$0xff] }
  0x30   :  { %883 = vmatpush2.msra.mxu0 %v81_v29  ;;  %572 = vperm.xlu1 %4324, %v314_v39   ;;  %v283_v29 = vld [vmem:[%s7035_s3 + $0x48] sm:$0xff]  ;;  %v105_v39 = vld [vmem:[#allocation2 + $0xb8] sm:$0xff] }
  0x31   :  { %884 = vmatprep.subr.mxu0 %v7043_v0 }
  0x32   :  { %885 = vmatpush2.msra.mxu0 %v80_v32  ;;  %v284_v32 = vld [vmem:[%s7035_s3 + $0x50] sm:$0xff] }
  0x33   :  { %886 = vmatprep.subr.mxu0 %v7043_v0  ;;  %647 = vperm.xlu0 %4323, %v329_v42   ;;  %v104_v42 = vld [vmem:[#allocation2 + $0xb0] sm:$0xff] }
  0x34   :  { %887 = vmatpush2.msra.mxu0 %v79_v33  ;;  %567 = vperm.xlu1 %4324, %v313_v43   ;;  %v285_v33 = vld [vmem:[%s7035_s3 + $0x58] sm:$0xff]  ;;  %v107_v43 = vld [vmem:[#allocation2 + $0xc8] sm:$0xff] }
  0x35   :  { %888 = vmatprep.subr.mxu0 %v7043_v0 }
  0x36   :  { %889 = vmatpush2.msra.mxu0 %v78_v36  ;;  %v286_v36 = vld [vmem:[%s7035_s3 + $0x60] sm:$0xff] }
  0x37   :  { %890 = vmatprep.subr.mxu0 %v7043_v0  ;;  %642 = vperm.xlu0 %4323, %v328_v46   ;;  %v106_v46 = vld [vmem:[#allocation2 + $0xc0] sm:$0xff] }
  0x38   :  { %891 = vmatpush2.msra.mxu0 %v77_v37  ;;  %562 = vperm.xlu1 %4324, %v312_v47   ;;  %v287_v37 = vld [vmem:[%s7035_s3 + $0x68] sm:$0xff]  ;;  %v109_v47 = vld [vmem:[#allocation2 + $0xd8] sm:$0xff] }
  0x39   :  { %892 = vmatprep.subr.mxu0 %v7043_v0 }
  0x3a   :  { %893 = vmatpush2.msra.mxu0 %v76_v40  ;;  %v288_v40 = vld [vmem:[%s7035_s3 + $0x70] sm:$0xff] }
  0x3b   :  { %894 = vmatprep.subr.mxu0 %v7043_v0  ;;  %637 = vperm.xlu0 %4323, %v327_v50   ;;  %v108_v50 = vld [vmem:[#allocation2 + $0xd0] sm:$0xff] }
  0x3c   :  { %895 = vmatpush2.msra.mxu0 %v75_v41  ;;  %557 = vperm.xlu1 %4324, %v311_v51   ;;  %v289_v41 = vld [vmem:[%s7035_s3 + $0x78] sm:$0xff]  ;;  %v111_v51 = vld [vmem:[#allocation2 + $0xe8] sm:$0xff] }
  0x3d   :  { %896 = vmatprep.subr.mxu0 %v7043_v0 }
  0x3e   :  { %897 = vmatpush2.msra.mxu0 %v74_v44  ;;  %v290_v44 = vld [vmem:[%s7035_s3 + $0x80] sm:$0xff] }
  0x3f   :  { %898 = vmatprep.subr.mxu0 %v7043_v0  ;;  %632 = vperm.xlu0 %4323, %v326_v54   ;;  %v110_v54 = vld [vmem:[#allocation2 + $0xe0] sm:$0xff] }
  0x40   :  { %899 = vmatpush2.msra.mxu0 %v73_v45  ;;  %552 = vperm.xlu1 %4324, %v310_v55   ;;  %v291_v45 = vld [vmem:[%s7035_s3 + $0x88] sm:$0xff]  ;;  %v113_v55 = vld [vmem:[#allocation2 + $0xf8] sm:$0xff] }
  0x41   :  { %900 = vmatprep.subr.mxu0 %v7043_v0 }
  0x42   :  { %901 = vmatpush2.msra.mxu0 %v72_v48  ;;  %v292_v48 = vld [vmem:[%s7035_s3 + $0x90] sm:$0xff] }
  0x43   :  { %902 = vmatprep.subr.mxu0 %v7043_v0  ;;  %627 = vperm.xlu0 %4323, %v325_v58   ;;  %v112_v58 = vld [vmem:[#allocation2 + $0xf0] sm:$0xff] }
  0x44   :  { %903 = vmatpush2.msra.mxu0 %v71_v49  ;;  %547 = vperm.xlu1 %4324, %v309_v59   ;;  %v293_v49 = vld [vmem:[%s7035_s3 + $0x98] sm:$0xff]  ;;  %v115_v59 = vld [vmem:[#allocation2 + $0x108] sm:$0xff] }
  0x45   :  { %904 = vmatprep.subr.mxu0 %v7043_v0 }
  0x46   :  { %905 = vmatpush2.msra.mxu0 %v70_v52  ;;  %v294_v52 = vld [vmem:[%s7035_s3 + $0xa0] sm:$0xff] }
  0x47   :  { %906 = vmatprep.subr.mxu0 %v7043_v0  ;;  %622 = vperm.xlu0 %4323, %v324_v63   ;;  %v117_v63 = vld [vmem:[#allocation2 + $0x118] sm:$0xff] }
  0x48   :  { %907 = vmatpush2.msra.mxu0 %v69_v53  ;;  %542 = vperm.xlu1 %4324, %v308_v1   ;;  %v295_v53 = vld [vmem:[%s7035_s3 + $0xa8] sm:$0xff]  ;;  %v300_v1 = vld [vmem:[%s7035_s3 + $0xd0] sm:$0xff] }
  0x49   :  { %908 = vmatprep.subr.mxu0 %v7043_v0 }
  0x4a   :  { %909 = vmatpush2.msra.mxu0 %v68_v56  ;;  %v296_v56 = vld [vmem:[%s7035_s3 + $0xb0] sm:$0xff] }
  0x4b   :  { %910 = vmatprep.subr.mxu0 %v7043_v0  ;;  %617 = vperm.xlu0 %4323, %v323_v4   ;;  %v119_v4 = vld [vmem:[#allocation2 + $0x128] sm:$0xff] }
  0x4c   :  { %911 = vmatpush2.msra.mxu0 %v67_v57  ;;  %537 = vperm.xlu1 %4324, %v307_v5   ;;  %v297_v57 = vld [vmem:[%s7035_s3 + $0xb8] sm:$0xff]  ;;  %v302_v5 = vld [vmem:[%s7035_s3 + $0xe0] sm:$0xff] }
  0x4d   :  { %912 = vmatprep.subr.mxu0 %v7043_v0 }
  0x4e   :  { %913 = vmatpush2.msra.mxu0 %v66_v60  ;;  %v298_v60 = vld [vmem:[%s7035_s3 + $0xc0] sm:$0xff] }
  0x4f   :  { %915 = vmatmul.mubr.f32.vlgmr.msra.gmra.mxu0 %v82_v61  ;;  %612 = vperm.xlu0 %4323, %v322_v8   ;;  %v299_v61 = vld [vmem:[%s7035_s3 + $0xc8] sm:$0xff]  ;;  %v121_v8 = vld [vmem:[#allocation2 + $0x138] sm:$0xff] }
  0x50   :  { %919 = vmatprep.mubr.f32.mxu0 %v85_v62  ;;  %532 = vperm.xlu1 %4324, %v306_v9   ;;  %v114_v62 = vld [vmem:[#allocation2 + $0x100] sm:$0xff]  ;;  %v304_v9 = vld [vmem:[%s7035_s3 + $0xf0] sm:$0xff] }
  0x53   :  { %920 = vmatmul.mubr.f32.gmra.mxu0 %v84_v2  ;;  %372 = vperm.xlu0 %4323, %v274_v12   ;;  %v301_v2 = vld [vmem:[%s7035_s3 + $0xd8] sm:$0xff]  ;;  %v123_v12 = vld [vmem:[#allocation2 + $0x148] sm:$0xff] }
  0x54   :  { %924 = vmatprep.mubr.f32.mxu0 %v87_v3  ;;  %377 = vperm.xlu1 %4324, %v275_v13   ;;  %v116_v3 = vld [vmem:[#allocation2 + $0x110] sm:$0xff]  ;;  %v122_v13 = vld [vmem:[#allocation2 + $0x140] sm:$0xff] }
  0x57   :  { %925 = vmatmul.mubr.f32.gmra.mxu0 %v86_v6  ;;  %382 = vperm.xlu0 %4323, %v276_v16   ;;  %v303_v6 = vld [vmem:[%s7035_s3 + $0xe8] sm:$0xff] }
  0x58   :  { %929 = vmatprep.mubr.f32.mxu0 %v89_v7  ;;  %387 = vperm.xlu1 %4324, %v277_v17   ;;  %v118_v7 = vld [vmem:[#allocation2 + $0x120] sm:$0xff]  ;;  %v127_v16 = vld [vmem:[#allocation2 + $0x168] sm:$0xff] }
  0x59   :  { %v126_v17 = vld [vmem:[#allocation2 + $0x160] sm:$0xff] }
  0x5b   :  { %930 = vmatmul.mubr.f32.gmra.mxu0 %v88_v10  ;;  %392 = vperm.xlu0 %4323, %v278_v20   ;;  %v305_v10 = vld [vmem:[%s7035_s3 + $0xf8] sm:$0xff]  ;;  %v131_v20 = vld [vmem:[#allocation2 + $0x188] sm:$0xff] }
  0x5c   :  { %934 = vmatprep.mubr.f32.mxu0 %v91_v11  ;;  %397 = vperm.xlu1 %4324, %v279_v21   ;;  %v120_v11 = vld [vmem:[#allocation2 + $0x130] sm:$0xff]  ;;  %v130_v21 = vld [vmem:[#allocation2 + $0x180] sm:$0xff] }
  0x5f   :  { %935 = vmatmul.mubr.f32.gmra.mxu0 %v90_v14  ;;  %402 = vperm.xlu0 %4323, %v280_v24   ;;  %v125_v14 = vld [vmem:[#allocation2 + $0x158] sm:$0xff]  ;;  %v132_v24 = vld [vmem:[#allocation2 + $0x190] sm:$0xff] }
  0x60   :  { %939 = vmatprep.mubr.f32.mxu0 %v93_v15  ;;  %407 = vperm.xlu1 %4324, %v281_v25   ;;  %v124_v15 = vld [vmem:[#allocation2 + $0x150] sm:$0xff]  ;;  %v135_v25 = vld [vmem:[#allocation2 + $0x1a8] sm:$0xff] }
  0x63   :  { %940 = vmatmul.mubr.f32.gmra.mxu0 %v92_v18  ;;  %412 = vperm.xlu0 %4323, %v282_v28   ;;  %v129_v18 = vld [vmem:[#allocation2 + $0x178] sm:$0xff] }
  0x64   :  { %944 = vmatprep.mubr.f32.mxu0 %v95_v19  ;;  %417 = vperm.xlu1 %4324, %v283_v29   ;;  %v128_v19 = vld [vmem:[#allocation2 + $0x170] sm:$0xff]  ;;  %v137_v28 = vld [vmem:[#allocation2 + $0x1b8] sm:$0xff] }
  0x65   :  { %v136_v29 = vld [vmem:[#allocation2 + $0x1b0] sm:$0xff] }
  0x67   :  { %945 = vmatmul.mubr.f32.gmra.mxu0 %v94_v22  ;;  %422 = vperm.xlu0 %4323, %v284_v32   ;;  %v133_v22 = vld [vmem:[#allocation2 + $0x198] sm:$0xff]  ;;  %v138_v32 = vld [vmem:[#allocation2 + $0x1c0] sm:$0xff] }
  0x68   :  { %949 = vmatprep.mubr.f32.mxu0 %v97_v23  ;;  %427 = vperm.xlu1 %4324, %v285_v33   ;;  %v141_v33 = vld [vmem:[#allocation2 + $0x1d8] sm:$0xff] }
  0x6b   :  { %950 = vmatmul.mubr.f32.gmra.mxu0 %v96_v26  ;;  %432 = vperm.xlu0 %4323, %v286_v36   ;;  %v143_v36 = vld [vmem:[#allocation2 + $0x1e8] sm:$0xff] }
  0x6c   :  { %954 = vmatprep.mubr.f32.mxu0 %v99_v27  ;;  %437 = vperm.xlu1 %4324, %v287_v37   ;;  %v134_v27 = vld [vmem:[#allocation2 + $0x1a0] sm:$0xff] }
  0x6d   :  { %v142_v37 = vld [vmem:[#allocation2 + $0x1e0] sm:$0xff] }
  0x6f   :  { %955 = vmatmul.mubr.f32.gmra.mxu0 %v98_v30  ;;  %442 = vperm.xlu0 %4323, %v288_v40   ;;  %v139_v30 = vld [vmem:[#allocation2 + $0x1c8] sm:$0xff]  ;;  %v144_v40 = vld [vmem:[#allocation2 + $0x1f0] sm:$0xff] }
  0x70   :  { %959 = vmatprep.mubr.f32.mxu0 %v101_v31  ;;  %447 = vperm.xlu1 %4324, %v289_v41   ;;  %v147_v41 = vld [vmem:[#allocation2 + $0x208] sm:$0xff] }
  0x73   :  { %960 = vmatmul.mubr.f32.gmra.mxu0 %v100_v34  ;;  %452 = vperm.xlu0 %4323, %v290_v44   ;;  %v149_v44 = vld [vmem:[#allocation2 + $0x218] sm:$0xff] }
  0x74   :  { %964 = vmatprep.mubr.f32.mxu0 %v103_v35  ;;  %457 = vperm.xlu1 %4324, %v291_v45   ;;  %v140_v35 = vld [vmem:[#allocation2 + $0x1d0] sm:$0xff] }
  0x75   :  { %v148_v45 = vld [vmem:[#allocation2 + $0x210] sm:$0xff] }
  0x77   :  { %965 = vmatmul.mubr.f32.gmra.mxu0 %v102_v38  ;;  %462 = vperm.xlu0 %4323, %v292_v48   ;;  %v145_v38 = vld [vmem:[#allocation2 + $0x1f8] sm:$0xff] }
  0x78   :  { %969 = vmatprep.mubr.f32.mxu0 %v105_v39  ;;  %467 = vperm.xlu1 %4324, %v293_v49   ;;  %v150_v49 = vld [vmem:[#allocation2 + $0x220] sm:$0xff] }
  0x7b   :  { %970 = vmatmul.mubr.f32.gmra.mxu0 %v104_v42  ;;  %472 = vperm.xlu0 %4323, %v294_v52  }
  0x7c   :  { %974 = vmatprep.mubr.f32.mxu0 %v107_v43  ;;  %477 = vperm.xlu1 %4324, %v295_v53   ;;  %v146_v43 = vld [vmem:[#allocation2 + $0x200] sm:$0xff]  ;;  %v152_v53 = vld [vmem:[#allocation2 + $0x230] sm:$0xff] }
  0x7f   :  { %975 = vmatmul.mubr.f32.gmra.mxu0 %v106_v46  ;;  %482 = vperm.xlu0 %4323, %v296_v56   ;;  %v352_v46 = vld [vmem:[%s7035_s3 + $0x270] sm:$0xff]  ;;  %v154_v56 = vld [vmem:[#allocation2 + $0x240] sm:$0xff] }
  0x80   :  { %979 = vmatprep.mubr.f32.mxu0 %v109_v47  ;;  %487 = vperm.xlu1 %4324, %v297_v57   ;;  %v151_v47 = vld [vmem:[#allocation2 + $0x228] sm:$0xff]  ;;  %v353_v57 = vld [vmem:[%s7035_s3 + $0x278] sm:$0xff] }
  0x83   :  { %980 = vmatmul.mubr.f32.gmra.mxu0 %v108_v50  ;;  %492 = vperm.xlu0 %4323, %v298_v60   ;;  %v350_v50 = vld [vmem:[%s7035_s3 + $0x260] sm:$0xff] }
  0x84   :  { %984 = vmatprep.mubr.f32.mxu0 %v111_v51  ;;  %497 = vperm.xlu1 %4324, %v299_v61   ;;  %v153_v51 = vld [vmem:[#allocation2 + $0x238] sm:$0xff]  ;;  %v156_v61 = vld [vmem:[#allocation2 + $0x250] sm:$0xff] }
  0x87   :  { %985 = vmatmul.mubr.f32.gmra.mxu0 %v110_v54  ;;  %502 = vperm.xlu0 %4323, %v300_v1   ;;  %v349_v54 = vld [vmem:[%s7035_s3 + $0x258] sm:$0xff]  ;;  %v159_v1 = vld [vmem:[#allocation2 + $0x268] sm:$0xff] }
  0x88   :  { %989 = vmatprep.mubr.f32.mxu0 %v113_v55  ;;  %507 = vperm.xlu1 %4324, %v301_v2   ;;  %v155_v55 = vld [vmem:[#allocation2 + $0x248] sm:$0xff] }
  0x8b   :  { %990 = vmatmul.mubr.f32.gmra.mxu0 %v112_v58  ;;  %512 = vperm.xlu0 %4323, %v302_v5   ;;  %v347_v58 = vld [vmem:[%s7035_s3 + $0x248] sm:$0xff]  ;;  %v345_v5 = vld [vmem:[%s7035_s3 + $0x238] sm:$0xff] }
  0x8c   :  { %994 = vmatprep.mubr.f32.mxu0 %v115_v59  ;;  %517 = vperm.xlu1 %4324, %v303_v6   ;;  %v157_v59 = vld [vmem:[#allocation2 + $0x258] sm:$0xff] }
  0x8d   :  { %v161_v6 = vld [vmem:[#allocation2 + $0x278] sm:$0xff] }
  0x8e   :  { %v4979_v23 = vpop.permute.xlu0 %687 }
  0x8f   :  { %995 = vmatmul.mubr.f32.gmra.mxu0 %v114_v62  ;;  %522 = vperm.xlu0 %4323, %v304_v9   ;;  %v351_v62 = vld [vmem:[%s7035_s3 + $0x268] sm:$0xff]  ;;  %v341_v9 = vld [vmem:[%s7035_s3 + $0x218] sm:$0xff] }
  0x90   :  { %999 = vmatprep.mubr.f32.mxu0 %v117_v63  ;;  %527 = vperm.xlu1 %4324, %v305_v10   ;;  %v346_v63 = vld [vmem:[%s7035_s3 + $0x240] sm:$0xff]  ;;  %v163_v10 = vld [vmem:[#allocation2 + $0x288] sm:$0xff] }
  0x92   :  { %v4981_v26 = vpop.permute.xlu0 %607 }
  0x93   :  { %1000 = vmatmul.mubr.f32.gmra.mxu0 %v116_v3  ;;  %762 = vperm.xlu0 %4323, %v352_v46   ;;  %v158_v3 = vld [vmem:[#allocation2 + $0x260] sm:$0xff] }
  0x94   :  { %1004 = vmatprep.mubr.f32.mxu0 %v119_v4  ;;  %767 = vperm.xlu1 %4324, %v353_v57   ;;  %v348_v4 = vld [vmem:[%s7035_s3 + $0x250] sm:$0xff]  ;;  %v174_v46 = vld [vmem:[#allocation2 + $0x2e0] sm:$0xff] }
  0x95   :  { %v178_v57 = vld [vmem:[#allocation2 + $0x300] sm:$0xff] }
  0x96   :  { %v4983_v31 = vpop.permute.xlu0 %677 }
  0x97   :  { %1005 = vmatmul.mubr.f32.gmra.mxu0 %v118_v7  ;;  %752 = vperm.xlu0 %4323, %v350_v50   ;;  %v160_v7 = vld [vmem:[#allocation2 + $0x270] sm:$0xff]  ;;  %v177_v50 = vld [vmem:[#allocation2 + $0x2f8] sm:$0xff] }
  0x98   :  { %1009 = vmatprep.mubr.f32.mxu0 %v121_v8  ;;  %757 = vperm.xlu1 %4324, %v351_v62   ;;  %v344_v8 = vld [vmem:[%s7035_s3 + $0x230] sm:$0xff]  ;;  %v181_v62 = vld [vmem:[#allocation2 + $0x318] sm:$0xff] }
  0x9a   :  { %v4985_v34 = vpop.permute.xlu0 %672 }
  0x9b   :  { %1010 = vmatmul.mubr.f32.gmra.mxu0 %v120_v11  ;;  %747 = vperm.xlu0 %4323, %v349_v54   ;;  %v361_v54 = vld [vmem:[%s7035_s3 + $0x2b8] sm:$0xff] }
  0x9c   :  { %1014 = vmatprep.mubr.f32.mxu0 %v123_v12  ;;  %742 = vperm.xlu1 %4324, %v348_v4   ;;  %v162_v12 = vld [vmem:[#allocation2 + $0x280] sm:$0xff]  ;;  %v357_v4 = vld [vmem:[%s7035_s3 + $0x298] sm:$0xff] }
  0x9e   :  { %v4987_v39 = vpop.permute.xlu0 %667 }
  0x9f   :  { %1015 = vmatmul.mubr.f32.gmra.mxu0 %v122_v13  ;;  %737 = vperm.xlu0 %4323, %v347_v58   ;;  %v343_v13 = vld [vmem:[%s7035_s3 + $0x228] sm:$0xff] }
  0xa0   :  { %1019 = vmatprep.mubr.f32.mxu0 %v125_v14  ;;  %722 = vperm.xlu1 %4324, %v344_v8   ;;  %v340_v14 = vld [vmem:[%s7035_s3 + $0x210] sm:$0xff]  ;;  %v359_v58 = vld [vmem:[%s7035_s3 + $0x2a8] sm:$0xff]  ;;  %v182_v8 = vld [vmem:[#allocation2 + $0x320] sm:$0xff] }
  0xa2   :  { %v4989_v42 = vpop.permute.xlu0 %662 }
  0xa3   :  { %1020 = vmatmul.mubr.f32.gmra.mxu0 %v124_v15  ;;  %732 = vperm.xlu0 %4323, %v346_v63   ;;  %v165_v15 = vld [vmem:[#allocation2 + $0x298] sm:$0xff] }
  0xa4   :  { %1024 = vmatprep.mubr.f32.mxu0 %v127_v16  ;;  %717 = vperm.xlu1 %4324, %v343_v13   ;;  %v184_v13 = vld [vmem:[#allocation2 + $0x330] sm:$0xff] }
  0xa6   :  { %v4994_v48 = vpop.permute.xlu0 %657 }
  0xa7   :  { %1025 = vmatmul.mubr.f32.gmra.mxu0 %v126_v17  ;;  %727 = vperm.xlu0 %4323, %v345_v5   ;;  %v164_v17 = vld [vmem:[#allocation2 + $0x290] sm:$0xff] }
  0xa8   :  { %1029 = vmatprep.mubr.f32.mxu0 %v129_v18  ;;  %v342_v18 = vld [vmem:[%s7035_s3 + $0x220] sm:$0xff] }
  0xa9   :  { %712 = vperm.xlu1 %4324, %v342_v18   ;;  %v186_v18 = vld [vmem:[#allocation2 + $0x340] sm:$0xff] }
  0xaa   :  { %v4999_v52 = vpop.permute.xlu0 %652 }
  0xab   :  { %1030 = vmatmul.mubr.f32.gmra.mxu0 %v128_v19  ;;  %707 = vperm.xlu0 %4323, %v341_v9   ;;  %v339_v19 = vld [vmem:[%s7035_s3 + $0x208] sm:$0xff] }
  0xac   :  { %1034 = vmatprep.mubr.f32.mxu0 %v131_v20  ;;  %v167_v20 = vld [vmem:[#allocation2 + $0x2a8] sm:$0xff] }
  0xae   :  { %v5010_v60 = vpop.permute.xlu0 %647 }
  0xaf   :  { %1035 = vmatmul.mubr.f32.gmra.mxu0 %v130_v21  ;;  %702 = vperm.xlu0 %4323, %v340_v14   ;;  %v166_v21 = vld [vmem:[#allocation2 + $0x2a0] sm:$0xff] }
  0xb0   :  { %1039 = vmatprep.mubr.f32.mxu0 %v133_v22  ;;  %v338_v22 = vld [vmem:[%s7035_s3 + $0x200] sm:$0xff] }
  0xb1   :  { %692 = vperm.xlu1 %4324, %v338_v22   ;;  %v188_v22 = vld [vmem:[#allocation2 + $0x350] sm:$0xff] }
  0xb2   :  { %v5018_v2 = vpop.permute.xlu0 %642 }
  0xb3   :  { %1040 = vmatmul.mubr.f32.gmra.mxu0 %v132_v24  ;;  %697 = vperm.xlu0 %4323, %v339_v19   ;;  %v368_v24 = vld [vmem:[%s7035_s3 + $0x2f0] sm:$0xff] }
  0xb4   :  { %1044 = vmatprep.mubr.f32.mxu0 %v135_v25  ;;  %v169_v25 = vld [vmem:[#allocation2 + $0x2b8] sm:$0xff] }
  0xb6   :  { %v5032_v11 = vpop.permute.xlu0 %637 }
  0xb7   :  { %1045 = vmatmul.mubr.f32.gmra.mxu0 %v134_v27  ;;  %842 = vperm.xlu0 %4323, %v368_v24  }
  0xb8   :  { %1049 = vmatprep.mubr.f32.mxu0 %v137_v28  ;;  %v168_v28 = vld [vmem:[#allocation2 + $0x2b0] sm:$0xff] }
  0xba   :  { %v5040_v16 = vpop.permute.xlu0 %632 }
  0xbb   :  { %1050 = vmatmul.mubr.f32.gmra.mxu0 %v136_v29  ;;  %v369_v29 = vld [vmem:[%s7035_s3 + $0x2f8] sm:$0xff] }
  0xbc   :  { %1054 = vmatprep.mubr.f32.mxu0 %v139_v30  ;;  %v366_v30 = vld [vmem:[%s7035_s3 + $0x2e0] sm:$0xff]  ;;  %847 = vperm.xlu1 %4324, %v369_v29  }
  0xbd   :  { %832 = vperm.xlu0 %4323, %v366_v30   ;;  %v190_v29 = vld [vmem:[#allocation2 + $0x360] sm:$0xff] }
  0xbe   :  { %v5054_v27 = vpop.permute.xlu0 %627 }
  0xbf   :  { %1055 = vmatmul.mubr.f32.gmra.mxu0 %v138_v32  ;;  %v171_v32 = vld [vmem:[#allocation2 + $0x2c8] sm:$0xff] }
  0xc0   :  { %1059 = vmatprep.mubr.f32.mxu0 %v141_v33 }
  0xc2   :  { %v5062_v33 = vpop.permute.xlu0 %622 }
  0xc3   :  { %1060 = vmatmul.mubr.f32.gmra.mxu0 %v140_v35  ;;  %v170_v35 = vld [vmem:[#allocation2 + $0x2c0] sm:$0xff] }
  0xc4   :  { %1064 = vmatprep.mubr.f32.mxu0 %v143_v36  ;;  %v367_v36 = vld [vmem:[%s7035_s3 + $0x2e8] sm:$0xff] }
  0xc5   :  { %837 = vperm.xlu1 %4324, %v367_v36   ;;  %v192_v36 = vld [vmem:[#allocation2 + $0x370] sm:$0xff] }
  0xc7   :  { %1065 = vmatmul.mubr.f32.gmra.mxu0 %v142_v37  ;;  %v364_v37 = vld [vmem:[%s7035_s3 + $0x2d0] sm:$0xff] }
  0xc8   :  { %1069 = vmatprep.mubr.f32.mxu0 %v145_v38  ;;  %v173_v38 = vld [vmem:[#allocation2 + $0x2d8] sm:$0xff]  ;;  %822 = vperm.xlu0 %4323, %v364_v37  }
  0xcb   :  { %1070 = vmatmul.mubr.f32.gmra.mxu0 %v144_v40  ;;  %v172_v40 = vld [vmem:[#allocation2 + $0x2d0] sm:$0xff] }
  0xcc   :  { %1074 = vmatprep.mubr.f32.mxu0 %v147_v41  ;;  %v365_v41 = vld [vmem:[%s7035_s3 + $0x2d8] sm:$0xff] }
  0xcd   :  { %827 = vperm.xlu1 %4324, %v365_v41   ;;  %v194_v41 = vld [vmem:[#allocation2 + $0x380] sm:$0xff] }
  0xcf   :  { %1075 = vmatmul.mubr.f32.gmra.mxu0 %v146_v43  ;;  %v362_v43 = vld [vmem:[%s7035_s3 + $0x2c0] sm:$0xff] }
  0xd0   :  { %1079 = vmatprep.mubr.f32.mxu0 %v149_v44  ;;  %v175_v44 = vld [vmem:[#allocation2 + $0x2e8] sm:$0xff]  ;;  %812 = vperm.xlu0 %4323, %v362_v43  }
  0xd3   :  { %1080 = vmatmul.mubr.f32.gmra.mxu0 %v148_v45  ;;  %v5076_v45 = vpop.permute.xlu0 %617 }
  0xd4   :  { %1084 = vmatprep.mubr.f32.mxu0 %v151_v47  ;;  %7079 = vst [vmem:[#allocation8_spill] sm:$0xff] %v5076_v45  ;;  %v363_v47 = vld [vmem:[%s7035_s3 + $0x2c8] sm:$0xff] }
  0xd5   :  { %817 = vperm.xlu1 %4324, %v363_v47   ;;  %v196_v47 = vld [vmem:[#allocation2 + $0x390] sm:$0xff] }
  0xd7   :  { %1085 = vmatmul.mubr.f32.gmra.mxu0 %v150_v49  ;;  %v360_v49 = vld [vmem:[%s7035_s3 + $0x2b0] sm:$0xff] }
  0xd8   :  { %1089 = vmatprep.mubr.f32.mxu0 %v153_v51  ;;  %802 = vperm.xlu0 %4323, %v360_v49   ;;  %v5084_v51 = vpop.permute.xlu0 %612 }
  0xd9   :  { %7080 = vst [vmem:[#allocation9_spill] sm:$0xff] %v5084_v51  ;;  %807 = vperm.xlu1 %4324, %v361_v54   ;;  %v198_v54 = vld [vmem:[#allocation2 + $0x3a0] sm:$0xff] }
  0xdb   :  { %1090 = vmatmul.mubr.f32.gmra.mxu0 %v152_v53  ;;  %v176_v53 = vld [vmem:[#allocation2 + $0x2f0] sm:$0xff] }
  0xdc   :  { %1094 = vmatprep.mubr.f32.mxu0 %v155_v55  ;;  %v358_v55 = vld [vmem:[%s7035_s3 + $0x2a0] sm:$0xff] }
  0xdd   :  { %792 = vperm.xlu0 %4323, %v358_v55   ;;  %797 = vperm.xlu1 %4324, %v359_v58   ;;  %v200_v58 = vld [vmem:[#allocation2 + $0x3b0] sm:$0xff] }
  0xdf   :  { %1095 = vmatmul.mubr.f32.gmra.mxu0 %v154_v56  ;;  %v179_v56 = vld [vmem:[#allocation2 + $0x308] sm:$0xff] }
  0xe0   :  { %1099 = vmatprep.mubr.f32.mxu0 %v157_v59  ;;  %v356_v59 = vld [vmem:[%s7035_s3 + $0x290] sm:$0xff] }
  0xe1   :  { %782 = vperm.xlu0 %4323, %v356_v59   ;;  %787 = vperm.xlu1 %4324, %v357_v4   ;;  %v205_v4 = vld [vmem:[#allocation2 + $0x3d8] sm:$0xff] }
  0xe3   :  { %1100 = vmatmul.mubr.f32.gmra.mxu0 %v156_v61  ;;  %v373_v61 = vpop.permute.xlu0 %372 }
  0xe4   :  { %1104 = vmatprep.mubr.f32.mxu0 %v159_v1 }
  0xe7   :  { %1105 = vmatmul.mubr.f32.gmra.mxu0 %v158_v3  ;;  %v180_v3 = vld [vmem:[#allocation2 + $0x310] sm:$0xff] }
  0xe8   :  { %1109 = vmatprep.mubr.f32.mxu0 %v161_v6  ;;  %v183_v6 = vld [vmem:[#allocation2 + $0x328] sm:$0xff] }
  0xeb   :  { %1110 = vmatmul.mubr.f32.gmra.mxu0 %v160_v7 }
  0xec   :  { %1114 = vmatprep.mubr.f32.mxu0 %v163_v10  ;;  %v185_v10 = vld [vmem:[#allocation2 + $0x338] sm:$0xff] }
  0xef   :  { %1115 = vmatmul.mubr.f32.gmra.mxu0 %v162_v12 }
  0xf0   :  { %1119 = vmatprep.mubr.f32.mxu0 %v165_v15  ;;  %v187_v15 = vld [vmem:[#allocation2 + $0x348] sm:$0xff] }
  0xf3   :  { %1120 = vmatmul.mubr.f32.gmra.mxu0 %v164_v17 }
  0xf4   :  { %1124 = vmatprep.mubr.f32.mxu0 %v167_v20  ;;  %v189_v20 = vld [vmem:[#allocation2 + $0x358] sm:$0xff] }
  0xf7   :  { %1125 = vmatmul.mubr.f32.gmra.mxu0 %v166_v21 }
  0xf8   :  { %1129 = vmatprep.mubr.f32.mxu0 %v169_v25  ;;  %v191_v25 = vld [vmem:[#allocation2 + $0x368] sm:$0xff] }
  0xfb   :  { %1130 = vmatmul.mubr.f32.gmra.mxu0 %v168_v28 }
  0xfc   :  { %1134 = vmatprep.mubr.f32.mxu0 %v171_v32  ;;  %v193_v32 = vld [vmem:[#allocation2 + $0x378] sm:$0xff] }
  0xff   :  { %1135 = vmatmul.mubr.f32.gmra.mxu0 %v170_v35 }
 0x100   :  { %1139 = vmatprep.mubr.f32.mxu0 %v173_v38  ;;  %v195_v38 = vld [vmem:[#allocation2 + $0x388] sm:$0xff] }
 0x103   :  { %1140 = vmatmul.mubr.f32.gmra.mxu0 %v172_v40 }
 0x104   :  { %1144 = vmatprep.mubr.f32.mxu0 %v175_v44  ;;  %v197_v44 = vld [vmem:[#allocation2 + $0x398] sm:$0xff] }
 0x107   :  { %1145 = vmatmul.mubr.f32.gmra.mxu0 %v174_v46 }
 0x108   :  { %1149 = vmatprep.mubr.f32.mxu0 %v177_v50  ;;  %v199_v50 = vld [vmem:[#allocation2 + $0x3a8] sm:$0xff] }
 0x10b   :  { %1150 = vmatmul.mubr.f32.gmra.mxu0 %v176_v53 }
 0x10c   :  { %1154 = vmatprep.mubr.f32.mxu0 %v179_v56  ;;  %v201_v56 = vld [vmem:[#allocation2 + $0x3b8] sm:$0xff] }
 0x10f   :  { %v916_v63 = vpop.f32.mrf.mxu0  ;;  %1155 = vmatmul.mubr.f32.gmra.mxu0 %v178_v57 }
 0x110   :  { %v5098_v1 = vadd.f32 %v916_v63, %v373_v61  ;;  %1159 = vmatprep.mubr.f32.mxu0 %v181_v62  ;;  %v203_v61 = vld [vmem:[#allocation2 + $0x3c8] sm:$0xff]  ;;  %v202_v63 = vld [vmem:[#allocation2 + $0x3c0] sm:$0xff] }
 0x111   :  { %v918_v5 = vpop.f32.mrf.mxu0 }
 0x112   :  { %7081 = vst [vmem:[#allocation10_spill] sm:$0xff] %v5098_v1  ;;  %3995 = vmatprep.mubr.msk.f32.mxu1 %vm1395_vm0, %v5098_v1 }
 0x113   :  { %v5105_v7 = vpop.f32.mrf.mxu0  ;;  %1160 = vmatmul.mubr.f32.gmra.mxu0 %v180_v3 }
 0x114   :  { %7082 = vst [vmem:[#allocation11_spill] sm:$0xff] %v5105_v7  ;;  %1164 = vmatprep.mubr.f32.mxu0 %v183_v6  ;;  %v204_v6 = vld [vmem:[#allocation2 + $0x3d0] sm:$0xff] }
 0x115   :  { %v923_v9 = vpop.f32.mrf.mxu0 }
 0x116   :  { %v207_v9 = vld [vmem:[#allocation2 + $0x3e8] sm:$0xff] }
 0x117   :  { %v5107_v12 = vpop.f32.mrf.mxu0  ;;  %1165 = vmatmul.mubr.f32.gmra.mxu0 %v182_v8 }
 0x118   :  { %7083 = vst [vmem:[#allocation12_spill] sm:$0xff] %v5107_v12  ;;  %1169 = vmatprep.mubr.f32.mxu0 %v185_v10 }
 0x119   :  { %v928_v14 = vpop.f32.mrf.mxu0 }
 0x11b   :  { %v5109_v17 = vpop.f32.mrf.mxu0  ;;  %1170 = vmatmul.mubr.f32.gmra.mxu0 %v184_v13  ;;  %v206_v13 = vld [vmem:[#allocation2 + $0x3e0] sm:$0xff] }
 0x11c   :  { %7084 = vst [vmem:[#allocation13_spill] sm:$0xff] %v5109_v17  ;;  %1174 = vmatprep.mubr.f32.mxu0 %v187_v15  ;;  %v209_v15 = vld [vmem:[#allocation2 + $0x3f8] sm:$0xff] }
 0x11d   :  { %v933_v19 = vpop.f32.mrf.mxu0 }
 0x11e   :  { %v208_v19 = vld [vmem:[#allocation2 + $0x3f0] sm:$0xff] }
 0x11f   :  { %v5111_v21 = vpop.f32.mrf.mxu0  ;;  %1175 = vmatmul.mubr.f32.gmra.mxu0 %v186_v18 }
 0x120   :  { %7085 = vst [vmem:[#allocation14_spill] sm:$0xff] %v5111_v21  ;;  %1179 = vmatprep.mubr.f32.mxu0 %v189_v20 }
 0x121   :  { %v938_v24 = vpop.f32.mrf.mxu0 }
 0x123   :  { %v5113_v28 = vpop.f32.mrf.mxu0  ;;  %1180 = vmatmul.mubr.f32.gmra.mxu0 %v188_v22  ;;  %v211_v22 = vld [vmem:[#allocation2 + $0x408] sm:$0xff] }
 0x124   :  { %7086 = vst [vmem:[#allocation15_spill] sm:$0xff] %v5113_v28  ;;  %1184 = vmatprep.mubr.f32.mxu0 %v191_v25  ;;  %v210_v25 = vld [vmem:[#allocation2 + $0x400] sm:$0xff] }
 0x125   :  { %v943_v30 = vpop.f32.mrf.mxu0 }
 0x126   :  { %v213_v30 = vld [vmem:[#allocation2 + $0x418] sm:$0xff] }
 0x127   :  { %v5115_v35 = vpop.f32.mrf.mxu0  ;;  %1185 = vmatmul.mubr.f32.gmra.mxu0 %v190_v29 }
 0x128   :  { %7087 = vst [vmem:[#allocation16_spill] sm:$0xff] %v5115_v35  ;;  %1189 = vmatprep.mubr.f32.mxu0 %v193_v32 }
 0x129   :  { %v948_v37 = vpop.f32.mrf.mxu0 }
 0x12b   :  { %v5117_v40 = vpop.f32.mrf.mxu0  ;;  %1190 = vmatmul.mubr.f32.gmra.mxu0 %v192_v36  ;;  %v212_v36 = vld [vmem:[#allocation2 + $0x410] sm:$0xff] }
 0x12c   :  { %7088 = vst [vmem:[#allocation17_spill] sm:$0xff] %v5117_v40  ;;  %1194 = vmatprep.mubr.f32.mxu0 %v195_v38  ;;  %v215_v38 = vld [vmem:[#allocation2 + $0x428] sm:$0xff] }
 0x12d   :  { %v953_v43 = vpop.f32.mrf.mxu0 }
 0x12e   :  { %v214_v43 = vld [vmem:[#allocation2 + $0x420] sm:$0xff] }
 0x12f   :  { %v5119_v46 = vpop.f32.mrf.mxu0  ;;  %1195 = vmatmul.mubr.f32.gmra.mxu0 %v194_v41 }
 0x130   :  { %7089 = vst [vmem:[#allocation18_spill] sm:$0xff] %v5119_v46  ;;  %1199 = vmatprep.mubr.f32.mxu0 %v197_v44 }
 0x131   :  { %v958_v49 = vpop.f32.mrf.mxu0 }
 0x133   :  { %v5121_v53 = vpop.f32.mrf.mxu0  ;;  %1200 = vmatmul.mubr.f32.gmra.mxu0 %v196_v47  ;;  %v217_v47 = vld [vmem:[#allocation2 + $0x438] sm:$0xff] }
 0x134   :  { %7090 = vst [vmem:[#allocation19_spill] sm:$0xff] %v5121_v53  ;;  %1204 = vmatprep.mubr.f32.mxu0 %v199_v50  ;;  %v216_v50 = vld [vmem:[#allocation2 + $0x430] sm:$0xff] }
 0x135   :  { %v963_v55 = vpop.f32.mrf.mxu0 }
 0x136   :  { %v219_v55 = vld [vmem:[#allocation2 + $0x448] sm:$0xff] }
 0x137   :  { %v5123_v57 = vpop.f32.mrf.mxu0  ;;  %1205 = vmatmul.mubr.f32.gmra.mxu0 %v198_v54 }
 0x138   :  { %7091 = vst [vmem:[#allocation20_spill] sm:$0xff] %v5123_v57  ;;  %1209 = vmatprep.mubr.f32.mxu0 %v201_v56 }
 0x139   :  { %v968_v59 = vpop.f32.mrf.mxu0 }
 0x13b   :  { %v5125_v62 = vpop.f32.mrf.mxu0  ;;  %1210 = vmatmul.mubr.f32.gmra.mxu0 %v200_v58  ;;  %v218_v58 = vld [vmem:[#allocation2 + $0x440] sm:$0xff] }
 0x13c   :  { %7092 = vst [vmem:[#allocation21_spill] sm:$0xff] %v5125_v62  ;;  %1214 = vmatprep.mubr.f32.mxu0 %v203_v61  ;;  %v221_v61 = vld [vmem:[#allocation2 + $0x458] sm:$0xff] }
 0x13d   :  { %v973_v3 = vpop.f32.mrf.mxu0 }
 0x13e   :  { %v220_v3 = vld [vmem:[#allocation2 + $0x450] sm:$0xff] }
 0x13f   :  { %v5127_v5 = vpop.f32.mrf.mxu0  ;;  %1215 = vmatmul.mubr.f32.gmra.mxu0 %v202_v63 }
 0x140   :  { %7093 = vst [vmem:[#allocation22_spill] sm:$0xff] %v5127_v5  ;;  %1219 = vmatprep.mubr.f32.mxu0 %v205_v4 }
 0x141   :  { %v978_v8 = vpop.f32.mrf.mxu0 }
 0x143   :  { %v5129_v10 = vpop.f32.mrf.mxu0  ;;  %1220 = vmatmul.mubr.f32.gmra.mxu0 %v204_v6  ;;  %v223_v6 = vld [vmem:[#allocation2 + $0x468] sm:$0xff] }
 0x144   :  { %7094 = vst [vmem:[#allocation23_spill] sm:$0xff] %v5129_v10  ;;  %1224 = vmatprep.mubr.f32.mxu0 %v207_v9  ;;  %v222_v9 = vld [vmem:[#allocation2 + $0x460] sm:$0xff] }
 0x145   :  { %v983_v14 = vpop.f32.mrf.mxu0 }
 0x146   :  { %v225_v14 = vld [vmem:[#allocation2 + $0x478] sm:$0xff] }
 0x147   :  { %v5131_v18 = vpop.f32.mrf.mxu0  ;;  %1225 = vmatmul.mubr.f32.gmra.mxu0 %v206_v13 }
 0x148   :  { %7095 = vst [vmem:[#allocation24_spill] sm:$0xff] %v5131_v18  ;;  %1229 = vmatprep.mubr.f32.mxu0 %v209_v15 }
 0x149   :  { %v988_v20 = vpop.f32.mrf.mxu0 }
 0x14b   :  { %v5133_v24 = vpop.f32.mrf.mxu0  ;;  %1230 = vmatmul.mubr.f32.gmra.mxu0 %v208_v19  ;;  %v224_v19 = vld [vmem:[#allocation2 + $0x470] sm:$0xff] }
 0x14c   :  { %7096 = vst [vmem:[#allocation25_spill] sm:$0xff] %v5133_v24  ;;  %1234 = vmatprep.mubr.f32.mxu0 %v211_v22  ;;  %v227_v22 = vld [vmem:[#allocation2 + $0x488] sm:$0xff] }
 0x14d   :  { %v993_v29 = vpop.f32.mrf.mxu0 }
 0x14e   :  { %v226_v29 = vld [vmem:[#allocation2 + $0x480] sm:$0xff] }
 0x14f   :  { %v5135_v32 = vpop.f32.mrf.mxu0  ;;  %1235 = vmatmul.mubr.f32.gmra.mxu0 %v210_v25 }
 0x150   :  { %7097 = vst [vmem:[#allocation26_spill] sm:$0xff] %v5135_v32  ;;  %1239 = vmatprep.mubr.f32.mxu0 %v213_v30 }
 0x151   :  { %v998_v37 = vpop.f32.mrf.mxu0 }
 0x153   :  { %v5137_v41 = vpop.f32.mrf.mxu0  ;;  %1240 = vmatmul.mubr.f32.gmra.mxu0 %v212_v36  ;;  %v229_v36 = vld [vmem:[#allocation2 + $0x498] sm:$0xff] }
 0x154   :  { %7098 = vst [vmem:[#allocation27_spill] sm:$0xff] %v5137_v41  ;;  %1244 = vmatprep.mubr.f32.mxu0 %v215_v38  ;;  %v228_v38 = vld [vmem:[#allocation2 + $0x490] sm:$0xff] }
 0x155   :  { %v1003_v44 = vpop.f32.mrf.mxu0 }
 0x156   :  { %v231_v44 = vld [vmem:[#allocation2 + $0x4a8] sm:$0xff] }
 0x157   :  { %v5139_v49 = vpop.f32.mrf.mxu0  ;;  %1245 = vmatmul.mubr.f32.gmra.mxu0 %v214_v43 }
 0x158   :  { %7099 = vst [vmem:[#allocation28_spill] sm:$0xff] %v5139_v49  ;;  %1249 = vmatprep.mubr.f32.mxu0 %v217_v47  ;;  %v273_v49 = vld [vmem:[#allocation2 + $0x5f8] sm:$0xff] }
 0x159   :  { %v1008_v54 = vpop.f32.mrf.mxu0 }
 0x15b   :  { %v5141_v56 = vpop.f32.mrf.mxu0  ;;  %1250 = vmatmul.mubr.f32.gmra.mxu0 %v216_v50  ;;  %v230_v50 = vld [vmem:[#allocation2 + $0x4a0] sm:$0xff] }
 0x15c   :  { %7100 = vst [vmem:[#allocation29_spill] sm:$0xff] %v5141_v56  ;;  %1254 = vmatprep.mubr.f32.mxu0 %v219_v55  ;;  %v233_v55 = vld [vmem:[#allocation2 + $0x4b8] sm:$0xff] }
 0x15d   :  { %v1013_v59 = vpop.f32.mrf.mxu0 }
 0x15e   :  { %v232_v59 = vld [vmem:[#allocation2 + $0x4b0] sm:$0xff] }
 0x15f   :  { %v5143_v63 = vpop.f32.mrf.mxu0  ;;  %1255 = vmatmul.mubr.f32.gmra.mxu0 %v218_v58 }
 0x160   :  { %7101 = vst [vmem:[#allocation30_spill] sm:$0xff] %v5143_v63  ;;  %1259 = vmatprep.mubr.f32.mxu0 %v221_v61 }
 0x161   :  { %v1018_v4 = vpop.f32.mrf.mxu0 }
 0x163   :  { %v5145_v8 = vpop.f32.mrf.mxu0  ;;  %1260 = vmatmul.mubr.f32.gmra.mxu0 %v220_v3  ;;  %v235_v3 = vld [vmem:[#allocation2 + $0x4c8] sm:$0xff] }
 0x164   :  { %7102 = vst [vmem:[#allocation31_spill] sm:$0xff] %v5145_v8  ;;  %1264 = vmatprep.mubr.f32.mxu0 %v223_v6  ;;  %v234_v6 = vld [vmem:[#allocation2 + $0x4c0] sm:$0xff]  ;;  %v268_v8 = vld [vmem:[#allocation2 + $0x5d0] sm:$0xff] }
 0x165   :  { %v1023_v13 = vpop.f32.mrf.mxu0 }
 0x166   :  { %v237_v13 = vld [vmem:[#allocation2 + $0x4d8] sm:$0xff] }
 0x167   :  { %v5147_v15 = vpop.f32.mrf.mxu0  ;;  %1265 = vmatmul.mubr.f32.gmra.mxu0 %v222_v9 }
 0x168   :  { %7103 = vst [vmem:[#allocation32_spill] sm:$0xff] %v5147_v15  ;;  %1269 = vmatprep.mubr.f32.mxu0 %v225_v14  ;;  %v269_v15 = vld [vmem:[#allocation2 + $0x5d8] sm:$0xff] }
 0x169   :  { %v1028_v20 = vpop.f32.mrf.mxu0 }
 0x16b   :  { %v5149_v25 = vpop.f32.mrf.mxu0  ;;  %1270 = vmatmul.mubr.f32.gmra.mxu0 %v224_v19  ;;  %v236_v19 = vld [vmem:[#allocation2 + $0x4d0] sm:$0xff] }
 0x16c   :  { %7104 = vst [vmem:[#allocation33_spill] sm:$0xff] %v5149_v25  ;;  %1274 = vmatprep.mubr.f32.mxu0 %v227_v22  ;;  %v239_v22 = vld [vmem:[#allocation2 + $0x4e8] sm:$0xff] }
 0x16d   :  { %v1033_v30 = vpop.f32.mrf.mxu0  ;;  %v267_v25 = vld [vmem:[#allocation2 + $0x5c8] sm:$0xff] }
 0x16e   :  { %v238_v30 = vld [vmem:[#allocation2 + $0x4e0] sm:$0xff] }
 0x16f   :  { %v5151_v37 = vpop.f32.mrf.mxu0  ;;  %1275 = vmatmul.mubr.f32.gmra.mxu0 %v226_v29 }
 0x170   :  { %7105 = vst [vmem:[#allocation34_spill] sm:$0xff] %v5151_v37  ;;  %1279 = vmatprep.mubr.f32.mxu0 %v229_v36 }
 0x171   :  { %v1038_v43 = vpop.f32.mrf.mxu0 }
 0x173   :  { %v5153_v47 = vpop.f32.mrf.mxu0  ;;  %1280 = vmatmul.mubr.f32.gmra.mxu0 %v228_v38  ;;  %v241_v38 = vld [vmem:[#allocation2 + $0x4f8] sm:$0xff] }
 0x174   :  { %7106 = vst [vmem:[#allocation35_spill] sm:$0xff] %v5153_v47  ;;  %1284 = vmatprep.mubr.f32.mxu0 %v231_v44  ;;  %v240_v44 = vld [vmem:[#allocation2 + $0x4f0] sm:$0xff] }
 0x175   :  { %v1043_v54 = vpop.f32.mrf.mxu0 }
 0x176   :  { %v243_v54 = vld [vmem:[#allocation2 + $0x508] sm:$0xff] }
 0x177   :  { %v5155_v58 = vpop.f32.mrf.mxu0  ;;  %1285 = vmatmul.mubr.f32.gmra.mxu0 %v230_v50 }
 0x178   :  { %7107 = vst [vmem:[#allocation36_spill] sm:$0xff] %v5155_v58  ;;  %1289 = vmatprep.mubr.f32.mxu0 %v233_v55  ;;  %v262_v58 = vld [vmem:[#allocation2 + $0x5a0] sm:$0xff] }
 0x179   :  { %v1048_v61 = vpop.f32.mrf.mxu0 }
 0x17b   :  { %v5157_v4 = vpop.f32.mrf.mxu0  ;;  %1290 = vmatmul.mubr.f32.gmra.mxu0 %v232_v59  ;;  %v242_v59 = vld [vmem:[#allocation2 + $0x500] sm:$0xff] }
 0x17c   :  { %7108 = vst [vmem:[#allocation37_spill] sm:$0xff] %v5157_v4  ;;  %1294 = vmatprep.mubr.f32.mxu0 %v235_v3  ;;  %v245_v3 = vld [vmem:[#allocation2 + $0x518] sm:$0xff]  ;;  %v263_v4 = vld [vmem:[#allocation2 + $0x5a8] sm:$0xff] }
 0x17d   :  { %v1053_v9 = vpop.f32.mrf.mxu0 }
 0x17e   :  { %v244_v9 = vld [vmem:[#allocation2 + $0x510] sm:$0xff] }
 0x17f   :  { %v5159_v14 = vpop.f32.mrf.mxu0  ;;  %1295 = vmatmul.mubr.f32.gmra.mxu0 %v234_v6 }
 0x180   :  { %7109 = vst [vmem:[#allocation38_spill] sm:$0xff] %v5159_v14  ;;  %1299 = vmatprep.mubr.f32.mxu0 %v237_v13  ;;  %v261_v14 = vld [vmem:[#allocation2 + $0x598] sm:$0xff] }
 0x181   :  { %v1058_v20 = vpop.f32.mrf.mxu0 }
 0x183   :  { %v5161_v29 = vpop.f32.mrf.mxu0  ;;  %1300 = vmatmul.mubr.f32.gmra.mxu0 %v236_v19  ;;  %v247_v19 = vld [vmem:[#allocation2 + $0x528] sm:$0xff] }
 0x184   :  { %7110 = vst [vmem:[#allocation39_spill] sm:$0xff] %v5161_v29  ;;  %1304 = vmatprep.mubr.f32.mxu0 %v239_v22  ;;  %v246_v22 = vld [vmem:[#allocation2 + $0x520] sm:$0xff] }
 0x185   :  { %v1063_v36 = vpop.f32.mrf.mxu0 }
 0x186   :  { %v249_v36 = vld [vmem:[#allocation2 + $0x538] sm:$0xff] }
 0x187   :  { %v5163_v43 = vpop.f32.mrf.mxu0  ;;  %1305 = vmatmul.mubr.f32.gmra.mxu0 %v238_v30 }
 0x188   :  { %7111 = vst [vmem:[#allocation40_spill] sm:$0xff] %v5163_v43  ;;  %1309 = vmatprep.mubr.f32.mxu0 %v241_v38 }
 0x189   :  { %v1068_v50 = vpop.f32.mrf.mxu0 }
 0x18b   :  { %v5165_v55 = vpop.f32.mrf.mxu0  ;;  %1310 = vmatmul.mubr.f32.gmra.mxu0 %v240_v44  ;;  %v248_v44 = vld [vmem:[#allocation2 + $0x530] sm:$0xff] }
 0x18c   :  { %7112 = vst [vmem:[#allocation41_spill] sm:$0xff] %v5165_v55  ;;  %1314 = vmatprep.mubr.f32.mxu0 %v243_v54  ;;  %v251_v54 = vld [vmem:[#allocation2 + $0x548] sm:$0xff] }
 0x18d   :  { %v1073_v61 = vpop.f32.mrf.mxu0 }
 0x18f   :  { %v5167_v6 = vpop.f32.mrf.mxu0  ;;  %1315 = vmatmul.mubr.f32.gmra.mxu0 %v242_v59  ;;  %v250_v59 = vld [vmem:[#allocation2 + $0x540] sm:$0xff] }
 0x190   :  { %7113 = vst [vmem:[#allocation42_spill] sm:$0xff] %v5167_v6  ;;  %1319 = vmatprep.mubr.f32.mxu0 %v245_v3  ;;  %v5247_v6 = vpop.permute.xlu0 %382 }
 0x191   :  { %v1078_v13 = vpop.f32.mrf.mxu0  ;;  %7121 = vst [vmem:[#allocation50_spill] sm:$0xff] %v5247_v6 }
 0x192   :  { %v253_v13 = vld [vmem:[#allocation2 + $0x558] sm:$0xff] }
 0x193   :  { %v5169_v20 = vpop.f32.mrf.mxu0  ;;  %1320 = vmatmul.mubr.f32.gmra.mxu0 %v244_v9  ;;  %v252_v9 = vld [vmem:[#allocation2 + $0x550] sm:$0xff] }
 0x194   :  { %7114 = vst [vmem:[#allocation43_spill] sm:$0xff] %v5169_v20  ;;  %1324 = vmatprep.mubr.f32.mxu0 %v247_v19 }
 0x195   :  { %v1083_v30 = vpop.f32.mrf.mxu0 }
 0x196   :  { %v255_v30 = vld [vmem:[#allocation2 + $0x568] sm:$0xff] }
 0x197   :  { %v5171_v38 = vpop.f32.mrf.mxu0  ;;  %1325 = vmatmul.mubr.f32.gmra.mxu0 %v246_v22  ;;  %v5179_v22 = vpop.permute.xlu1 %682 }
 0x198   :  { %7115 = vst [vmem:[#allocation44_spill] sm:$0xff] %v5171_v38  ;;  %1329 = vmatprep.mubr.f32.mxu0 %v249_v36  ;;  %v254_v36 = vld [vmem:[#allocation2 + $0x560] sm:$0xff] }
 0x199   :  { %v1088_v50 = vpop.f32.mrf.mxu0 }
 0x19b   :  { %v5173_v61 = vpop.f32.mrf.mxu0  ;;  %1330 = vmatmul.mubr.f32.gmra.mxu0 %v248_v44  ;;  %v257_v44 = vld [vmem:[#allocation2 + $0x578] sm:$0xff] }
 0x19c   :  { %1334 = vmatprep.mubr.f32.mxu0 %v251_v54 }
 0x19d   :  { %v1093_v3 = vpop.f32.mrf.mxu0 }
 0x19e   :  { %v256_v3 = vld [vmem:[#allocation2 + $0x570] sm:$0xff] }
 0x19f   :  { %v5175_v0 = vpop.f32.mrf.mxu0  ;;  %1335 = vmatmul.mubr.f32.gmra.mxu0 %v250_v59  ;;  %v259_v59 = vld [vmem:[#allocation2 + $0x588] sm:$0xff] }
 0x1a0   :  { %1339 = vmatprep.mubr.f32.mxu0 %v253_v13  ;;  %v5183_v13 = vpop.permute.xlu1 %602 }
 0x1a1   :  { %v1098_v19 = vpop.f32.mrf.mxu0 }
 0x1a3   :  { %v5177_v55 = vpop.f32.mrf.mxu0  ;;  %1340 = vmatmul.mubr.f32.gmra.mxu0 %v252_v9  ;;  %v258_v9 = vld [vmem:[#allocation2 + $0x580] sm:$0xff] }
 0x1a4   :  { %1344 = vmatprep.mubr.f32.mxu0 %v255_v30 }
 0x1a5   :  { %v1103_v50 = vpop.f32.mrf.mxu0 }
 0x1a6   :  { %v5189_v50 = vpop.permute.xlu1 %597 }
 0x1a7   :  { %v5181_v54 = vpop.f32.mrf.mxu0  ;;  %1345 = vmatmul.mubr.f32.gmra.mxu0 %v254_v36  ;;  %v260_v36 = vld [vmem:[#allocation2 + $0x590] sm:$0xff] }
 0x1a8   :  { %1349 = vmatprep.mubr.f32.mxu0 %v257_v44 }
 0x1a9   :  { %v1108_v43 = vpop.f32.mrf.mxu0 }
 0x1ab   :  { %v5185_v19 = vpop.f32.mrf.mxu0  ;;  %1350 = vmatmul.mubr.f32.gmra.mxu0 %v256_v3  ;;  %v265_v3 = vld [vmem:[#allocation2 + $0x5b8] sm:$0xff] }
 0x1ac   :  { %1354 = vmatprep.mubr.f32.mxu0 %v259_v59  ;;  %v5193_v59 = vpop.permute.xlu1 %592 }
 0x1ad   :  { %v1113_v29 = vpop.f32.mrf.mxu0 }
 0x1af   :  { %v5187_v30 = vpop.f32.mrf.mxu0  ;;  %1355 = vmatmul.mubr.f32.gmra.mxu0 %v258_v9  ;;  %v264_v9 = vld [vmem:[#allocation2 + $0x5b0] sm:$0xff] }
 0x1b0   :  { %1359 = vmatprep.mubr.f32.mxu0 %v261_v14 }
 0x1b1   :  { %v1118_v44 = vpop.f32.mrf.mxu0 }
 0x1b2   :  { %v5199_v44 = vpop.permute.xlu1 %587 }
 0x1b3   :  { %v5191_v43 = vpop.f32.mrf.mxu0  ;;  %1360 = vmatmul.mubr.f32.gmra.mxu0 %v260_v36  ;;  %v266_v36 = vld [vmem:[#allocation2 + $0x5c0] sm:$0xff] }
 0x1b4   :  { %1364 = vmatprep.mubr.f32.mxu0 %v263_v4 }
 0x1b5   :  { %v1123_v47 = vpop.f32.mrf.mxu0 }
 0x1b7   :  { %v5195_v29 = vpop.f32.mrf.mxu0  ;;  %1365 = vmatmul.mubr.f32.gmra.mxu0 %v262_v58  ;;  %v271_v58 = vld [vmem:[#allocation2 + $0x5e8] sm:$0xff] }
 0x1b8   :  { %1369 = vmatprep.mubr.f32.mxu0 %v265_v3  ;;  %v5203_v3 = vpop.permute.xlu1 %582 }
 0x1b9   :  { %v1128_v37 = vpop.f32.mrf.mxu0 }
 0x1bb   :  { %v5197_v14 = vpop.f32.mrf.mxu0  ;;  %1370 = vmatmul.mubr.f32.gmra.mxu0 %v264_v9  ;;  %v270_v9 = vld [vmem:[#allocation2 + $0x5e0] sm:$0xff] }
 0x1bc   :  { %1374 = vmatprep.mubr.f32.mxu0 %v267_v25 }
 0x1bd   :  { %v1133_v4 = vpop.f32.mrf.mxu0 }
 0x1be   :  { %v5209_v4 = vpop.permute.xlu1 %577 }
 0x1bf   :  { %v5201_v47 = vpop.f32.mrf.mxu0  ;;  %1375 = vmatmul.mubr.f32.gmra.mxu0 %v266_v36  ;;  %v272_v36 = vld [vmem:[#allocation2 + $0x5f0] sm:$0xff] }
 0x1c0   :  { %1379 = vmatprep.mubr.f32.mxu0 %v269_v15 }
 0x1c1   :  { %v1138_v63 = vpop.f32.mrf.mxu0 }
 0x1c2   :  { %v5211_v32 = vpop.permute.xlu1 %572 }
 0x1c3   :  { %v5205_v37 = vpop.f32.mrf.mxu0  ;;  %1380 = vmatmul.mubr.f32.gmra.mxu0 %v268_v8 }
 0x1c4   :  { %1384 = vmatprep.mubr.f32.mxu0 %v271_v58 }
 0x1c5   :  { %v1143_v56 = vpop.f32.mrf.mxu0 }
 0x1c6   :  { %v5217_v56 = vpop.permute.xlu1 %567 }
 0x1c7   :  { %v5207_v25 = vpop.f32.mrf.mxu0  ;;  %1385 = vmatmul.mubr.f32.gmra.mxu0 %v270_v9 }
 0x1c8   :  { %1389 = vmatprep.mubr.f32.mxu0 %v273_v49 }
 0x1c9   :  { %v1148_v15 = vpop.f32.mrf.mxu0 }
 0x1ca   :  { %v5221_v5 = vpop.permute.xlu1 %562 }
 0x1cb   :  { %v1151_v41 = vpop.f32.mrf.mxu0  ;;  %1390 = vmatmul.mubr.f32.gmra.mxu0 %v272_v36 }
 0x1cd   :  { %v1153_v63 = vpop.f32.mrf.mxu0 }
 0x1ce   :  { %v5227_v63 = vpop.permute.xlu1 %557 }
 0x1cf   :  { %v5213_v24 = vpop.f32.mrf.mxu0 }
 0x1d0   :  { %7116 = vst [vmem:[#allocation45_spill] sm:$0xff] %v5213_v24 }
 0x1d1   :  { %v1158_v8 = vpop.f32.mrf.mxu0 }
 0x1d2   :  { %v5231_v53 = vpop.permute.xlu1 %552 }
 0x1d3   :  { %v5215_v58 = vpop.f32.mrf.mxu0 }
 0x1d4   :  { %7117 = vst [vmem:[#allocation46_spill] sm:$0xff] %v5215_v58 }
 0x1d5   :  { %v1163_v18 = vpop.f32.mrf.mxu0 }
 0x1d7   :  { %v5219_v10 = vpop.f32.mrf.mxu0 }
 0x1d8   :  { %7118 = vst [vmem:[#allocation47_spill] sm:$0xff] %v5219_v10 }
 0x1d9   :  { %v1168_v9 = vpop.f32.mrf.mxu0 }
 0x1da   :  { %v5237_v9 = vpop.permute.xlu1 %547 }
 0x1db   :  { %v5223_v49 = vpop.f32.mrf.mxu0 }
 0x1dd   :  { %v1173_v15 = vpop.f32.mrf.mxu0 }
 0x1de   :  { %v5241_v21 = vpop.permute.xlu1 %542 }
 0x1df   :  { %v5225_v36 = vpop.f32.mrf.mxu0  ;;  %7119 = vst [vmem:[#allocation48_spill] sm:$0xff] %v5241_v21 }
 0x1e1   :  { %v1178_v62 = vpop.f32.mrf.mxu0 }
 0x1e3   :  { %v5229_v57 = vpop.f32.mrf.mxu0 }
 0x1e5   :  { %v1183_v8 = vpop.f32.mrf.mxu0 }
 0x1e6   :  { %v5245_v8 = vpop.permute.xlu1 %537 }
 0x1e7   :  { %v5233_v46 = vpop.f32.mrf.mxu0  ;;  %7120 = vst [vmem:[#allocation49_spill] sm:$0xff] %v5245_v8 }
 0x1e9   :  { %v1188_v18 = vpop.f32.mrf.mxu0 }
 0x1ea   :  { %v5249_v24 = vpop.permute.xlu1 %532 }
 0x1eb   :  { %v5235_v40 = vpop.f32.mrf.mxu0  ;;  %7122 = vst [vmem:[#allocation51_spill] sm:$0xff] %v5249_v24 }
 0x1ed   :  { %v1193_v35 = vpop.f32.mrf.mxu0 }
 0x1ee   :  { %v5251_v35 = vpop.permute.xlu0 %392  ;;  %v5253_v58 = vpop.permute.xlu1 %377 }
 0x1ef   :  { %v5239_v28 = vpop.f32.mrf.mxu0  ;;  %7123 = vst [vmem:[#allocation52_spill] sm:$0xff] %v5251_v35  ;;  %7124 = vst [vmem:[#allocation53_spill] sm:$0xff] %v5253_v58 }
 0x1f1   :  { %v1198_v15 = vpop.f32.mrf.mxu0 }
 0x1f2   :  { %v5255_v45 = vpop.permute.xlu0 %402  ;;  %v5257_v21 = vpop.permute.xlu1 %387 }
 0x1f3   :  { %v5243_v17 = vpop.f32.mrf.mxu0 }
 0x1f5   :  { %v1203_v62 = vpop.f32.mrf.mxu0 }
 0x1f7   :  { %v1206_v12 = vpop.f32.mrf.mxu0 }
 0x1f9   :  { %v1208_v1 = vpop.f32.mrf.mxu0 }
 0x1fa   :  { %v5259_v1 = vpop.permute.xlu0 %412 }
 0x1fb   :  { %v1211_v7 = vpop.f32.mrf.mxu0  ;;  %7125 = vst [vmem:[#allocation54_spill] sm:$0xff] %v5259_v1 }
 0x1fd   :  { %v1213_v18 = vpop.f32.mrf.mxu0 }
 0x1fe   :  { %v5261_v18 = vpop.permute.xlu1 %397  ;;  %v5263_v24 = vpop.permute.xlu0 %422 }
 0x1ff   :  { %v1216_v51 = vpop.f32.mrf.mxu0 }
 0x201   :  { %v1218_v20 = vpop.f32.mrf.mxu0 }
 0x202   :  { %v1152_v20 = vadd.f32 %v1151_v41, %v4981_v26  ;;  %v5272_v1 = vpop.permute.xlu1 %407 }
 0x203   :  { %v1221_v15 = vpop.f32.mrf.mxu0 }
 0x204   :  { %v1222_v26 = vadd.f32 %v1221_v15, %v4983_v31  ;;  %v1137_v15 = vadd.f32 %v5201_v47, %v5193_v59  ;;  %v1127_v47 = vadd.f32 %v5195_v29, %v5203_v3  ;;  %v1197_v29 = vadd.f32 %v5239_v28, %v4999_v52 }
 0x205   :  { %v1223_v62 = vpop.f32.mrf.mxu0 }
 0x206   :  { %v5283_v41 = vpop.permute.xlu1 %417 }
 0x207   :  { %v1226_v38 = vpop.f32.mrf.mxu0 }
 0x208   :  { %v1227_v58 = vadd.f32 %v1226_v38, %v5179_v22  ;;  %v1142_v22 = vadd.f32 %v5205_v37, %v5189_v50  ;;  %v1132_v37 = vadd.f32 %v5197_v14, %v5199_v44  ;;  %v1202_v14 = vadd.f32 %v5243_v17, %v4994_v48 }
 0x209   :  { %v1228_v8 = vpop.f32.mrf.mxu0 }
 0x20a   :  { %v5274_v8 = vpop.permute.xlu0 %432  ;;  %v5294_v31 = vpop.permute.xlu1 %427 }
 0x20b   :  { %v1231_v6 = vpop.f32.mrf.mxu0 }
 0x20c   :  { %v1232_v35 = vadd.f32 %v1231_v6, %v4979_v23  ;;  %v1147_v23 = vadd.f32 %v5207_v25, %v5183_v13 }
 0x20d   :  { %v1233_v10 = vpop.f32.mrf.mxu0 }
 0x20e   :  { %3963 = vmatprep.subr.msk.mxu1 %vm1395_vm0, %v1232_v35  ;;  %v5285_v38 = vpop.permute.xlu0 %442  ;;  %v1217_v35 = vadd.f32 %v1216_v51, %v4985_v34  ;;  %v5305_v34 = vpop.permute.xlu1 %437 }
 0x20f   :  { %v5269_v62 = vpop.f32.mrf.mxu0  ;;  %3964 = vmatpush3.xpose.msk.msra.mxu1 %vm1395_vm0, %v1152_v20 }
 0x210   :  { %3965 = vmatprep.subr.msk.mxu1 %vm1395_vm0, %v1227_v58 }
 0x211   :  { %v1238_v6 = vpop.f32.mrf.mxu0 }
 0x212   :  { %v5296_v25 = vpop.permute.xlu0 %452 }
 0x213   :  { %v5280_v10 = vpop.f32.mrf.mxu0  ;;  %3966 = vmatpush3.xpose.msk.msra.mxu1 %vm1395_vm0, %v1147_v23  ;;  %v1212_v23 = vadd.f32 %v1211_v7, %v4987_v39  ;;  %v5316_v39 = vpop.permute.xlu1 %447 }
 0x214   :  { %3967 = vmatprep.subr.msk.mxu1 %vm1395_vm0, %v1222_v26  ;;  %v1207_v26 = vadd.f32 %v1206_v12, %v4989_v42 }
 0x215   :  { %v1243_v58 = vpop.f32.mrf.mxu0 }
 0x216   :  { %v5307_v51 = vpop.permute.xlu0 %462  ;;  %v1122_v58 = vadd.f32 %v5191_v43, %v5209_v4  ;;  %v1192_v43 = vadd.f32 %v5235_v40, %v5010_v60 }
 0x217   :  { %v5291_v13 = vpop.f32.mrf.mxu0  ;;  %3968 = vmatpush3.xpose.msk.msra.mxu1 %vm1395_vm0, %v1142_v22  ;;  %v5328_v42 = vpop.permute.xlu1 %457 }
 0x218   :  { %3969 = vmatprep.subr.msk.mxu1 %vm1395_vm0, %v1217_v35 }
 0x219   :  { %v1248_v20 = vpop.f32.mrf.mxu0 }
 0x21a   :  { %v5318_v7 = vpop.permute.xlu0 %472 }
 0x21b   :  { %v5302_v50 = vpop.f32.mrf.mxu0  ;;  %3970 = vmatpush3.xpose.msk.msra.mxu1 %vm1395_vm0, %v1137_v15  ;;  %v5340_v48 = vpop.permute.xlu1 %467  ;;  %v1117_v15 = vadd.f32 %v5187_v30, %v5211_v32  ;;  %v1187_v32 = vadd.f32 %v5233_v46, %v5018_v2 }
 0x21c   :  { %3971 = vmatprep.subr.msk.mxu1 %vm1395_vm0, %v1212_v23  ;;  %v1112_v23 = vadd.f32 %v5185_v19, %v5217_v56  ;;  %v1182_v19 = vadd.f32 %v5229_v57, %v5032_v11 }
 0x21d   :  { %v1253_v6 = vpop.f32.mrf.mxu0 }
 0x21e   :  { %v5330_v12 = vpop.permute.xlu0 %482  ;;  %v1107_v6 = vadd.f32 %v5181_v54, %v5221_v5  ;;  %v1177_v5 = vadd.f32 %v5225_v36, %v5040_v16  ;;  %v1092_v36 = vadd.f32 %v5173_v61, %v5237_v9 }
 0x21f   :  { %v5313_v59 = vpop.f32.mrf.mxu0  ;;  %3972 = vmatpush3.xpose.msk.msra.mxu1 %vm1395_vm0, %v1132_v37  ;;  %v5352_v52 = vpop.permute.xlu1 %477 }
 0x220   :  { %3973 = vmatprep.subr.msk.mxu1 %vm1395_vm0, %v1207_v26 }
 0x221   :  { %v1258_v22 = vpop.f32.mrf.mxu0 }
 0x222   :  { %v5342_v17 = vpop.permute.xlu0 %492 }
 0x223   :  { %v5325_v44 = vpop.f32.mrf.mxu0  ;;  %3974 = vmatpush3.xpose.msk.msra.mxu1 %vm1395_vm0, %v1127_v47  ;;  %v5364_v60 = vpop.permute.xlu1 %487  ;;  %v1102_v47 = vadd.f32 %v5177_v55, %v5227_v63  ;;  %v1172_v55 = vadd.f32 %v5223_v49, %v5054_v27  ;;  %v7127_v27 = vld [vmem:[#allocation48_spill] sm:$0xff] }
 0x224   :  { %3975 = vmatprep.subr.msk.mxu1 %vm1395_vm0, %v1202_v14  ;;  %v1097_v14 = vadd.f32 %v5175_v0, %v5231_v53  ;;  %v7128_v49 = vld [vmem:[#allocation44_spill] sm:$0xff] }
 0x225   :  { %v1263_v35 = vpop.f32.mrf.mxu0 }
 0x226   :  { %v5354_v28 = vpop.permute.xlu0 %502 }
 0x227   :  { %v5337_v3 = vpop.f32.mrf.mxu0  ;;  %3976 = vmatpush3.xpose.msk.msra.mxu1 %vm1395_vm0, %v1122_v58  ;;  %v5376_v2 = vpop.permute.xlu1 %497 }
 0x228   :  { %3977 = vmatprep.subr.msk.mxu1 %vm1395_vm0, %v1197_v29 }
 0x229   :  { %v1268_v20 = vpop.f32.mrf.mxu0 }
 0x22a   :  { %v5366_v40 = vpop.permute.xlu0 %512 }
 0x22b   :  { %v5349_v4 = vpop.f32.mrf.mxu0  ;;  %3978 = vmatpush3.xpose.msk.msra.mxu1 %vm1395_vm0, %v1117_v15  ;;  %v5388_v11 = vpop.permute.xlu1 %507  ;;  %v7126_v15 = vld [vmem:[#allocation47_spill] sm:$0xff] }
 0x22c   :  { %3979 = vmatprep.subr.msk.mxu1 %vm1395_vm0, %v1192_v43  ;;  %v1167_v20 = vadd.f32 %v7126_v15, %v5062_v33  ;;  %v1087_v43 = vadd.f32 %v7128_v49, %v7127_v27  ;;  %v7131_v33 = vld [vmem:[#allocation49_spill] sm:$0xff] }
 0x22d   :  { %v1273_v37 = vpop.f32.mrf.mxu0 }
 0x22e   :  { %v5378_v46 = vpop.permute.xlu0 %522  ;;  %v7129_v37 = vld [vmem:[#allocation8_spill] sm:$0xff] }
 0x22f   :  { %v5361_v30 = vpop.f32.mrf.mxu0  ;;  %3980 = vmatpush3.xpose.msk.msra.mxu1 %vm1395_vm0, %v1112_v23  ;;  %v5396_v16 = vpop.permute.xlu1 %517 }
 0x230   :  { %3981 = vmatprep.subr.msk.mxu1 %vm1395_vm0, %v1187_v32  ;;  %v7130_v32 = vld [vmem:[#allocation46_spill] sm:$0xff] }
 0x231   :  { %v1278_v26 = vpop.f32.mrf.mxu0 }
 0x232   :  { %v763_v57 = vpop.permute.xlu0 %762 }
 0x233   :  { %v5373_v56 = vpop.f32.mrf.mxu0  ;;  %3982 = vmatpush3.xpose.msk.msra.mxu1 %vm1395_vm0, %v1107_v6  ;;  %v5404_v53 = vpop.permute.xlu1 %527  ;;  %v1162_v6 = vadd.f32 %v7130_v32, %v7129_v37  ;;  %v7137_v37 = vmov 0.0   ;;  %v7138_v32 = vld [vmem:[#allocation53_spill] sm:$0xff] }
 0x234   :  { %3983 = vmatprep.subr.msk.mxu1 %vm1395_vm0, %v1182_v19  ;;  %v7132_v19 = vld [vmem:[#allocation43_spill] sm:$0xff] }
 0x235   :  { %v1283_v22 = vpop.f32.mrf.mxu0 }
 0x236   :  { %v753_v29 = vpop.permute.xlu0 %752 }
 0x237   :  { %v5385_v54 = vpop.f32.mrf.mxu0  ;;  %3984 = vmatpush3.xpose.msk.msra.mxu1 %vm1395_vm0, %v1102_v47  ;;  %v768_v26 = vpop.permute.xlu1 %767  ;;  %v1082_v47 = vadd.f32 %v7132_v19, %v7131_v33 }
 0x238   :  { %3985 = vmatprep.subr.msk.mxu1 %vm1395_vm0, %v1177_v5  ;;  %v7133_v5 = vld [vmem:[#allocation9_spill] sm:$0xff] }
 0x239   :  { %v1288_v58 = vpop.f32.mrf.mxu0 }
 0x23a   :  { %v748_v9 = vpop.permute.xlu0 %747 }
 0x23b   :  { %v1291_v63 = vpop.f32.mrf.mxu0  ;;  %3986 = vmatpush3.xpose.msk.msra.mxu1 %vm1395_vm0, %v1097_v14  ;;  %v7134_v14 = vld [vmem:[#allocation45_spill] sm:$0xff]  ;;  %v758_v49 = vpop.permute.xlu1 %757 }
 0x23c   :  { %3987 = vmatprep.subr.msk.mxu1 %vm1395_vm0, %v1172_v55  ;;  %v1157_v58 = vadd.f32 %v7134_v14, %v7133_v5 }
 0x23d   :  { %v1293_v35 = vpop.f32.mrf.mxu0 }
 0x23e   :  { %v7136_v35 = vld [vmem:[#allocation42_spill] sm:$0xff]  ;;  %v738_v27 = vpop.permute.xlu0 %737 }
 0x23f   :  { %v1296_v0 = vpop.f32.mrf.mxu0  ;;  %3988 = vmatpush3.xpose.msk.msra.mxu1 %vm1395_vm0, %v1092_v36  ;;  %v7135_v36 = vld [vmem:[#allocation51_spill] sm:$0xff] }
 0x240   :  { %3989 = vmatprep.subr.msk.mxu1 %vm1395_vm0, %v1167_v20  ;;  %v1077_v15 = vadd.f32 %v7136_v35, %v7135_v36  ;;  %v7143_v36 = vld [vmem:[#allocation12_spill] sm:$0xff] }
 0x241   :  { %v1298_v23 = vpop.f32.mrf.mxu0 }
 0x242   :  { %v733_v14 = vpop.permute.xlu0 %732 }
 0x243   :  { %v1301_v61 = vpop.f32.mrf.mxu0  ;;  %3990 = vmatpush3.xpose.msk.msra.mxu1 %vm1395_vm0, %v1087_v43 }
 0x244   :  { %3991 = vmatprep.subr.msk.mxu1 %vm1395_vm0, %v1162_v6  ;;  %v7139_v6 = vld [vmem:[#allocation11_spill] sm:$0xff] }
 0x245   :  { %v1303_v22 = vpop.f32.mrf.mxu0  ;;  %v922_v33 = vadd.f32 %v7139_v6, %v7138_v32  ;;  %v1292_v32 = vadd.f32 %v1291_v63, %v748_v9  ;;  %v1282_v9 = vadd.f32 %v5373_v56, %v738_v27 }
 0x246   :  { %v7140_v22 = vld [vmem:[#allocation10_spill] sm:$0xff] }
 0x247   :  { %v1306_v55 = vpop.f32.mrf.mxu0  ;;  %3992 = vmatpush3.xpose.msk.msra.mxu1 %vm1395_vm0, %v1082_v47 }
 0x248   :  { %3993 = vmatprep.subr.msk.mxu1 %vm1395_vm0, %v1157_v58  ;;  %v1307_v47 = vadd.f32 %v1306_v55, %v763_v57  ;;  %v743_v58 = vpop.permute.xlu1 %742  ;;  %v1297_v57 = vadd.f32 %v1296_v0, %v753_v29 }
 0x249   :  { %v1308_v20 = vpop.f32.mrf.mxu0  ;;  %v1287_v29 = vadd.f32 %v5385_v54, %v743_v58  ;;  %v1277_v54 = vadd.f32 %v5361_v30, %v733_v14 }
 0x24b   :  { %v1311_v43 = vpop.f32.mrf.mxu0  ;;  %3994 = vmatpush3.xpose.msk.msra.mxu1 %vm1395_vm0, %v1077_v15  ;;  %v1302_v15 = vadd.f32 %v1301_v61, %v758_v49  ;;  %v728_v61 = vpop.permute.xlu0 %727 }
 0x24c   :  { %v1312_v23 = vadd.f32 %v1311_v43, %v768_v26  ;;  %2613 = vmatprep.subr.mxu1 %v7137_v37  ;;  %v7142_v26 = vld [vmem:[#allocation50_spill] sm:$0xff]  ;;  %v7144_v43 = vld [vmem:[#allocation13_spill] sm:$0xff]  ;;  %v723_v49 = vpop.permute.xlu1 %722  ;;  %v1272_v27 = vadd.f32 %v5349_v4, %v728_v61 }
 0x24d   :  { %v1313_v19 = vpop.f32.mrf.mxu0  ;;  %v927_v35 = vadd.f32 %v7143_v36, %v7142_v26  ;;  %v7147_v26 = vld [vmem:[#allocation15_spill] sm:$0xff]  ;;  %v1267_v30 = vadd.f32 %v5337_v3, %v723_v49  ;;  %v7150_v49 = vld [vmem:[#allocation54_spill] sm:$0xff] }
 0x24e   :  { %3996 = vmatmul.mubr.msk.f32.vlgmr.msra.gmra.mxu1 %vm1395_vm0, %v7140_v22  ;;  %v942_v56 = vadd.f32 %v7147_v26, %v5261_v18 }
 0x24f   :  { %v5427_v5 = vpop.f32.mrf.mxu0  ;;  %3997 = vmatprep.mubr.msk.f32.mxu1 %vm1395_vm0, %v922_v33  ;;  %2614 = vmatpush1.msra.mxu1 %v1312_v23  ;;  %v932_v23 = vadd.f32 %v7144_v43, %v5257_v21  ;;  %v7146_v21 = vld [vmem:[#allocation14_spill] sm:$0xff] }
 0x250   :  { %7141 = vst [vmem:[#allocation47_spill] sm:$0xff] %v5427_v5  ;;  %2615 = vmatprep.subr.mxu1 %v7137_v37  ;;  %v718_v58 = vpop.permute.xlu1 %717 }
 0x251   :  { %v1318_v20 = vpop.f32.mrf.mxu0  ;;  %2616 = vmatpush1.msra.mxu1 %v1307_v47  ;;  %v708_v47 = vpop.permute.xlu0 %707  ;;  %v1262_v4 = vadd.f32 %v5325_v44, %v718_v58 }
 0x252   :  { %3998 = vmatmul.mubr.msk.f32.gmra.mxu1 %vm1395_vm0, %v922_v33  ;;  %2617 = vmatprep.subr.mxu1 %v7137_v37  ;;  %v7145_v33 = vld [vmem:[#allocation52_spill] sm:$0xff] }
 0x253   :  { %v5435_v55 = vpop.f32.mrf.mxu0  ;;  %3999 = vmatprep.mubr.msk.f32.mxu1 %vm1395_vm0, %v927_v35  ;;  %2618 = vmatpush1.msra.mxu1 %v1302_v15  ;;  %v937_v63 = vadd.f32 %v7146_v21, %v7145_v33 }
 0x254   :  { %2619 = vmatprep.subr.mxu1 %v7137_v37 }
 0x255   :  { %v1323_v6 = vpop.f32.mrf.mxu0  ;;  %2620 = vmatpush1.msra.mxu1 %v1297_v57  ;;  %v703_v20 = vpop.permute.xlu0 %702 }
 0x256   :  { %4000 = vmatmul.mubr.msk.f32.gmra.mxu1 %vm1395_vm0, %v927_v35  ;;  %2621 = vmatprep.subr.mxu1 %v7137_v37  ;;  %v7148_v35 = vld [vmem:[#allocation16_spill] sm:$0xff]  ;;  %v713_v57 = vpop.permute.xlu1 %712 }
 0x257   :  { %v5444_v0 = vpop.f32.mrf.mxu0  ;;  %4001 = vmatprep.mubr.msk.f32.mxu1 %vm1395_vm0, %v932_v23  ;;  %2622 = vmatpush1.msra.mxu1 %v1292_v32  ;;  %v947_v18 = vadd.f32 %v7148_v35, %v5255_v45  ;;  %v1257_v3 = vadd.f32 %v5313_v59, %v713_v57  ;;  %v7149_v45 = vld [vmem:[#allocation17_spill] sm:$0xff]  ;;  %v1247_v59 = vadd.f32 %v5291_v13, %v703_v20 }
 0x258   :  { %2623 = vmatprep.subr.mxu1 %v7137_v37  ;;  %v952_v44 = vadd.f32 %v7149_v45, %v5272_v1  ;;  %v7151_v1 = vld [vmem:[#allocation18_spill] sm:$0xff] }
 0x259   :  { %v1328_v19 = vpop.f32.mrf.mxu0  ;;  %2624 = vmatpush1.msra.mxu1 %v1287_v29  ;;  %v698_v61 = vpop.permute.xlu0 %697  ;;  %v957_v29 = vadd.f32 %v7151_v1, %v7150_v49 }
 0x25a   :  { %4002 = vmatmul.mubr.msk.f32.gmra.mxu1 %vm1395_vm0, %v932_v23  ;;  %2625 = vmatprep.subr.mxu1 %v7137_v37  ;;  %v1252_v23 = vadd.f32 %v5302_v50, %v708_v47  ;;  %v1242_v50 = vadd.f32 %v5280_v10, %v698_v61  ;;  %v693_v21 = vpop.permute.xlu1 %692 }
 0x25b   :  { %v5454_v22 = vpop.f32.mrf.mxu0  ;;  %4003 = vmatprep.mubr.msk.f32.mxu1 %vm1395_vm0, %v937_v63  ;;  %2626 = vmatpush1.msra.mxu1 %v1282_v9  ;;  %v1237_v13 = vadd.f32 %v5269_v62, %v693_v21  ;;  %v7152_v9 = vld [vmem:[#allocation19_spill] sm:$0xff]  ;;  %v7153_v62 = vld [vmem:[#allocation20_spill] sm:$0xff] }
 0x25c   :  { %2627 = vmatprep.subr.mxu1 %v7137_v37  ;;  %v962_v19 = vadd.f32 %v7152_v9, %v5283_v41  ;;  %v967_v47 = vadd.f32 %v7153_v62, %v5263_v24  ;;  %v7154_v41 = vld [vmem:[#allocation21_spill] sm:$0xff] }
 0x25d   :  { %v1333_v36 = vpop.f32.mrf.mxu0  ;;  %2628 = vmatpush1.msra.mxu1 %v1277_v54 }
 0x25e   :  { %4004 = vmatmul.mubr.msk.f32.gmra.mxu1 %vm1395_vm0, %v937_v63  ;;  %2629 = vmatprep.subr.mxu1 %v7137_v37  ;;  %v848_v57 = vpop.permute.xlu1 %847 }
 0x25f   :  { %v5464_v14 = vpop.f32.mrf.mxu0  ;;  %4005 = vmatprep.mubr.msk.f32.mxu1 %vm1395_vm0, %v942_v56  ;;  %2630 = vmatpush1.msra.mxu1 %v1272_v27 }
 0x260   :  { %2631 = vmatprep.subr.mxu1 %v7137_v37 }
 0x261   :  { %v1338_v15 = vpop.f32.mrf.mxu0  ;;  %2632 = vmatpush1.msra.mxu1 %v1267_v30  ;;  %v7155_v30 = vld [vmem:[#allocation22_spill] sm:$0xff] }
 0x262   :  { %4006 = vmatmul.mubr.msk.f32.gmra.mxu1 %vm1395_vm0, %v942_v56  ;;  %2633 = vmatprep.subr.mxu1 %v7137_v37  ;;  %v972_v56 = vadd.f32 %v7154_v41, %v5294_v31  ;;  %v977_v35 = vadd.f32 %v7155_v30, %v5274_v8  ;;  %v838_v61 = vpop.permute.xlu1 %837 }
 0x263   :  { %v5474_v43 = vpop.f32.mrf.mxu0  ;;  %4007 = vmatprep.mubr.msk.f32.mxu1 %vm1395_vm0, %v947_v18  ;;  %2634 = vmatpush1.msra.mxu1 %v1262_v4  ;;  %v7156_v4 = vld [vmem:[#allocation23_spill] sm:$0xff] }
 0x264   :  { %2635 = vmatprep.subr.mxu1 %v7137_v37  ;;  %v982_v15 = vadd.f32 %v7156_v4, %v5305_v34  ;;  %v7163_v4 = vld [vmem:[#allocation30_spill] sm:$0xff] }
 0x265   :  { %v1343_v32 = vpop.f32.mrf.mxu0  ;;  %2636 = vmatpush1.msra.mxu1 %v1257_v3  ;;  %v7157_v3 = vld [vmem:[#allocation24_spill] sm:$0xff] }
 0x266   :  { %4008 = vmatmul.mubr.msk.f32.gmra.mxu1 %vm1395_vm0, %v947_v18  ;;  %2637 = vmatprep.subr.mxu1 %v7137_v37  ;;  %v987_v45 = vadd.f32 %v7157_v3, %v5285_v38  ;;  %v7158_v32 = vld [vmem:[#allocation25_spill] sm:$0xff]  ;;  %v7159_v38 = vld [vmem:[#allocation26_spill] sm:$0xff]  ;;  %v828_v21 = vpop.permute.xlu1 %827  ;;  %v7165_v3 = vld [vmem:[#allocation32_spill] sm:$0xff] }
 0x267   :  { %v5484_v6 = vpop.f32.mrf.mxu0  ;;  %4009 = vmatprep.mubr.msk.f32.mxu1 %vm1395_vm0, %v952_v44  ;;  %2638 = vmatpush1.msra.mxu1 %v1252_v23  ;;  %v992_v34 = vadd.f32 %v7158_v32, %v5316_v39  ;;  %v7160_v39 = vld [vmem:[#allocation27_spill] sm:$0xff] }
 0x268   :  { %2639 = vmatprep.subr.mxu1 %v7137_v37  ;;  %v1002_v9 = vadd.f32 %v7160_v39, %v5328_v42 }
 0x269   :  { %v1348_v33 = vpop.f32.mrf.mxu0  ;;  %2640 = vmatpush1.msra.mxu1 %v1247_v59 }
 0x26a   :  { %4010 = vmatmul.mubr.msk.f32.gmra.mxu1 %vm1395_vm0, %v952_v44  ;;  %2641 = vmatprep.subr.mxu1 %v7137_v37  ;;  %v843_v44 = vpop.permute.xlu0 %842  ;;  %v818_v41 = vpop.permute.xlu1 %817 }
 0x26b   :  { %v5494_v63 = vpop.f32.mrf.mxu0  ;;  %4011 = vmatprep.mubr.msk.f32.mxu1 %vm1395_vm0, %v957_v29  ;;  %2642 = vmatpush1.msra.mxu1 %v1242_v50 }
 0x26c   :  { %2643 = vmatprep.subr.mxu1 %v7137_v37 }
 0x26d   :  { %v1353_v10 = vpop.f32.mrf.mxu0  ;;  %2644 = vmatpush1.msra.mxu1 %v1237_v13 }
 0x26e   :  { %4012 = vmatmul.mubr.msk.f32.gmra.mxu1 %vm1395_vm0, %v957_v29  ;;  %2645 = vmatprep.subr.mxu1 %v7137_v37  ;;  %v833_v1 = vpop.permute.xlu0 %832  ;;  %v997_v29 = vadd.f32 %v7159_v38, %v5296_v25  ;;  %v7161_v25 = vld [vmem:[#allocation28_spill] sm:$0xff] }
 0x26f   :  { %v5502_v54 = vpop.f32.mrf.mxu0  ;;  %4013 = vmatprep.mubr.msk.f32.mxu1 %vm1395_vm0, %v962_v19 }
 0x271   :  { %v1358_v58 = vpop.f32.mrf.mxu0 }
 0x272   :  { %4014 = vmatmul.mubr.msk.f32.gmra.mxu1 %vm1395_vm0, %v962_v19  ;;  %v823_v10 = vpop.permute.xlu0 %822 }
 0x273   :  { %v5508_v26 = vpop.f32.mrf.mxu0  ;;  %4015 = vmatprep.mubr.msk.f32.mxu1 %vm1395_vm0, %v967_v47 }
 0x275   :  { %v1363_v27 = vpop.f32.mrf.mxu0 }
 0x276   :  { %4016 = vmatmul.mubr.msk.f32.gmra.mxu1 %vm1395_vm0, %v967_v47  ;;  %v1007_v47 = vadd.f32 %v7161_v25, %v5307_v51  ;;  %v7162_v27 = vld [vmem:[#allocation29_spill] sm:$0xff] }
 0x277   :  { %v1366_v36 = vpop.f32.mrf.mxu0  ;;  %4017 = vmatprep.mubr.msk.f32.mxu1 %vm1395_vm0, %v972_v56  ;;  %v1012_v30 = vadd.f32 %v7162_v27, %v5340_v48  ;;  %v1913_v27 = vld [vmem:[%s7036_s4 + $0x20] sm:$0xff] }
 0x278   :  { %v1367_v51 = vadd.f32 %v1366_v36, %v823_v10  ;;  %v7164_v36 = vld [vmem:[#allocation31_spill] sm:$0xff] }
 0x279   :  { %v1368_v24 = vpop.f32.mrf.mxu0 }
 0x27a   :  { %4018 = vmatmul.mubr.msk.f32.gmra.mxu1 %vm1395_vm0, %v972_v56  ;;  %v813_v56 = vpop.permute.xlu0 %812  ;;  %v808_v24 = vpop.permute.xlu1 %807 }
 0x27b   :  { %v1371_v18 = vpop.f32.mrf.mxu0  ;;  %4019 = vmatprep.mubr.msk.f32.mxu1 %vm1395_vm0, %v977_v35 }
 0x27d   :  { %v1373_v20 = vpop.f32.mrf.mxu0 }
 0x27e   :  { %4020 = vmatmul.mubr.msk.f32.gmra.mxu1 %vm1395_vm0, %v977_v35  ;;  %v1372_v35 = vadd.f32 %v1371_v18, %v828_v21  ;;  %v1362_v20 = vadd.f32 %v5508_v26, %v818_v41  ;;  %v803_v48 = vpop.permute.xlu0 %802  ;;  %v1357_v18 = vadd.f32 %v5502_v54, %v813_v56  ;;  %v798_v26 = vpop.permute.xlu1 %797 }
 0x27f   :  { %v1376_v31 = vpop.f32.mrf.mxu0  ;;  %4021 = vmatprep.mubr.msk.f32.mxu1 %vm1395_vm0, %v982_v15 }
 0x280   :  { %v1377_v42 = vadd.f32 %v1376_v31, %v833_v1  ;;  %v1022_v31 = vadd.f32 %v7164_v36, %v5352_v52  ;;  %v1342_v52 = vadd.f32 %v5474_v43, %v798_v26 }
 0x281   :  { %v1378_v8 = vpop.f32.mrf.mxu0 }
 0x282   :  { %4022 = vmatmul.mubr.msk.f32.gmra.mxu1 %vm1395_vm0, %v982_v15  ;;  %v1017_v15 = vadd.f32 %v7163_v4, %v5318_v7  ;;  %v1352_v7 = vadd.f32 %v5494_v63, %v808_v24  ;;  %v793_v54 = vpop.permute.xlu0 %792  ;;  %v7166_v8 = vld [vmem:[#allocation33_spill] sm:$0xff] }
 0x283   :  { %v1381_v23 = vpop.f32.mrf.mxu0  ;;  %4023 = vmatprep.mubr.msk.f32.mxu1 %vm1395_vm0, %v987_v45  ;;  %v1337_v63 = vadd.f32 %v5464_v14, %v793_v54  ;;  %v7167_v14 = vld [vmem:[#allocation34_spill] sm:$0xff] }
 0x284   :  { %v1382_v58 = vadd.f32 %v1381_v23, %v838_v61  ;;  %v1037_v32 = vadd.f32 %v7167_v14, %v5342_v17  ;;  %v7170_v17 = vld [vmem:[#allocation37_spill] sm:$0xff] }
 0x285   :  { %v1383_v59 = vpop.f32.mrf.mxu0 }
 0x286   :  { %4024 = vmatmul.mubr.msk.f32.gmra.mxu1 %vm1395_vm0, %v987_v45  ;;  %v1027_v45 = vadd.f32 %v7165_v3, %v5330_v12  ;;  %v783_v43 = vpop.permute.xlu0 %782  ;;  %v1052_v59 = vadd.f32 %v7170_v17, %v5388_v11  ;;  %v7173_v11 = vld [vmem:[#allocation40_spill] sm:$0xff] }
 0x287   :  { %v1386_v49 = vpop.f32.mrf.mxu0  ;;  %4025 = vmatprep.mubr.msk.f32.mxu1 %vm1395_vm0, %v992_v34  ;;  %v1327_v23 = vadd.f32 %v5444_v0, %v783_v43  ;;  %v7169_v0 = vld [vmem:[#allocation36_spill] sm:$0xff]  ;;  %v1067_v1 = vadd.f32 %v7173_v11, %v5378_v46  ;;  %v1922_v11 = vld [vmem:[%s7036_s4 + $0x68] sm:$0xff] }
 0x288   :  { %v1387_v62 = vadd.f32 %v1386_v49, %v843_v44  ;;  %v1032_v44 = vadd.f32 %v7166_v8, %v5364_v60  ;;  %v7168_v60 = vld [vmem:[#allocation35_spill] sm:$0xff] }
 0x289   :  { %v1388_v50 = vpop.f32.mrf.mxu0 }
 0x28a   :  { %4026 = vmatmul.mubr.msk.f32.gmra.mxu1 %vm1395_vm0, %v992_v34  ;;  %v1047_v34 = vadd.f32 %v7169_v0, %v5354_v28  ;;  %v7172_v28 = vld [vmem:[#allocation39_spill] sm:$0xff]  ;;  %v1909_v50 = vld [vmem:[%s7036_s4] sm:$0xff] }
 0x28b   :  { %v1391_v33 = vpop.f32.mrf.mxu0  ;;  %4027 = vmatprep.mubr.msk.f32.mxu1 %vm1395_vm0, %v997_v29  ;;  %v1062_v49 = vadd.f32 %v7172_v28, %v5396_v16  ;;  %v1921_v28 = vld [vmem:[%s7036_s4 + $0x60] sm:$0xff] }
 0x28c   :  { %v1392_v13 = vadd.f32 %v1391_v33, %v848_v57  ;;  %v1347_v57 = vadd.f32 %v5484_v6, %v803_v48  ;;  %v788_v6 = vpop.permute.xlu1 %787  ;;  %v1910_v33 = vld [vmem:[%s7036_s4 + $0x8] sm:$0xff] }
 0x28d   :  { %v1393_v19 = vpop.f32.mrf.mxu0  ;;  %v1332_v12 = vadd.f32 %v5454_v22, %v788_v6  ;;  %v1042_v22 = vadd.f32 %v7168_v60, %v5376_v2  ;;  %v7171_v2 = vld [vmem:[#allocation38_spill] sm:$0xff]  ;;  %v1918_v6 = vld [vmem:[%s7036_s4 + $0x48] sm:$0xff] }
 0x28e   :  { %4028 = vmatmul.mubr.msk.f32.gmra.mxu1 %vm1395_vm0, %v997_v29  ;;  %v1057_v61 = vadd.f32 %v7171_v2, %v5366_v40  ;;  %v7174_v40 = vld [vmem:[#allocation41_spill] sm:$0xff]  ;;  %v1911_v19 = vld [vmem:[%s7036_s4 + $0x10] sm:$0xff] }
 0x28f   :  { %2646 = vmatpush2.msra.mxu1 %v1392_v13  ;;  %4029 = vmatprep.mubr.msk.f32.mxu1 %vm1395_vm0, %v1002_v9  ;;  %v1072_v38 = vadd.f32 %v7174_v40, %v5404_v53 }
 0x290   :  { %2647 = vmatprep.subr.mxu1 %v7137_v37 }
 0x291   :  { %2648 = vmatpush2.msra.mxu1 %v1387_v62  ;;  %v1912_v62 = vld [vmem:[%s7036_s4 + $0x18] sm:$0xff] }
 0x292   :  { %2649 = vmatprep.subr.mxu1 %v7137_v37  ;;  %4030 = vmatmul.mubr.msk.f32.gmra.mxu1 %vm1395_vm0, %v1002_v9 }
 0x293   :  { %2650 = vmatpush2.msra.mxu1 %v1382_v58  ;;  %4031 = vmatprep.mubr.msk.f32.mxu1 %vm1395_vm0, %v1007_v47 }
 0x294   :  { %2651 = vmatprep.subr.mxu1 %v7137_v37 }
 0x295   :  { %2652 = vmatpush2.msra.mxu1 %v1377_v42 }
 0x296   :  { %2653 = vmatprep.subr.mxu1 %v7137_v37  ;;  %4032 = vmatmul.mubr.msk.f32.gmra.mxu1 %vm1395_vm0, %v1007_v47 }
 0x297   :  { %2654 = vmatpush2.msra.mxu1 %v1372_v35  ;;  %4033 = vmatprep.mubr.msk.f32.mxu1 %vm1395_vm0, %v1012_v30  ;;  %v1914_v35 = vld [vmem:[%s7036_s4 + $0x28] sm:$0xff] }
 0x298   :  { %2655 = vmatprep.subr.mxu1 %v7137_v37 }
 0x299   :  { %2656 = vmatpush2.msra.mxu1 %v1367_v51 }
 0x29a   :  { %2657 = vmatprep.subr.mxu1 %v7137_v37  ;;  %4034 = vmatmul.mubr.msk.f32.gmra.mxu1 %vm1395_vm0, %v1012_v30 }
 0x29b   :  { %2658 = vmatpush2.msra.mxu1 %v1362_v20  ;;  %4035 = vmatprep.mubr.msk.f32.mxu1 %vm1395_vm0, %v1017_v15 }
 0x29c   :  { %2659 = vmatprep.subr.mxu1 %v7137_v37 }
 0x29d   :  { %2660 = vmatpush2.msra.mxu1 %v1357_v18  ;;  %v1915_v18 = vld [vmem:[%s7036_s4 + $0x30] sm:$0xff] }
 0x29e   :  { %2661 = vmatprep.subr.mxu1 %v7137_v37  ;;  %4036 = vmatmul.mubr.msk.f32.gmra.mxu1 %vm1395_vm0, %v1017_v15 }
 0x29f   :  { %2662 = vmatpush2.msra.mxu1 %v1352_v7  ;;  %4037 = vmatprep.mubr.msk.f32.mxu1 %vm1395_vm0, %v1022_v31 }
 0x2a0   :  { %2663 = vmatprep.subr.mxu1 %v7137_v37 }
 0x2a1   :  { %2664 = vmatpush2.msra.mxu1 %v1347_v57 }
 0x2a2   :  { %2665 = vmatprep.subr.mxu1 %v7137_v37  ;;  %4038 = vmatmul.mubr.msk.f32.gmra.mxu1 %vm1395_vm0, %v1022_v31  ;;  %v1916_v31 = vld [vmem:[%s7036_s4 + $0x38] sm:$0xff] }
 0x2a3   :  { %2666 = vmatpush2.msra.mxu1 %v1342_v52  ;;  %4039 = vmatprep.mubr.msk.f32.mxu1 %vm1395_vm0, %v1027_v45  ;;  %v1917_v52 = vld [vmem:[%s7036_s4 + $0x40] sm:$0xff] }
 0x2a4   :  { %2667 = vmatprep.subr.mxu1 %v7137_v37 }
 0x2a5   :  { %2668 = vmatpush2.msra.mxu1 %v1337_v63 }
 0x2a6   :  { %2669 = vmatprep.subr.mxu1 %v7137_v37  ;;  %4040 = vmatmul.mubr.msk.f32.gmra.mxu1 %vm1395_vm0, %v1027_v45 }
 0x2a7   :  { %2670 = vmatpush2.msra.mxu1 %v1332_v12  ;;  %4041 = vmatprep.mubr.msk.f32.mxu1 %vm1395_vm0, %v1032_v44 }
 0x2a8   :  { %2671 = vmatprep.subr.mxu1 %v7137_v37 }
 0x2a9   :  { %2672 = vmatpush2.msra.mxu1 %v1327_v23 }
 0x2aa   :  { %4042 = vmatmul.mubr.msk.f32.gmra.mxu1 %vm1395_vm0, %v1032_v44  ;;  %2673 = vmatprep.subr.mxu1 %v7137_v37 }
 0x2ab   :  { %4043 = vmatprep.mubr.msk.f32.mxu1 %vm1395_vm0, %v1037_v32 }
 0x2ae   :  { %4044 = vmatmul.mubr.msk.f32.gmra.mxu1 %vm1395_vm0, %v1037_v32  ;;  %v1919_v32 = vld [vmem:[%s7036_s4 + $0x50] sm:$0xff] }
 0x2af   :  { %4045 = vmatprep.mubr.msk.f32.mxu1 %vm1395_vm0, %v1042_v22 }
 0x2b2   :  { %4046 = vmatmul.mubr.msk.f32.gmra.mxu1 %vm1395_vm0, %v1042_v22  ;;  %v1920_v22 = vld [vmem:[%s7036_s4 + $0x58] sm:$0xff] }
 0x2b3   :  { %4047 = vmatprep.mubr.msk.f32.mxu1 %vm1395_vm0, %v1047_v34 }
 0x2b6   :  { %4048 = vmatmul.mubr.msk.f32.gmra.mxu1 %vm1395_vm0, %v1047_v34 }
 0x2b7   :  { %4049 = vmatprep.mubr.msk.f32.mxu1 %vm1395_vm0, %v1052_v59 }
 0x2ba   :  { %4050 = vmatmul.mubr.msk.f32.gmra.mxu1 %vm1395_vm0, %v1052_v59 }
 0x2bb   :  { %4051 = vmatprep.mubr.msk.f32.mxu1 %vm1395_vm0, %v1057_v61 }
 0x2be   :  { %4052 = vmatmul.mubr.msk.f32.gmra.mxu1 %vm1395_vm0, %v1057_v61 }
 0x2bf   :  { %4053 = vmatprep.mubr.msk.f32.mxu1 %vm1395_vm0, %v1062_v49 }
 0x2c2   :  { %4054 = vmatmul.mubr.msk.f32.gmra.mxu1 %vm1395_vm0, %v1062_v49 }
 0x2c3   :  { %4055 = vmatprep.mubr.msk.f32.mxu1 %vm1395_vm0, %v1067_v1 }
 0x2c6   :  { %4056 = vmatmul.mubr.msk.f32.gmra.mxu1 %vm1395_vm0, %v1067_v1 }
 0x2c7   :  { %4057 = vmatprep.mubr.msk.f32.mxu1 %vm1395_vm0, %v1072_v38 }
 0x2ca   :  { %4058 = vmatmul.mubr.msk.f32.gmra.mxu1 %vm1395_vm0, %v1072_v38 }
 0x30e   :  { %v1654_v16 = vpop.f32.mrf.mxu1 }
 0x30f   :  { %v1845_v29 = vmul.f32 0.35355338, %v1654_v16 }
 0x310   :  { %v1656_v46 = vpop.f32.mrf.mxu1 }
 0x311   :  { %v1846_v21 = vmul.f32 0.35355338, %v1656_v46  ;;  %v5624_v53 = vadd.f32 %v1909_v50, %v1845_v29  ;;  %v1923_v46 = vld [vmem:[%s7036_s4 + $0x70] sm:$0xff] }
 0x312   :  { %v1660_v13 = vpop.f32.mrf.mxu1 }
 0x313   :  { %v1847_v39 = vmul.f32 0.35355338, %v1660_v13  ;;  %v5626_v9 = vadd.f32 %v1910_v33, %v1846_v21  ;;  %v1924_v21 = vld [vmem:[%s7036_s4 + $0x78] sm:$0xff] }
 0x314   :  { %v1662_v10 = vpop.f32.mrf.mxu1 }
 0x315   :  { %v1848_v25 = vmul.f32 0.35355338, %v1662_v10  ;;  %v2037_v47 = vmax.f32 %v5624_v53, %v5626_v9  ;;  %v5636_v41 = vadd.f32 %v1911_v19, %v1847_v39 }
 0x316   :  { %v1666_v58 = vpop.f32.mrf.mxu1 }
 0x317   :  { %v1849_v42 = vmul.f32 0.35355338, %v1666_v58  ;;  %2038 = vmax.xlane.f32.xlu0 %v2037_v47  ;;  %v5638_v56 = vadd.f32 %v1912_v62, %v1848_v25  ;;  %v1925_v47 = vld [vmem:[%s7036_s4 + $0x80] sm:$0xff] }
 0x318   :  { %v1668_v30 = vpop.f32.mrf.mxu1 }
 0x319   :  { %v1850_v51 = vmul.f32 0.35355338, %v1668_v30  ;;  %v2040_v24 = vmax.f32 %v5636_v41, %v5638_v56  ;;  %v5648_v15 = vadd.f32 %v1913_v27, %v1849_v42  ;;  %v1926_v42 = vld [vmem:[%s7036_s4 + $0x88] sm:$0xff] }
 0x31a   :  { %v1672_v4 = vpop.f32.mrf.mxu1 }
 0x31b   :  { %v5650_v20 = vadd.f32 %v1914_v35, %v1850_v51  ;;  %v1851_v48 = vmul.f32 0.35355338, %v1672_v4  ;;  %2041 = vmax.xlane.f32.xlu1 %v2040_v24 }
 0x31c   :  { %v1674_v36 = vpop.f32.mrf.mxu1 }
 0x31d   :  { %v1852_v7 = vmul.f32 0.35355338, %v1674_v36  ;;  %v2043_v26 = vmax.f32 %v5648_v15, %v5650_v20  ;;  %v5660_v54 = vadd.f32 %v1915_v18, %v1851_v48  ;;  %v1927_v48 = vld [vmem:[%s7036_s4 + $0x90] sm:$0xff]  ;;  %v1928_v36 = vld [vmem:[%s7036_s4 + $0x98] sm:$0xff] }
 0x31e   :  { %v1678_v57 = vpop.f32.mrf.mxu1 }
 0x31f   :  { %v5662_v3 = vadd.f32 %v1916_v31, %v1852_v7  ;;  %v1853_v45 = vmul.f32 0.35355338, %v1678_v57  ;;  %2044 = vmax.xlane.f32.xlu0 %v2043_v26 }
 0x320   :  { %v1680_v63 = vpop.f32.mrf.mxu1 }
 0x321   :  { %v1854_v8 = vmul.f32 0.35355338, %v1680_v63  ;;  %v2046_v44 = vmax.f32 %v5660_v54, %v5662_v3  ;;  %v5672_v43 = vadd.f32 %v1917_v52, %v1853_v45  ;;  %v1929_v63 = vld [vmem:[%s7036_s4 + $0xa0] sm:$0xff] }
 0x322   :  { %v1684_v12 = vpop.f32.mrf.mxu1 }
 0x323   :  { %v1855_v23 = vmul.f32 0.35355338, %v1684_v12  ;;  %2047 = vmax.xlane.f32.xlu0 %v2046_v44  ;;  %v5674_v14 = vadd.f32 %v1918_v6, %v1854_v8  ;;  %v1930_v8 = vld [vmem:[%s7036_s4 + $0xa8] sm:$0xff] }
 0x324   :  { %v1686_v60 = vpop.f32.mrf.mxu1 }
 0x325   :  { %v1856_v0 = vmul.f32 0.35355338, %v1686_v60  ;;  %v2049_v34 = vmax.f32 %v5672_v43, %v5674_v14  ;;  %v5684_v59 = vadd.f32 %v1919_v32, %v1855_v23 }
 0x326   :  { %v1690_v17 = vpop.f32.mrf.mxu1 }
 0x327   :  { %v5686_v2 = vadd.f32 %v1920_v22, %v1856_v0  ;;  %v1857_v61 = vmul.f32 0.35355338, %v1690_v17  ;;  %2050 = vmax.xlane.f32.xlu1 %v2049_v34  ;;  %v1931_v0 = vld [vmem:[%s7036_s4 + $0xb0] sm:$0xff]  ;;  %v1932_v17 = vld [vmem:[%s7036_s4 + $0xb8] sm:$0xff] }
 0x328   :  { %v1692_v49 = vpop.f32.mrf.mxu1 }
 0x329   :  { %v1858_v1 = vmul.f32 0.35355338, %v1692_v49  ;;  %v2052_v40 = vmax.f32 %v5684_v59, %v5686_v2  ;;  %v5696_v16 = vadd.f32 %v1921_v28, %v1857_v61 }
 0x32a   :  { %v1696_v38 = vpop.f32.mrf.mxu1 }
 0x32b   :  { %v1859_v29 = vmul.f32 0.35355338, %v1696_v38  ;;  %2053 = vmax.xlane.f32.xlu0 %v2052_v40  ;;  %v5698_v50 = vadd.f32 %v1922_v11, %v1858_v1  ;;  %v1933_v38 = vld [vmem:[%s7036_s4 + $0xc0] sm:$0xff] }
 0x32c   :  { %v1698_v33 = vpop.f32.mrf.mxu1 }
 0x32d   :  { %v1860_v13 = vmul.f32 0.35355338, %v1698_v33  ;;  %v2055_v39 = vmax.f32 %v5696_v16, %v5698_v50  ;;  %v5708_v10 = vadd.f32 %v1923_v46, %v1859_v29  ;;  %v1934_v46 = vld [vmem:[%s7036_s4 + $0xc8] sm:$0xff] }
 0x32e   :  { %v1702_v19 = vpop.f32.mrf.mxu1 }
 0x32f   :  { %v5710_v62 = vadd.f32 %v1924_v21, %v1860_v13  ;;  %v1861_v25 = vmul.f32 0.35355338, %v1702_v19  ;;  %2056 = vmax.xlane.f32.xlu1 %v2055_v39 }
 0x330   :  { %v1704_v58 = vpop.f32.mrf.mxu1 }
 0x331   :  { %v1862_v27 = vmul.f32 0.35355338, %v1704_v58  ;;  %v2058_v30 = vmax.f32 %v5708_v10, %v5710_v62  ;;  %v5720_v51 = vadd.f32 %v1925_v47, %v1861_v25  ;;  %v1935_v47 = vld [vmem:[%s7036_s4 + $0xd0] sm:$0xff] }
 0x332   :  { %v1708_v35 = vpop.f32.mrf.mxu1 }
 0x333   :  { %v5722_v24 = vadd.f32 %v1926_v42, %v1862_v27  ;;  %v1863_v4 = vmul.f32 0.35355338, %v1708_v35  ;;  %2059 = vmax.xlane.f32.xlu0 %v2058_v30  ;;  %v1936_v42 = vld [vmem:[%s7036_s4 + $0xd8] sm:$0xff] }
 0x334   :  { %v1710_v18 = vpop.f32.mrf.mxu1 }
 0x335   :  { %v1864_v31 = vmul.f32 0.35355338, %v1710_v18  ;;  %v2061_v7 = vmax.f32 %v5720_v51, %v5722_v24  ;;  %v5732_v57 = vadd.f32 %v1927_v48, %v1863_v4 }
 0x336   :  { %v1714_v26 = vpop.f32.mrf.mxu1 }
 0x337   :  { %v5734_v45 = vadd.f32 %v1928_v36, %v1864_v31  ;;  %v1865_v52 = vmul.f32 0.35355338, %v1714_v26  ;;  %2062 = vmax.xlane.f32.xlu1 %v2061_v7  ;;  %v1937_v36 = vld [vmem:[%s7036_s4 + $0xe0] sm:$0xff]  ;;  %v1938_v7 = vld [vmem:[%s7036_s4 + $0xe8] sm:$0xff] }
 0x338   :  { %v1716_v6 = vpop.f32.mrf.mxu1 }
 0x339   :  { %v1866_v44 = vmul.f32 0.35355338, %v1716_v6  ;;  %v2064_v12 = vmax.f32 %v5732_v57, %v5734_v45  ;;  %v5744_v32 = vadd.f32 %v1929_v63, %v1865_v52 }
 0x33a   :  { %v1720_v23 = vpop.f32.mrf.mxu1 }
 0x33b   :  { %v5746_v60 = vadd.f32 %v1930_v8, %v1866_v44  ;;  %v1867_v22 = vmul.f32 0.35355338, %v1720_v23  ;;  %2065 = vmax.xlane.f32.xlu0 %v2064_v12  ;;  %v1939_v12 = vld [vmem:[%s7036_s4 + $0xf0] sm:$0xff] }
 0x33c   :  { %v1722_v34 = vpop.f32.mrf.mxu1 }
 0x33d   :  { %v1868_v61 = vmul.f32 0.35355338, %v1722_v34  ;;  %v2067_v28 = vmax.f32 %v5744_v32, %v5746_v60  ;;  %v5756_v11 = vadd.f32 %v1931_v0, %v1867_v22  ;;  %v1940_v22 = vld [vmem:[%s7036_s4 + $0xf8] sm:$0xff] }
 0x33e   :  { %v1726_v49 = vpop.f32.mrf.mxu1 }
 0x33f   :  { %v5758_v1 = vadd.f32 %v1932_v17, %v1868_v61  ;;  %v1869_v40 = vmul.f32 0.35355338, %v1726_v49  ;;  %2068 = vmax.xlane.f32.xlu1 %v2067_v28 }
 0x340   :  { %v1728_v29 = vpop.f32.mrf.mxu1 }
 0x341   :  { %v1870_v33 = vmul.f32 0.35355338, %v1728_v29  ;;  %v2070_v21 = vmax.f32 %v5756_v11, %v5758_v1  ;;  %v5768_v39 = vadd.f32 %v1933_v38, %v1869_v40  ;;  %v1941_v40 = vld [vmem:[%s7036_s4 + $0x100] sm:$0xff]  ;;  %v1942_v29 = vld [vmem:[%s7036_s4 + $0x108] sm:$0xff] }
 0x342   :  { %v1732_v13 = vpop.f32.mrf.mxu1 }
 0x343   :  { %v5770_v19 = vadd.f32 %v1934_v46, %v1870_v33  ;;  %v1871_v25 = vmul.f32 0.35355338, %v1732_v13  ;;  %2071 = vmax.xlane.f32.xlu0 %v2070_v21 }
 0x344   :  { %v1734_v58 = vpop.f32.mrf.mxu1 }
 0x345   :  { %v1872_v27 = vmul.f32 0.35355338, %v1734_v58  ;;  %v2073_v30 = vmax.f32 %v5768_v39, %v5770_v19  ;;  %v5780_v4 = vadd.f32 %v1935_v47, %v1871_v25  ;;  %v1943_v58 = vld [vmem:[%s7036_s4 + $0x110] sm:$0xff] }
 0x346   :  { %v1738_v35 = vpop.f32.mrf.mxu1 }
 0x347   :  { %v5782_v48 = vadd.f32 %v1936_v42, %v1872_v27  ;;  %v1873_v18 = vmul.f32 0.35355338, %v1738_v35  ;;  %2074 = vmax.xlane.f32.xlu1 %v2073_v30  ;;  %v1944_v27 = vld [vmem:[%s7036_s4 + $0x118] sm:$0xff] }
 0x348   :  { %v1740_v31 = vpop.f32.mrf.mxu1 }
 0x349   :  { %v1874_v26 = vmul.f32 0.35355338, %v1740_v31  ;;  %v2076_v52 = vmax.f32 %v5780_v4, %v5782_v48  ;;  %v5792_v6 = vadd.f32 %v1937_v36, %v1873_v18 }
 0x34a   :  { %v1744_v63 = vpop.f32.mrf.mxu1 }
 0x34b   :  { %v5794_v8 = vadd.f32 %v1938_v7, %v1874_v26  ;;  %v1875_v44 = vmul.f32 0.35355338, %v1744_v63  ;;  %2077 = vmax.xlane.f32.xlu0 %v2076_v52  ;;  %v1945_v26 = vld [vmem:[%s7036_s4 + $0x120] sm:$0xff]  ;;  %v1946_v63 = vld [vmem:[%s7036_s4 + $0x128] sm:$0xff] }
 0x34c   :  { %v1746_v23 = vpop.f32.mrf.mxu1 }
 0x34d   :  { %v1876_v0 = vmul.f32 0.35355338, %v1746_v23  ;;  %v2079_v34 = vmax.f32 %v5792_v6, %v5794_v8  ;;  %v5804_v61 = vadd.f32 %v1939_v12, %v1875_v44 }
 0x34e   :  { %v1750_v17 = vpop.f32.mrf.mxu1 }
 0x34f   :  { %v5806_v28 = vadd.f32 %v1940_v22, %v1876_v0  ;;  %v1877_v49 = vmul.f32 0.35355338, %v1750_v17  ;;  %2080 = vmax.xlane.f32.xlu0 %v2079_v34  ;;  %v1947_v17 = vld [vmem:[%s7036_s4 + $0x130] sm:$0xff] }
 0x350   :  { %v1752_v38 = vpop.f32.mrf.mxu1 }
 0x351   :  { %v1878_v46 = vmul.f32 0.35355338, %v1752_v38  ;;  %v2082_v33 = vmax.f32 %v5804_v61, %v5806_v28  ;;  %v5816_v13 = vadd.f32 %v1941_v40, %v1877_v49  ;;  %v1948_v40 = vld [vmem:[%s7036_s4 + $0x138] sm:$0xff] }
 0x352   :  { %v1756_v21 = vpop.f32.mrf.mxu1 }
 0x353   :  { %v5818_v25 = vadd.f32 %v1942_v29, %v1878_v46  ;;  %v1879_v47 = vmul.f32 0.35355338, %v1756_v21  ;;  %2083 = vmax.xlane.f32.xlu1 %v2082_v33 }
 0x354   :  { %v1758_v42 = vpop.f32.mrf.mxu1 }
 0x355   :  { %v1880_v30 = vmul.f32 0.35355338, %v1758_v42  ;;  %v2085_v35 = vmax.f32 %v5816_v13, %v5818_v25  ;;  %v5828_v36 = vadd.f32 %v1943_v58, %v1879_v47 }
 0x356   :  { %v1762_v18 = vpop.f32.mrf.mxu1 }
 0x357   :  { %v5830_v31 = vadd.f32 %v1944_v27, %v1880_v30  ;;  %v1881_v7 = vmul.f32 0.35355338, %v1762_v18  ;;  %2086 = vmax.xlane.f32.xlu0 %v2085_v35  ;;  %v1951_v30 = vld [vmem:[%s7036_s4 + $0x150] sm:$0xff]  ;;  %v1952_v18 = vld [vmem:[%s7036_s4 + $0x158] sm:$0xff] }
 0x358   :  { %v1764_v52 = vpop.f32.mrf.mxu1 }
 0x359   :  { %v1882_v44 = vmul.f32 0.35355338, %v1764_v52  ;;  %v2088_v12 = vmax.f32 %v5828_v36, %v5830_v31  ;;  %v5840_v22 = vadd.f32 %v1945_v26, %v1881_v7 }
 0x35a   :  { %v1768_v23 = vpop.f32.mrf.mxu1 }
 0x35b   :  { %v5842_v0 = vadd.f32 %v1946_v63, %v1882_v44  ;;  %v1883_v34 = vmul.f32 0.35355338, %v1768_v23  ;;  %2089 = vmax.xlane.f32.xlu1 %v2088_v12  ;;  %v355_v23 = vld [vmem:[%s7035_s3 + $0x288] sm:$0xff] }
 0x35c   :  { %v1770_v49 = vpop.f32.mrf.mxu1 }
 0x35d   :  { %v1884_v38 = vmul.f32 0.35355338, %v1770_v49  ;;  %v2091_v29 = vmax.f32 %v5840_v22, %v5842_v0  ;;  %v5852_v33 = vadd.f32 %v1947_v17, %v1883_v34 }
 0x35e   :  { %v1774_v46 = vpop.f32.mrf.mxu1 }
 0x35f   :  { %7175 = vst [vmem:[#allocation48_spill] sm:$0xff] %v5852_v33  ;;  %v5854_v21 = vadd.f32 %v1948_v40, %v1884_v38  ;;  %2092 = vmax.xlane.f32.xlu0 %v2091_v29 }
 0x360   :  { %v1776_v47 = vpop.f32.mrf.mxu1 }
 0x361   :  { %7176 = vst [vmem:[#allocation44_spill] sm:$0xff] %v5854_v21  ;;  %v2094_v58 = vmax.f32 %v5852_v33, %v5854_v21  ;;  %v1953_v21 = vld [vmem:[%s7036_s4 + $0x160] sm:$0xff] }
 0x362   :  { %v1780_v42 = vpop.f32.mrf.mxu1 }
 0x363   :  { %v1887_v27 = vmul.f32 0.35355338, %v1780_v42  ;;  %2095 = vmax.xlane.f32.xlu0 %v2094_v58  ;;  %v354_v58 = vld [vmem:[%s7035_s3 + $0x280] sm:$0xff] }
 0x364   :  { %v1782_v35 = vpop.f32.mrf.mxu1 }
 0x365   :  { %v1888_v7 = vmul.f32 0.35355338, %v1782_v35  ;;  %v5864_v52 = vadd.f32 %v1951_v30, %v1887_v27  ;;  %v1886_v30 = vmul.f32 0.35355338, %v1776_v47  ;;  %v1950_v35 = vld [vmem:[%s7036_s4 + $0x148] sm:$0xff] }
 0x366   :  { %v1786_v26 = vpop.f32.mrf.mxu1 }
 0x367   :  { %7177 = vst [vmem:[#allocation8_spill] sm:$0xff] %v5864_v52  ;;  %v5866_v63 = vadd.f32 %v1952_v18, %v1888_v7  ;;  %v1885_v7 = vmul.f32 0.35355338, %v1774_v46  ;;  %v1889_v47 = vmul.f32 0.35355338, %v1786_v26  ;;  %v1955_v26 = vld [vmem:[%s7036_s4 + $0x170] sm:$0xff] }
 0x368   :  { %v1788_v44 = vpop.f32.mrf.mxu1 }
 0x369   :  { %7178 = vst [vmem:[#allocation46_spill] sm:$0xff] %v5866_v63  ;;  %v2100_v12 = vmax.f32 %v5864_v52, %v5866_v63  ;;  %v1890_v5 = vmul.f32 0.35355338, %v1788_v44  ;;  %v1954_v63 = vld [vmem:[%s7036_s4 + $0x168] sm:$0xff]  ;;  %v1956_v44 = vld [vmem:[%s7036_s4 + $0x178] sm:$0xff]  ;;  %v5899_v37 = vadd.f32 %v1953_v21, %v1889_v47 }
 0x36a   :  { %v1792_v34 = vpop.f32.mrf.mxu1 }
 0x36b   :  { %2101 = vmax.xlane.f32.xlu0 %v2100_v12  ;;  %v1949_v12 = vld [vmem:[%s7036_s4 + $0x140] sm:$0xff]  ;;  %v5892_v46 = vadd.f32 %v1954_v63, %v1890_v5 }
 0x36c   :  { %777 = vperm.xlu1 %4324, %v355_v23   ;;  %v1794_v17 = vpop.f32.mrf.mxu1  ;;  %v5882_v23 = vadd.f32 %v1950_v35, %v1886_v30  ;;  %v5887_v52 = vadd.f32 %v1949_v12, %v1885_v7  ;;  %v1891_v7 = vmul.f32 0.35355338, %v1792_v34  ;;  %v1957_v34 = vld [vmem:[%s7036_s4 + $0x180] sm:$0xff] }
 0x36d   :  { %7181 = vst [vmem:[#allocation9_spill] sm:$0xff] %v5892_v46  ;;  %v1892_v33 = vmul.f32 0.35355338, %v1794_v17  ;;  %v2103_v63 = vmax.f32 %v5899_v37, %v5892_v46  ;;  %v1958_v17 = vld [vmem:[%s7036_s4 + $0x188] sm:$0xff] }
 0x36e   :  { %v1798_v49 = vpop.f32.mrf.mxu1  ;;  %7179 = vst [vmem:[#allocation49_spill] sm:$0xff] %v5882_v23  ;;  %7180 = vst [vmem:[#allocation43_spill] sm:$0xff] %v5887_v52  ;;  %v2097_v30 = vmax.f32 %v5887_v52, %v5882_v23  ;;  %v5911_v52 = vadd.f32 %v1955_v26, %v1891_v7 }
 0x36f   :  { %v5904_v12 = vadd.f32 %v1956_v44, %v1892_v33  ;;  %v1893_v21 = vmul.f32 0.35355338, %v1798_v49  ;;  %v1959_v49 = vld [vmem:[%s7036_s4 + $0x190] sm:$0xff] }
 0x370   :  { %v1800_v40 = vpop.f32.mrf.mxu1  ;;  %7183 = vst [vmem:[#allocation51_spill] sm:$0xff] %v5911_v52 }
 0x371   :  { %7182 = vst [vmem:[#allocation45_spill] sm:$0xff] %v5904_v12  ;;  %v1894_v5 = vmul.f32 0.35355338, %v1800_v40  ;;  %v2106_v40 = vmax.f32 %v5911_v52, %v5904_v12  ;;  %v5923_v46 = vadd.f32 %v1957_v34, %v1893_v21 }
 0x372   :  { %v1804_v38 = vpop.f32.mrf.mxu1 }
 0x373   :  { %v5916_v47 = vadd.f32 %v1958_v17, %v1894_v5  ;;  %7185 = vst [vmem:[#allocation53_spill] sm:$0xff] %v5923_v46  ;;  %v1895_v7 = vmul.f32 0.35355338, %v1804_v38  ;;  %v1961_v38 = vld [vmem:[%s7036_s4 + $0x1a0] sm:$0xff] }
 0x374   :  { %v1806_v29 = vpop.f32.mrf.mxu1 }
 0x375   :  { %7184 = vst [vmem:[#allocation42_spill] sm:$0xff] %v5916_v47  ;;  %v1896_v33 = vmul.f32 0.35355338, %v1806_v29  ;;  %v2109_v29 = vmax.f32 %v5923_v46, %v5916_v47  ;;  %v5935_v12 = vadd.f32 %v1959_v49, %v1895_v7  ;;  %v1963_v49 = vld [vmem:[%s7036_s4 + $0x1b0] sm:$0xff] }
 0x376   :  { %v1810_v42 = vpop.f32.mrf.mxu1 }
 0x377   :  { %7187 = vst [vmem:[#allocation10_spill] sm:$0xff] %v5935_v12  ;;  %v1897_v21 = vmul.f32 0.35355338, %v1810_v42 }
 0x378   :  { %v1812_v27 = vpop.f32.mrf.mxu1 }
 0x379   :  { %v1898_v5 = vmul.f32 0.35355338, %v1812_v27  ;;  %v5947_v47 = vadd.f32 %v1961_v38, %v1897_v21 }
 0x37a   :  { %v1816_v18 = vpop.f32.mrf.mxu1 }
 0x37b   :  { %v1899_v7 = vmul.f32 0.35355338, %v1816_v18  ;;  %v1966_v18 = vld [vmem:[%s7036_s4 + $0x1c8] sm:$0xff] }
 0x381   :  { %772 = vperm.xlu0 %4323, %v354_v58   ;;  %v1818_v58 = vpop.f32.mrf.mxu1 }
 0x383   :  { %v1822_v35 = vpop.f32.mrf.mxu1 }
 0x384   :  { %v1901_v46 = vmul.f32 0.35355338, %v1822_v35  ;;  %v1968_v35 = vld [vmem:[%s7036_s4 + $0x1d8] sm:$0xff] }
 0x385   :  { %v1824_v23 = vpop.f32.mrf.mxu1 }
 0x387   :  { %v1828_v44 = vpop.f32.mrf.mxu1 }
 0x389   :  { %v1830_v17 = vpop.f32.mrf.mxu1 }
 0x390   :  { %2098 = vmax.xlane.f32.xlu1 %v2097_v30  ;;  %v1960_v30 = vld [vmem:[%s7036_s4 + $0x198] sm:$0xff] }
 0x391   :  { %v5928_v26 = vadd.f32 %v1960_v30, %v1896_v33  ;;  %v1900_v33 = vmul.f32 0.35355338, %v1818_v58  ;;  %v1834_v30 = vpop.f32.mrf.mxu1 }
 0x393   :  { %7186 = vst [vmem:[#allocation11_spill] sm:$0xff] %v5928_v26  ;;  %v2112_v27 = vmax.f32 %v5935_v12, %v5928_v26  ;;  %v1836_v21 = vpop.f32.mrf.mxu1  ;;  %v5961_v12 = vadd.f32 %v1963_v49, %v1899_v7 }
 0x394   :  { %2104 = vmax.xlane.f32.xlu1 %v2103_v63  ;;  %v1962_v63 = vld [vmem:[%s7036_s4 + $0x1a8] sm:$0xff] }
 0x395   :  { %v5940_v34 = vadd.f32 %v1962_v63, %v1898_v5  ;;  %v1902_v63 = vmul.f32 0.35355338, %v1824_v23 }
 0x397   :  { %v2115_v26 = vmax.f32 %v5947_v47, %v5940_v34 }
 0x398   :  { %2107 = vmax.xlane.f32.xlu1 %v2106_v40  ;;  %v1964_v40 = vld [vmem:[%s7036_s4 + $0x1b8] sm:$0xff] }
 0x39c   :  { %2110 = vmax.xlane.f32.xlu1 %v2109_v29  ;;  %v5954_v29 = vadd.f32 %v1964_v40, %v1900_v33  ;;  %v5968_v33 = vadd.f32 %v1966_v18, %v1902_v63  ;;  %v1904_v40 = vmul.f32 0.35355338, %v1830_v17  ;;  %v1906_v18 = vmul.f32 0.35355338, %v1836_v21 }
 0x39e   :  { %v2118_v7 = vmax.f32 %v5961_v12, %v5954_v29  ;;  %v5982_v63 = vadd.f32 %v1968_v35, %v1904_v40 }
 0x3a0   :  { %v2039_v42 = vpop.xlane.xlu0 %2038  ;;  %2113 = vmax.xlane.f32.xlu1 %v2112_v27 }
 0x3a1   :  { %v2133_v5 = vsub.f32 %v5624_v53, %v2039_v42  ;;  %v2134_v58 = vsub.f32 %v5626_v9, %v2039_v42  ;;  %v1965_v53 = vld [vmem:[%s7036_s4 + $0x1c0] sm:$0xff] }
 0x3a3   :  { %v2197_v38 = vmul.f32 1.442695, %v2133_v5  ;;  %v2199_v27 = vmul.f32 1.442695, %v2134_v58  ;;  %v5975_v5 = vadd.f32 %v1965_v53, %v1901_v46  ;;  %v1903_v58 = vmul.f32 0.35355338, %v1828_v44 }
 0x3a4   :  { %v2042_v52 = vpop.xlane.xlu1 %2041  ;;  %2116 = vmax.xlane.f32.xlu1 %v2115_v26  ;;  %v1840_v26 = vpop.f32.mrf.mxu1  ;;  %v1970_v44 = vld [vmem:[%s7036_s4 + $0x1e8] sm:$0xff] }
 0x3a5   :  { %4325 = vpow2.f32 %v2197_v38  ;;  %v2135_v9 = vsub.f32 %v5636_v41, %v2042_v52  ;;  %v2136_v23 = vsub.f32 %v5638_v56, %v2042_v52  ;;  %v1967_v56 = vld [vmem:[%s7036_s4 + $0x1d0] sm:$0xff]  ;;  %v2121_v46 = vmax.f32 %v5975_v5, %v5968_v33 }
 0x3a6   :  { %4327 = vpow2.f32 %v2199_v27  ;;  %v1842_v38 = vpop.f32.mrf.mxu1 }
 0x3a7   :  { %v2201_v42 = vmul.f32 1.442695, %v2135_v9  ;;  %v2203_v49 = vmul.f32 1.442695, %v2136_v23  ;;  %v5989_v9 = vadd.f32 %v1967_v56, %v1903_v58  ;;  %v1905_v23 = vmul.f32 0.35355338, %v1834_v30 }
 0x3a8   :  { %v2045_v41 = vpop.xlane.xlu0 %2044  ;;  %2119 = vmax.xlane.f32.xlu1 %v2118_v7  ;;  %v5996_v7 = vadd.f32 %v1970_v44, %v1906_v18  ;;  %v1908_v35 = vmul.f32 0.35355338, %v1842_v38  ;;  %v1972_v30 = vld [vmem:[%s7036_s4 + $0x1f8] sm:$0xff]  ;;  %v1907_v56 = vmul.f32 0.35355338, %v1840_v26 }
 0x3a9   :  { %4329 = vpow2.f32 %v2201_v42  ;;  %v2137_v52 = vsub.f32 %v5648_v15, %v2045_v41  ;;  %v2138_v17 = vsub.f32 %v5650_v20, %v2045_v41  ;;  %v1969_v20 = vld [vmem:[%s7036_s4 + $0x1e0] sm:$0xff]  ;;  %v2124_v42 = vmax.f32 %v5989_v9, %v5982_v63 }
 0x3aa   :  { %4331 = vpow2.f32 %v2203_v49  ;;  %v6003_v41 = vadd.f32 %v1969_v20, %v1905_v23 }
 0x3ab   :  { %v2205_v27 = vmul.f32 1.442695, %v2137_v52  ;;  %v2207_v53 = vmul.f32 1.442695, %v2138_v17 }
 0x3ac   :  { %v2048_v15 = vpop.xlane.xlu0 %2047  ;;  %2122 = vmax.xlane.f32.xlu1 %v2121_v46  ;;  %v6012_v46 = vadd.f32 %v1972_v30, %v1908_v35  ;;  %v2127_v44 = vmax.f32 %v6003_v41, %v5996_v7 }
 0x3ad   :  { %4333 = vpow2.f32 %v2205_v27  ;;  %v2139_v21 = vsub.f32 %v5660_v54, %v2048_v15  ;;  %v2140_v40 = vsub.f32 %v5662_v3, %v2048_v15  ;;  %v1971_v54 = vld [vmem:[%s7036_s4 + $0x1f0] sm:$0xff] }
 0x3ae   :  { %4335 = vpow2.f32 %v2207_v53  ;;  %v6018_v53 = vadd.f32 %v1971_v54, %v1907_v56 }
 0x3af   :  { %v2209_v49 = vmul.f32 1.442695, %v2139_v21  ;;  %v2211_v58 = vmul.f32 1.442695, %v2140_v40 }
 0x3b0   :  { %v2051_v52 = vpop.xlane.xlu1 %2050  ;;  %2125 = vmax.xlane.f32.xlu1 %v2124_v42  ;;  %v2130_v21 = vmax.f32 %v6018_v53, %v6012_v46 }
 0x3b1   :  { %4337 = vpow2.f32 %v2209_v49  ;;  %v2141_v3 = vsub.f32 %v5672_v43, %v2051_v52  ;;  %v2142_v17 = vsub.f32 %v5674_v14, %v2051_v52 }
 0x3b2   :  { %v6010_v18 = vpop.eup %4325  ;;  %4339 = vpow2.f32 %v2211_v58 }
 0x3b3   :  { %v6016_v26 = vpop.eup %4327  ;;  %v2213_v38 = vmul.f32 1.442695, %v2141_v3  ;;  %v2215_v27 = vmul.f32 1.442695, %v2142_v17 }
 0x3b4   :  { %v2054_v23 = vpop.xlane.xlu0 %2053  ;;  %2128 = vmax.xlane.f32.xlu1 %v2127_v44  ;;  %v2325_v43 = vadd.f32 %v6016_v26, %v6010_v18 }
 0x3b5   :  { %4341 = vpow2.f32 %v2213_v38  ;;  %v2143_v14 = vsub.f32 %v5684_v59, %v2054_v23  ;;  %v2144_v15 = vsub.f32 %v5686_v2, %v2054_v23 }
 0x3b6   :  { %v6024_v20 = vpop.eup %4329  ;;  %4343 = vpow2.f32 %v2215_v27  ;;  %2326 = vadd.xlane.f32.xlu0 %v2325_v43 }
 0x3b7   :  { %v6028_v40 = vpop.eup %4331  ;;  %v2217_v35 = vmul.f32 1.442695, %v2143_v14  ;;  %v2219_v42 = vmul.f32 1.442695, %v2144_v15 }
 0x3b8   :  { %v2057_v30 = vpop.xlane.xlu1 %2056  ;;  %2131 = vmax.xlane.f32.xlu1 %v2130_v21  ;;  %v2328_v49 = vadd.f32 %v6028_v40, %v6024_v20 }
 0x3b9   :  { %4345 = vpow2.f32 %v2217_v35  ;;  %v2145_v59 = vsub.f32 %v5696_v16, %v2057_v30  ;;  %v2146_v2 = vsub.f32 %v5698_v50, %v2057_v30 }
 0x3ba   :  { %v6034_v58 = vpop.eup %4333  ;;  %4347 = vpow2.f32 %v2219_v42  ;;  %2329 = vadd.xlane.f32.xlu0 %v2328_v49 }
 0x3bb   :  { %v6036_v56 = vpop.eup %4335  ;;  %v2221_v52 = vmul.f32 1.442695, %v2145_v59  ;;  %v2223_v54 = vmul.f32 1.442695, %v2146_v2 }
 0x3bc   :  { %v2060_v3 = vpop.xlane.xlu0 %2059  ;;  %v2331_v17 = vadd.f32 %v6036_v56, %v6034_v58 }
 0x3bd   :  { %4349 = vpow2.f32 %v2221_v52  ;;  %v2147_v44 = vsub.f32 %v5708_v10, %v2060_v3  ;;  %v2148_v38 = vsub.f32 %v5710_v62, %v2060_v3 }
 0x3be   :  { %v6042_v16 = vpop.eup %4337  ;;  %4351 = vpow2.f32 %v2223_v54  ;;  %2332 = vadd.xlane.f32.xlu0 %v2331_v17 }
 0x3bf   :  { %v6044_v50 = vpop.eup %4339  ;;  %v2225_v27 = vmul.f32 1.442695, %v2147_v44  ;;  %v2227_v23 = vmul.f32 1.442695, %v2148_v38 }
 0x3c0   :  { %v2063_v43 = vpop.xlane.xlu1 %2062  ;;  %v2334_v14 = vadd.f32 %v6044_v50, %v6042_v16 }
 0x3c1   :  { %4353 = vpow2.f32 %v2225_v27  ;;  %v2149_v15 = vsub.f32 %v5720_v51, %v2063_v43  ;;  %v2150_v21 = vsub.f32 %v5722_v24, %v2063_v43 }
 0x3c2   :  { %v6050_v10 = vpop.eup %4341  ;;  %4355 = vpow2.f32 %v2227_v23  ;;  %2335 = vadd.xlane.f32.xlu0 %v2334_v14 }
 0x3c3   :  { %v6052_v62 = vpop.eup %4343  ;;  %v2229_v35 = vmul.f32 1.442695, %v2149_v15  ;;  %v2231_v42 = vmul.f32 1.442695, %v2150_v21 }
 0x3c4   :  { %v2066_v30 = vpop.xlane.xlu0 %2065  ;;  %v2337_v49 = vadd.f32 %v6052_v62, %v6050_v10 }
 0x3c5   :  { %4357 = vpow2.f32 %v2229_v35  ;;  %v2151_v59 = vsub.f32 %v5732_v57, %v2066_v30  ;;  %v2152_v2 = vsub.f32 %v5734_v45, %v2066_v30 }
 0x3c6   :  { %v6058_v51 = vpop.eup %4345  ;;  %4359 = vpow2.f32 %v2231_v42  ;;  %2338 = vadd.xlane.f32.xlu0 %v2337_v49 }
 0x3c7   :  { %v6060_v24 = vpop.eup %4347  ;;  %v2233_v52 = vmul.f32 1.442695, %v2151_v59  ;;  %v2235_v54 = vmul.f32 1.442695, %v2152_v2 }
 0x3c8   :  { %v2069_v3 = vpop.xlane.xlu1 %2068  ;;  %v2340_v17 = vadd.f32 %v6060_v24, %v6058_v51 }
 0x3c9   :  { %4361 = vpow2.f32 %v2233_v52  ;;  %v2153_v44 = vsub.f32 %v5744_v32, %v2069_v3  ;;  %v2154_v38 = vsub.f32 %v5746_v60, %v2069_v3 }
 0x3ca   :  { %v6066_v57 = vpop.eup %4349  ;;  %4363 = vpow2.f32 %v2235_v54  ;;  %2341 = vadd.xlane.f32.xlu0 %v2340_v17 }
 0x3cb   :  { %v6068_v45 = vpop.eup %4351  ;;  %v2237_v27 = vmul.f32 1.442695, %v2153_v44  ;;  %v2239_v23 = vmul.f32 1.442695, %v2154_v38 }
 0x3cc   :  { %v2072_v43 = vpop.xlane.xlu0 %2071  ;;  %v2343_v14 = vadd.f32 %v6068_v45, %v6066_v57 }
 0x3cd   :  { %4365 = vpow2.f32 %v2237_v27  ;;  %v2155_v15 = vsub.f32 %v5756_v11, %v2072_v43  ;;  %v2156_v21 = vsub.f32 %v5758_v1, %v2072_v43 }
 0x3ce   :  { %v6074_v32 = vpop.eup %4353  ;;  %4367 = vpow2.f32 %v2239_v23  ;;  %2344 = vadd.xlane.f32.xlu0 %v2343_v14 }
 0x3cf   :  { %v6076_v60 = vpop.eup %4355  ;;  %v2241_v35 = vmul.f32 1.442695, %v2155_v15  ;;  %v2243_v42 = vmul.f32 1.442695, %v2156_v21 }
 0x3d0   :  { %v2075_v30 = vpop.xlane.xlu1 %2074  ;;  %v2346_v49 = vadd.f32 %v6076_v60, %v6074_v32 }
 0x3d1   :  { %4369 = vpow2.f32 %v2241_v35  ;;  %v2157_v59 = vsub.f32 %v5768_v39, %v2075_v30  ;;  %v2158_v2 = vsub.f32 %v5770_v19, %v2075_v30 }
 0x3d2   :  { %v6082_v11 = vpop.eup %4357  ;;  %4371 = vpow2.f32 %v2243_v42  ;;  %2347 = vadd.xlane.f32.xlu0 %v2346_v49 }
 0x3d3   :  { %v6084_v1 = vpop.eup %4359  ;;  %v2245_v52 = vmul.f32 1.442695, %v2157_v59  ;;  %v2247_v54 = vmul.f32 1.442695, %v2158_v2 }
 0x3d4   :  { %v2078_v3 = vpop.xlane.xlu0 %2077  ;;  %v2349_v17 = vadd.f32 %v6084_v1, %v6082_v11 }
 0x3d5   :  { %4373 = vpow2.f32 %v2245_v52  ;;  %v2159_v44 = vsub.f32 %v5780_v4, %v2078_v3  ;;  %v2160_v38 = vsub.f32 %v5782_v48, %v2078_v3 }
 0x3d6   :  { %v6090_v39 = vpop.eup %4361  ;;  %4375 = vpow2.f32 %v2247_v54  ;;  %2350 = vadd.xlane.f32.xlu1 %v2349_v17 }
 0x3d7   :  { %v6092_v19 = vpop.eup %4363  ;;  %v2249_v27 = vmul.f32 1.442695, %v2159_v44  ;;  %v2251_v23 = vmul.f32 1.442695, %v2160_v38 }
 0x3d8   :  { %v2081_v43 = vpop.xlane.xlu0 %2080  ;;  %v2352_v14 = vadd.f32 %v6092_v19, %v6090_v39 }
 0x3d9   :  { %4377 = vpow2.f32 %v2249_v27  ;;  %v2161_v15 = vsub.f32 %v5792_v6, %v2081_v43  ;;  %v2162_v21 = vsub.f32 %v5794_v8, %v2081_v43 }
 0x3da   :  { %v6098_v4 = vpop.eup %4365  ;;  %4379 = vpow2.f32 %v2251_v23  ;;  %2353 = vadd.xlane.f32.xlu1 %v2352_v14 }
 0x3db   :  { %v6100_v48 = vpop.eup %4367  ;;  %v2253_v35 = vmul.f32 1.442695, %v2161_v15  ;;  %v2255_v42 = vmul.f32 1.442695, %v2162_v21 }
 0x3dc   :  { %v2084_v30 = vpop.xlane.xlu1 %2083  ;;  %v2355_v49 = vadd.f32 %v6100_v48, %v6098_v4 }
 0x3dd   :  { %4381 = vpow2.f32 %v2253_v35  ;;  %v2163_v59 = vsub.f32 %v5804_v61, %v2084_v30  ;;  %v2164_v2 = vsub.f32 %v5806_v28, %v2084_v30 }
 0x3de   :  { %v6106_v6 = vpop.eup %4369  ;;  %4383 = vpow2.f32 %v2255_v42  ;;  %2356 = vadd.xlane.f32.xlu1 %v2355_v49 }
 0x3df   :  { %v6108_v8 = vpop.eup %4371  ;;  %v2257_v52 = vmul.f32 1.442695, %v2163_v59  ;;  %v2259_v54 = vmul.f32 1.442695, %v2164_v2 }
 0x3e0   :  { %v2087_v3 = vpop.xlane.xlu0 %2086  ;;  %v2358_v17 = vadd.f32 %v6108_v8, %v6106_v6 }
 0x3e1   :  { %4385 = vpow2.f32 %v2257_v52  ;;  %v2165_v44 = vsub.f32 %v5816_v13, %v2087_v3  ;;  %v2166_v38 = vsub.f32 %v5818_v25, %v2087_v3 }
 0x3e2   :  { %v6114_v61 = vpop.eup %4373  ;;  %4387 = vpow2.f32 %v2259_v54  ;;  %2359 = vadd.xlane.f32.xlu0 %v2358_v17 }
 0x3e3   :  { %v6116_v28 = vpop.eup %4375  ;;  %v2261_v27 = vmul.f32 1.442695, %v2165_v44  ;;  %v2263_v23 = vmul.f32 1.442695, %v2166_v38 }
 0x3e4   :  { %v2090_v43 = vpop.xlane.xlu1 %2089  ;;  %v2361_v14 = vadd.f32 %v6116_v28, %v6114_v61 }
 0x3e5   :  { %4389 = vpow2.f32 %v2261_v27  ;;  %v2167_v15 = vsub.f32 %v5828_v36, %v2090_v43  ;;  %v2168_v21 = vsub.f32 %v5830_v31, %v2090_v43  ;;  %v7188_v27 = vmov 0.0  }
 0x3e6   :  { %v6122_v13 = vpop.eup %4377  ;;  %4391 = vpow2.f32 %v2263_v23  ;;  %2362 = vadd.xlane.f32.xlu1 %v2361_v14  ;;  %v7190_v23 = vld [vmem:[#allocation44_spill] sm:$0xff] }
 0x3e7   :  { %v6124_v25 = vpop.eup %4379  ;;  %v2265_v35 = vmul.f32 1.442695, %v2167_v15  ;;  %v2267_v42 = vmul.f32 1.442695, %v2168_v21 }
 0x3e8   :  { %v778_v30 = vpop.permute.xlu1 %777  ;;  %v2093_v49 = vpop.xlane.xlu0 %2092  ;;  %v2364_v59 = vadd.f32 %v6124_v25, %v6122_v13 }
 0x3e9   :  { %4393 = vpow2.f32 %v2265_v35  ;;  %v1322_v2 = vadd.f32 %v5435_v55, %v778_v30  ;;  %v2169_v36 = vsub.f32 %v5840_v22, %v2093_v49  ;;  %v2170_v31 = vsub.f32 %v5842_v0, %v2093_v49  ;;  %v7189_v55 = vld [vmem:[#allocation48_spill] sm:$0xff] }
 0x3ea   :  { %v6131_v52 = vpop.eup %4381  ;;  %4395 = vpow2.f32 %v2267_v42  ;;  %2365 = vadd.xlane.f32.xlu0 %v2364_v59 }
 0x3eb   :  { %v6133_v54 = vpop.eup %4383  ;;  %v2269_v3 = vmul.f32 1.442695, %v2169_v36  ;;  %v2271_v17 = vmul.f32 1.442695, %v2170_v31  ;;  %2674 = vmatpush2.msra.mxu1 %v1322_v2  ;;  %v7193_v2 = vld [vmem:[#allocation8_spill] sm:$0xff]  ;;  %v7194_v31 = vld [vmem:[#allocation46_spill] sm:$0xff] }
 0x3ec   :  { %v2096_v44 = vpop.xlane.xlu0 %2095  ;;  %v2367_v38 = vadd.f32 %v6133_v54, %v6131_v52  ;;  %2675 = vmatprep.subr.mxu1 %v7188_v27 }
 0x3ed   :  { %4397 = vpow2.f32 %v2269_v3  ;;  %v2171_v22 = vsub.f32 %v7189_v55, %v2096_v44  ;;  %v2172_v0 = vsub.f32 %v7190_v23, %v2096_v44 }
 0x3ee   :  { %v6140_v43 = vpop.eup %4385  ;;  %4399 = vpow2.f32 %v2271_v17  ;;  %2368 = vadd.xlane.f32.xlu1 %v2367_v38 }
 0x3ef   :  { %v6142_v14 = vpop.eup %4387  ;;  %v2273_v15 = vmul.f32 1.442695, %v2171_v22  ;;  %v2275_v21 = vmul.f32 1.442695, %v2172_v0 }
 0x3f0   :  { %v2370_v35 = vadd.f32 %v6142_v14, %v6140_v43 }
 0x3f1   :  { %4401 = vpow2.f32 %v2273_v15 }
 0x3f2   :  { %v6146_v42 = vpop.eup %4389  ;;  %4403 = vpow2.f32 %v2275_v21  ;;  %2371 = vadd.xlane.f32.xlu0 %v2370_v35  ;;  %v7199_v21 = vld [vmem:[#allocation47_spill] sm:$0xff] }
 0x3f3   :  { %7191 = vst [vmem:[#allocation50_spill] sm:$0xff] %v6146_v42  ;;  %v6148_v30 = vpop.eup %4391 }
 0x3f4   :  { %7192 = vst [vmem:[#allocation12_spill] sm:$0xff] %v6148_v30  ;;  %v2102_v49 = vpop.xlane.xlu0 %2101  ;;  %v2373_v59 = vadd.f32 %v6148_v30, %v6146_v42 }
 0x3f5   :  { %v2175_v36 = vsub.f32 %v7193_v2, %v2102_v49  ;;  %v2176_v3 = vsub.f32 %v7194_v31, %v2102_v49 }
 0x3f6   :  { %v6154_v17 = vpop.eup %4393  ;;  %2374 = vadd.xlane.f32.xlu1 %v2373_v59 }
 0x3f7   :  { %7195 = vst [vmem:[#allocation13_spill] sm:$0xff] %v6154_v17  ;;  %v6156_v44 = vpop.eup %4395  ;;  %v2281_v38 = vmul.f32 1.442695, %v2175_v36  ;;  %v2283_v27 = vmul.f32 1.442695, %v2176_v3 }
 0x3f8   :  { %7196 = vst [vmem:[#allocation52_spill] sm:$0xff] %v6156_v44  ;;  %v2376_v55 = vadd.f32 %v6156_v44, %v6154_v17 }
 0x3f9   :  { %4405 = vpow2.f32 %v2281_v38 }
 0x3fa   :  { %v6160_v22 = vpop.eup %4397  ;;  %4407 = vpow2.f32 %v2283_v27  ;;  %2377 = vadd.xlane.f32.xlu0 %v2376_v55  ;;  %v7204_v27 = vld [vmem:[#allocation43_spill] sm:$0xff] }
 0x3fb   :  { %7197 = vst [vmem:[#allocation14_spill] sm:$0xff] %v6160_v22  ;;  %v6162_v23 = vpop.eup %4399 }
 0x3fc   :  { %7198 = vst [vmem:[#allocation15_spill] sm:$0xff] %v6162_v23  ;;  %v773_v0 = vpop.permute.xlu0 %772  ;;  %v2379_v15 = vadd.f32 %v6162_v23, %v6160_v22 }
 0x3fd   :  { %v1317_v35 = vadd.f32 %v7199_v21, %v773_v0  ;;  %v7205_v0 = vld [vmem:[#allocation49_spill] sm:$0xff] }
 0x3fe   :  { %v6167_v49 = vpop.eup %4401  ;;  %2380 = vadd.xlane.f32.xlu1 %v2379_v15 }
 0x3ff   :  { %7200 = vst [vmem:[#allocation16_spill] sm:$0xff] %v6167_v49  ;;  %v6169_v59 = vpop.eup %4403  ;;  %2676 = vmatpush2.msra.mxu1 %v1317_v35 }
 0x400   :  { %7201 = vst [vmem:[#allocation17_spill] sm:$0xff] %v6169_v59  ;;  %v2382_v2 = vadd.f32 %v6169_v59, %v6167_v49 }
 0x402   :  { %2383 = vadd.xlane.f32.xlu0 %v2382_v2  ;;  %v7206_v2 = vld [vmem:[#allocation9_spill] sm:$0xff] }
 0x406   :  { %v6173_v36 = vpop.eup %4405 }
 0x407   :  { %7202 = vst [vmem:[#allocation54_spill] sm:$0xff] %v6173_v36  ;;  %v6175_v31 = vpop.eup %4407 }
 0x408   :  { %7203 = vst [vmem:[#allocation18_spill] sm:$0xff] %v6175_v31  ;;  %v2388_v3 = vadd.f32 %v6175_v31, %v6173_v36  ;;  %v7207_v36 = vld [vmem:[#allocation51_spill] sm:$0xff]  ;;  %v7208_v31 = vld [vmem:[#allocation45_spill] sm:$0xff] }
 0x40a   :  { %2389 = vadd.xlane.f32.xlu0 %v2388_v3 }
 0x419   :  { %v2099_v38 = vpop.xlane.xlu1 %2098 }
 0x41a   :  { %v2173_v55 = vsub.f32 %v7204_v27, %v2099_v38  ;;  %v2174_v15 = vsub.f32 %v7205_v0, %v2099_v38  ;;  %v7209_v0 = vld [vmem:[#allocation53_spill] sm:$0xff] }
 0x41c   :  { %v2277_v21 = vmul.f32 1.442695, %v2173_v55  ;;  %v2279_v22 = vmul.f32 1.442695, %v2174_v15 }
 0x41d   :  { %v2105_v35 = vpop.xlane.xlu1 %2104 }
 0x41e   :  { %4409 = vpow2.f32 %v2277_v21  ;;  %v2177_v49 = vsub.f32 %v5899_v37, %v2105_v35  ;;  %v2178_v59 = vsub.f32 %v7206_v2, %v2105_v35  ;;  %v7210_v21 = vld [vmem:[#allocation42_spill] sm:$0xff]  ;;  %v7212_v2 = vld [vmem:[#allocation11_spill] sm:$0xff] }
 0x41f   :  { %4411 = vpow2.f32 %v2279_v22 }
 0x420   :  { %v2285_v23 = vmul.f32 1.442695, %v2177_v49  ;;  %v2287_v17 = vmul.f32 1.442695, %v2178_v59  ;;  %v7211_v59 = vld [vmem:[#allocation10_spill] sm:$0xff] }
 0x421   :  { %v2108_v44 = vpop.xlane.xlu1 %2107 }
 0x422   :  { %4413 = vpow2.f32 %v2285_v23  ;;  %v2179_v3 = vsub.f32 %v7207_v36, %v2108_v44  ;;  %v2180_v42 = vsub.f32 %v7208_v31, %v2108_v44 }
 0x423   :  { %4415 = vpow2.f32 %v2287_v17 }
 0x424   :  { %v2289_v27 = vmul.f32 1.442695, %v2179_v3  ;;  %v2291_v38 = vmul.f32 1.442695, %v2180_v42 }
 0x425   :  { %v2111_v55 = vpop.xlane.xlu1 %2110 }
 0x426   :  { %4417 = vpow2.f32 %v2289_v27  ;;  %v2181_v15 = vsub.f32 %v7209_v0, %v2111_v55  ;;  %v2182_v37 = vsub.f32 %v7210_v21, %v2111_v55 }
 0x427   :  { %4419 = vpow2.f32 %v2291_v38 }
 0x428   :  { %v2293_v35 = vmul.f32 1.442695, %v2181_v15  ;;  %v2295_v22 = vmul.f32 1.442695, %v2182_v37 }
 0x429   :  { %v2114_v49 = vpop.xlane.xlu1 %2113 }
 0x42a   :  { %4421 = vpow2.f32 %v2293_v35  ;;  %v2183_v23 = vsub.f32 %v7211_v59, %v2114_v49  ;;  %v2184_v36 = vsub.f32 %v7212_v2, %v2114_v49 }
 0x42b   :  { %v6189_v30 = vpop.eup %4409  ;;  %4423 = vpow2.f32 %v2295_v22 }
 0x42c   :  { %v6191_v17 = vpop.eup %4411  ;;  %v2297_v42 = vmul.f32 1.442695, %v2183_v23  ;;  %v2299_v44 = vmul.f32 1.442695, %v2184_v36 }
 0x42d   :  { %v2117_v31 = vpop.xlane.xlu1 %2116  ;;  %v2385_v3 = vadd.f32 %v6191_v17, %v6189_v30 }
 0x42e   :  { %4425 = vpow2.f32 %v2297_v42  ;;  %v2185_v27 = vsub.f32 %v5947_v47, %v2117_v31  ;;  %v2186_v38 = vsub.f32 %v5940_v34, %v2117_v31 }
 0x42f   :  { %v6197_v55 = vpop.eup %4413  ;;  %4427 = vpow2.f32 %v2299_v44  ;;  %2386 = vadd.xlane.f32.xlu1 %v2385_v3 }
 0x430   :  { %v6199_v0 = vpop.eup %4415  ;;  %v2301_v15 = vmul.f32 1.442695, %v2185_v27  ;;  %v2303_v21 = vmul.f32 1.442695, %v2186_v38 }
 0x431   :  { %v2120_v37 = vpop.xlane.xlu1 %2119  ;;  %v2391_v35 = vadd.f32 %v6199_v0, %v6197_v55 }
 0x432   :  { %4429 = vpow2.f32 %v2301_v15  ;;  %v2187_v22 = vsub.f32 %v5961_v12, %v2120_v37  ;;  %v2188_v49 = vsub.f32 %v5954_v29, %v2120_v37 }
 0x433   :  { %v6205_v47 = vpop.eup %4417  ;;  %4431 = vpow2.f32 %v2303_v21  ;;  %2392 = vadd.xlane.f32.xlu1 %v2391_v35 }
 0x434   :  { %v6207_v34 = vpop.eup %4419  ;;  %v2305_v59 = vmul.f32 1.442695, %v2187_v22  ;;  %v2307_v23 = vmul.f32 1.442695, %v2188_v49 }
 0x435   :  { %v2123_v2 = vpop.xlane.xlu1 %2122  ;;  %v2394_v36 = vadd.f32 %v6207_v34, %v6205_v47 }
 0x436   :  { %4433 = vpow2.f32 %v2305_v59  ;;  %v2189_v42 = vsub.f32 %v5975_v5, %v2123_v2  ;;  %v2190_v44 = vsub.f32 %v5968_v33, %v2123_v2 }
 0x437   :  { %v6213_v12 = vpop.eup %4421  ;;  %4435 = vpow2.f32 %v2307_v23  ;;  %2395 = vadd.xlane.f32.xlu0 %v2394_v36 }
 0x438   :  { %v6215_v29 = vpop.eup %4423  ;;  %v2309_v31 = vmul.f32 1.442695, %v2189_v42  ;;  %v2311_v3 = vmul.f32 1.442695, %v2190_v44 }
 0x439   :  { %v2126_v27 = vpop.xlane.xlu1 %2125  ;;  %v2397_v38 = vadd.f32 %v6215_v29, %v6213_v12 }
 0x43a   :  { %4437 = vpow2.f32 %v2309_v31  ;;  %v2191_v15 = vsub.f32 %v5989_v9, %v2126_v27  ;;  %v2192_v21 = vsub.f32 %v5982_v63, %v2126_v27 }
 0x43b   :  { %v6221_v5 = vpop.eup %4425  ;;  %4439 = vpow2.f32 %v2311_v3  ;;  %2398 = vadd.xlane.f32.xlu1 %v2397_v38 }
 0x43c   :  { %v6223_v33 = vpop.eup %4427  ;;  %v2313_v37 = vmul.f32 1.442695, %v2191_v15  ;;  %v2315_v35 = vmul.f32 1.442695, %v2192_v21 }
 0x43d   :  { %v2129_v22 = vpop.xlane.xlu1 %2128  ;;  %v2400_v49 = vadd.f32 %v6223_v33, %v6221_v5 }
 0x43e   :  { %4441 = vpow2.f32 %v2313_v37  ;;  %v2193_v59 = vsub.f32 %v6003_v41, %v2129_v22  ;;  %v2194_v23 = vsub.f32 %v5996_v7, %v2129_v22 }
 0x43f   :  { %v6229_v9 = vpop.eup %4429  ;;  %4443 = vpow2.f32 %v2315_v35  ;;  %v2327_v63 = vpop.xlane.xlu0 %2326  ;;  %2401 = vadd.xlane.f32.xlu0 %v2400_v49 }
 0x440   :  { %7213 = vst [vmem:[#allocation19_spill] sm:$0xff] %v6229_v9  ;;  %v6231_v2 = vpop.eup %4431  ;;  %v2317_v36 = vmul.f32 1.442695, %v2193_v59  ;;  %v2319_v42 = vmul.f32 1.442695, %v2194_v23  ;;  %4445 = vrcp.f32 %v2327_v63 }
 0x441   :  { %v2132_v44 = vpop.xlane.xlu1 %2131  ;;  %v2403_v31 = vadd.f32 %v6231_v2, %v6229_v9 }
 0x442   :  { %4447 = vpow2.f32 %v2317_v36  ;;  %v2195_v3 = vsub.f32 %v6018_v53, %v2132_v44  ;;  %v2196_v41 = vsub.f32 %v6012_v46, %v2132_v44 }
 0x443   :  { %v6237_v7 = vpop.eup %4433  ;;  %4449 = vpow2.f32 %v2319_v42  ;;  %v2330_v27 = vpop.xlane.xlu0 %2329  ;;  %2404 = vadd.xlane.f32.xlu1 %v2403_v31 }
 0x444   :  { %7214 = vst [vmem:[#allocation20_spill] sm:$0xff] %v6237_v7  ;;  %v6239_v38 = vpop.eup %4435  ;;  %v2321_v15 = vmul.f32 1.442695, %v2195_v3  ;;  %v2323_v21 = vmul.f32 1.442695, %v2196_v41  ;;  %4451 = vrcp.f32 %v2330_v27 }
 0x445   :  { %7215 = vst [vmem:[#allocation21_spill] sm:$0xff] %v6239_v38  ;;  %v2406_v37 = vadd.f32 %v6239_v38, %v6237_v7 }
 0x446   :  { %4453 = vpow2.f32 %v2321_v15 }
 0x447   :  { %v6243_v35 = vpop.eup %4437  ;;  %4455 = vpow2.f32 %v2323_v21  ;;  %v2333_v53 = vpop.xlane.xlu0 %2332  ;;  %2407 = vadd.xlane.f32.xlu0 %v2406_v37 }
 0x448   :  { %7216 = vst [vmem:[#allocation22_spill] sm:$0xff] %v6243_v35  ;;  %v6245_v46 = vpop.eup %4439  ;;  %4457 = vrcp.f32 %v2333_v53 }
 0x449   :  { %7217 = vst [vmem:[#allocation23_spill] sm:$0xff] %v6245_v46  ;;  %v2409_v22 = vadd.f32 %v6245_v46, %v6243_v35 }
 0x44b   :  { %v6249_v49 = vpop.eup %4441  ;;  %v2336_v59 = vpop.xlane.xlu0 %2335  ;;  %2410 = vadd.xlane.f32.xlu1 %v2409_v22 }
 0x44c   :  { %7218 = vst [vmem:[#allocation24_spill] sm:$0xff] %v6249_v49  ;;  %v6251_v23 = vpop.eup %4443  ;;  %4459 = vrcp.f32 %v2336_v59 }
 0x44d   :  { %7219 = vst [vmem:[#allocation25_spill] sm:$0xff] %v6251_v23  ;;  %v4446_v36 = vpop.eup %4445  ;;  %v2412_v42 = vadd.f32 %v6251_v23, %v6249_v49 }
 0x44e   :  { %v2453_v44 = vmul.f32 %v4446_v36, %v2327_v63 }
 0x44f   :  { %v6255_v31 = vpop.eup %4447  ;;  %v2339_v3 = vpop.xlane.xlu0 %2338  ;;  %2413 = vadd.xlane.f32.xlu0 %v2412_v42 }
 0x450   :  { %7220 = vst [vmem:[#allocation26_spill] sm:$0xff] %v6255_v31  ;;  %v6257_v41 = vpop.eup %4449  ;;  %v2485_v15 = vsub.f32 2.0, %v2453_v44  ;;  %4461 = vrcp.f32 %v2339_v3 }
 0x451   :  { %7221 = vst [vmem:[#allocation27_spill] sm:$0xff] %v6257_v41  ;;  %v4452_v21 = vpop.eup %4451  ;;  %v2415_v37 = vadd.f32 %v6257_v41, %v6255_v31 }
 0x452   :  { %v2454_v22 = vmul.f32 %v4452_v21, %v2330_v27  ;;  %v2517_v35 = vmul.f32 %v4446_v36, %v2485_v15 }
 0x453   :  { %v6261_v46 = vpop.eup %4453  ;;  %v2342_v7 = vpop.xlane.xlu0 %2341  ;;  %2416 = vadd.xlane.f32.xlu1 %v2415_v37 }
 0x454   :  { %v6263_v49 = vpop.eup %4455  ;;  %v2486_v63 = vsub.f32 2.0, %v2454_v22  ;;  %4463 = vrcp.f32 %v2342_v7  ;;  %v2549_v42 = vmul.f32 %v6010_v18, %v2517_v35  ;;  %v2550_v23 = vmul.f32 %v6016_v26, %v2517_v35 }
 0x455   :  { %v4458_v44 = vpop.eup %4457  ;;  %v2418_v38 = vadd.f32 %v6263_v49, %v6261_v46 }
 0x456   :  { %v2455_v9 = vmul.f32 %v4458_v44, %v2333_v53  ;;  %2677 = vmatprep.mubr.f32.mxu1 %v2550_v23  ;;  %v2518_v27 = vmul.f32 %v4452_v21, %v2486_v63 }
 0x457   :  { %2678 = vmatmul.mubr.f32.vlgmr.msra.gmra.mxu1 %v2549_v42  ;;  %v2345_v36 = vpop.xlane.xlu0 %2344  ;;  %2419 = vadd.xlane.f32.xlu0 %v2418_v38 }
 0x458   :  { %v2487_v15 = vsub.f32 2.0, %v2455_v9  ;;  %4465 = vrcp.f32 %v2345_v36  ;;  %v2552_v37 = vmul.f32 %v6028_v40, %v2518_v27  ;;  %v2551_v22 = vmul.f32 %v6024_v20, %v2518_v27 }
 0x459   :  { %v4460_v31 = vpop.eup %4459 }
 0x45a   :  { %v2456_v18 = vmul.f32 %v4460_v31, %v2336_v59  ;;  %2682 = vmatprep.mubr.f32.mxu1 %v2552_v37  ;;  %v2519_v26 = vmul.f32 %v4458_v44, %v2487_v15  ;;  %v2885_v44 = vld [vmem:[%s7038_s6 + $0x78] sm:$0xff] }
 0x45b   :  { %2683 = vmatmul.mubr.f32.gmra.mxu1 %v2551_v22  ;;  %v2348_v35 = vpop.xlane.xlu0 %2347 }
 0x45c   :  { %v2488_v41 = vsub.f32 2.0, %v2456_v18  ;;  %4467 = vrcp.f32 %v2348_v35  ;;  %v2554_v53 = vmul.f32 %v6036_v56, %v2519_v26  ;;  %v2553_v23 = vmul.f32 %v6034_v58, %v2519_v26 }
 0x45d   :  { %v4462_v21 = vpop.eup %4461 }
 0x45e   :  { %v2457_v38 = vmul.f32 %v4462_v21, %v2339_v3  ;;  %2687 = vmatprep.mubr.f32.mxu1 %v2554_v53  ;;  %v2520_v9 = vmul.f32 %v4460_v31, %v2488_v41 }
 0x45f   :  { %2688 = vmatmul.mubr.f32.gmra.mxu1 %v2553_v23  ;;  %v2351_v40 = vpop.xlane.xlu1 %2350 }
 0x460   :  { %v2489_v63 = vsub.f32 2.0, %v2457_v38  ;;  %4469 = vrcp.f32 %v2351_v40  ;;  %v2556_v20 = vmul.f32 %v6044_v50, %v2520_v9  ;;  %v2555_v59 = vmul.f32 %v6042_v16, %v2520_v9  ;;  %v2883_v16 = vld [vmem:[%s7038_s6 + $0x68] sm:$0xff] }
 0x461   :  { %v4464_v42 = vpop.eup %4463 }
 0x462   :  { %v2458_v56 = vmul.f32 %v4464_v42, %v2342_v7  ;;  %2692 = vmatprep.mubr.f32.mxu1 %v2556_v20  ;;  %v2521_v58 = vmul.f32 %v4462_v21, %v2489_v63  ;;  %v2881_v20 = vld [vmem:[%s7038_s6 + $0x58] sm:$0xff] }
 0x463   :  { %2693 = vmatmul.mubr.f32.gmra.mxu1 %v2555_v59  ;;  %v2354_v3 = vpop.xlane.xlu1 %2353 }
 0x464   :  { %v2490_v27 = vsub.f32 2.0, %v2458_v56  ;;  %4471 = vrcp.f32 %v2354_v3  ;;  %2963 = vperm.xlu1 %4324, %v2885_v44   ;;  %v2558_v31 = vmul.f32 %v6052_v62, %v2521_v58  ;;  %v2557_v41 = vmul.f32 %v6050_v10, %v2521_v58  ;;  %v2882_v10 = vld [vmem:[%s7038_s6 + $0x60] sm:$0xff] }
 0x465   :  { %v4466_v50 = vpop.eup %4465 }
 0x466   :  { %v2459_v15 = vmul.f32 %v4466_v50, %v2345_v36  ;;  %2697 = vmatprep.mubr.f32.mxu1 %v2558_v31  ;;  %v2522_v37 = vmul.f32 %v4464_v42, %v2490_v27  ;;  %v2884_v36 = vld [vmem:[%s7038_s6 + $0x70] sm:$0xff]  ;;  %v2879_v27 = vld [vmem:[%s7038_s6 + $0x48] sm:$0xff] }
 0x467   :  { %2698 = vmatmul.mubr.f32.gmra.mxu1 %v2557_v41  ;;  %v2357_v7 = vpop.xlane.xlu1 %2356 }
 0x468   :  { %v2491_v22 = vsub.f32 2.0, %v2459_v15  ;;  %4473 = vrcp.f32 %v2357_v7  ;;  %2953 = vperm.xlu1 %4324, %v2883_v16   ;;  %v2560_v18 = vmul.f32 %v6060_v24, %v2522_v37  ;;  %v2559_v26 = vmul.f32 %v6058_v51, %v2522_v37  ;;  %v2877_v37 = vld [vmem:[%s7038_s6 + $0x38] sm:$0xff] }
 0x469   :  { %v4468_v62 = vpop.eup %4467 }
 0x46a   :  { %v2460_v53 = vmul.f32 %v4468_v62, %v2348_v35  ;;  %2702 = vmatprep.mubr.f32.mxu1 %v2560_v18  ;;  %v2523_v23 = vmul.f32 %v4466_v50, %v2491_v22  ;;  %v2880_v35 = vld [vmem:[%s7038_s6 + $0x50] sm:$0xff] }
 0x46b   :  { %2703 = vmatmul.mubr.f32.gmra.mxu1 %v2559_v26  ;;  %v2360_v21 = vpop.xlane.xlu0 %2359 }
 0x46c   :  { %v2492_v38 = vsub.f32 2.0, %v2460_v53  ;;  %4475 = vrcp.f32 %v2360_v21  ;;  %2948 = vperm.xlu1 %4324, %v2882_v10   ;;  %v2562_v24 = vmul.f32 %v6068_v45, %v2523_v23  ;;  %v2561_v51 = vmul.f32 %v6066_v57, %v2523_v23  ;;  %v2875_v53 = vld [vmem:[%s7038_s6 + $0x28] sm:$0xff] }
 0x46d   :  { %v4470_v9 = vpop.eup %4469  ;;  %2958 = vperm.xlu0 %4323, %v2884_v36  }
 0x46e   :  { %v2461_v63 = vmul.f32 %v4470_v9, %v2351_v40  ;;  %2707 = vmatprep.mubr.f32.mxu1 %v2562_v24  ;;  %v2524_v59 = vmul.f32 %v4468_v62, %v2492_v38  ;;  %v2878_v40 = vld [vmem:[%s7038_s6 + $0x40] sm:$0xff] }
 0x46f   :  { %2708 = vmatmul.mubr.f32.gmra.mxu1 %v2561_v51  ;;  %v2363_v42 = vpop.xlane.xlu1 %2362 }
 0x470   :  { %v2493_v44 = vsub.f32 2.0, %v2461_v63  ;;  %4477 = vrcp.f32 %v2363_v42  ;;  %2938 = vperm.xlu1 %4324, %v2880_v35   ;;  %v2564_v57 = vmul.f32 %v6076_v60, %v2524_v59  ;;  %v2563_v45 = vmul.f32 %v6074_v32, %v2524_v59 }
 0x471   :  { %v4472_v56 = vpop.eup %4471  ;;  %2943 = vperm.xlu0 %4323, %v2881_v20  }
 0x472   :  { %v2462_v58 = vmul.f32 %v4472_v56, %v2354_v3  ;;  %2712 = vmatprep.mubr.f32.mxu1 %v2564_v57  ;;  %v2525_v31 = vmul.f32 %v4470_v9, %v2493_v44  ;;  %v2876_v3 = vld [vmem:[%s7038_s6 + $0x30] sm:$0xff]  ;;  %v2873_v9 = vld [vmem:[%s7038_s6 + $0x18] sm:$0xff]  ;;  %v2871_v57 = vld [vmem:[%s7038_s6 + $0x8] sm:$0xff] }
 0x473   :  { %2713 = vmatmul.mubr.f32.gmra.mxu1 %v2563_v45  ;;  %v2366_v41 = vpop.xlane.xlu0 %2365 }
 0x474   :  { %v2494_v50 = vsub.f32 2.0, %v2462_v58  ;;  %4479 = vrcp.f32 %v2366_v41  ;;  %2928 = vperm.xlu1 %4324, %v2878_v40   ;;  %v2566_v32 = vmul.f32 %v6084_v1, %v2525_v31  ;;  %v2565_v60 = vmul.f32 %v6082_v11, %v2525_v31 }
 0x475   :  { %v4474_v16 = vpop.eup %4473  ;;  %2933 = vperm.xlu0 %4323, %v2879_v27  }
 0x476   :  { %v2463_v15 = vmul.f32 %v4474_v16, %v2357_v7  ;;  %2717 = vmatprep.mubr.f32.mxu1 %v2566_v32  ;;  %v2526_v22 = vmul.f32 %v4472_v56, %v2494_v50  ;;  %v2874_v7 = vld [vmem:[%s7038_s6 + $0x20] sm:$0xff] }
 0x477   :  { %2718 = vmatmul.mubr.f32.gmra.mxu1 %v2565_v60  ;;  %v2369_v18 = vpop.xlane.xlu1 %2368 }
 0x478   :  { %v2495_v26 = vsub.f32 2.0, %v2463_v15  ;;  %4481 = vrcp.f32 %v2369_v18  ;;  %2918 = vperm.xlu1 %4324, %v2876_v3   ;;  %v2568_v11 = vmul.f32 %v6092_v19, %v2526_v22  ;;  %v2567_v1 = vmul.f32 %v6090_v39, %v2526_v22 }
 0x479   :  { %v4476_v62 = vpop.eup %4475  ;;  %2923 = vperm.xlu0 %4323, %v2877_v37  }
 0x47a   :  { %v2464_v10 = vmul.f32 %v4476_v62, %v2360_v21  ;;  %2722 = vmatprep.mubr.f32.mxu1 %v2568_v11  ;;  %v2527_v36 = vmul.f32 %v4474_v16, %v2495_v26  ;;  %v2872_v21 = vld [vmem:[%s7038_s6 + $0x10] sm:$0xff] }
 0x47b   :  { %v2372_v23 = vpop.xlane.xlu0 %2371  ;;  %2723 = vmatmul.mubr.f32.gmra.mxu1 %v2567_v1 }
 0x47c   :  { %v2496_v38 = vsub.f32 2.0, %v2464_v10  ;;  %4483 = vrcp.f32 %v2372_v23  ;;  %2908 = vperm.xlu1 %4324, %v2874_v7   ;;  %v2570_v39 = vmul.f32 %v6100_v48, %v2527_v36  ;;  %v2569_v19 = vmul.f32 %v6098_v4, %v2527_v36  ;;  %v7222_v36 = vld [vmem:[#allocation12_spill] sm:$0xff] }
 0x47d   :  { %v4478_v24 = vpop.eup %4477  ;;  %2913 = vperm.xlu0 %4323, %v2875_v53  }
 0x47e   :  { %v2465_v51 = vmul.f32 %v4478_v24, %v2363_v42  ;;  %2727 = vmatprep.mubr.f32.mxu1 %v2570_v39  ;;  %v2528_v35 = vmul.f32 %v4476_v62, %v2496_v38  ;;  %v2870_v42 = vld [vmem:[%s7038_s6] sm:$0xff] }
 0x47f   :  { %2728 = vmatmul.mubr.f32.gmra.mxu1 %v2569_v19  ;;  %v2375_v63 = vpop.xlane.xlu1 %2374 }
 0x480   :  { %v2497_v20 = vsub.f32 2.0, %v2465_v51  ;;  %4485 = vrcp.f32 %v2375_v63  ;;  %2898 = vperm.xlu1 %4324, %v2872_v21   ;;  %v2572_v4 = vmul.f32 %v6108_v8, %v2528_v35  ;;  %v2571_v48 = vmul.f32 %v6106_v6, %v2528_v35  ;;  %v7224_v21 = vld [vmem:[#allocation52_spill] sm:$0xff]  ;;  %v7225_v51 = vld [vmem:[#allocation13_spill] sm:$0xff] }
 0x481   :  { %v4480_v59 = vpop.eup %4479  ;;  %2903 = vperm.xlu0 %4323, %v2873_v9  }
 0x482   :  { %v2466_v44 = vmul.f32 %v4480_v59, %v2366_v41  ;;  %2732 = vmatprep.mubr.f32.mxu1 %v2572_v4  ;;  %v2529_v45 = vmul.f32 %v4478_v24, %v2497_v20  ;;  %v7226_v4 = vld [vmem:[#allocation15_spill] sm:$0xff] }
 0x483   :  { %v2378_v56 = vpop.xlane.xlu0 %2377  ;;  %2733 = vmatmul.mubr.f32.gmra.mxu1 %v2571_v48 }
 0x484   :  { %v2498_v40 = vsub.f32 2.0, %v2466_v44  ;;  %4487 = vrcp.f32 %v2378_v56  ;;  %2888 = vperm.xlu1 %4324, %v2870_v42   ;;  %v2574_v6 = vmul.f32 %v6116_v28, %v2529_v45  ;;  %v2573_v8 = vmul.f32 %v6114_v61, %v2529_v45 }
 0x485   :  { %v4482_v58 = vpop.eup %4481  ;;  %2893 = vperm.xlu0 %4323, %v2871_v57   ;;  %v7228_v57 = vld [vmem:[#allocation17_spill] sm:$0xff] }
 0x486   :  { %v2530_v27 = vmul.f32 %v4480_v59, %v2498_v40  ;;  %v2467_v31 = vmul.f32 %v4482_v58, %v2369_v18  ;;  %2737 = vmatprep.mubr.f32.mxu1 %v2574_v6  ;;  %v7227_v59 = vld [vmem:[#allocation14_spill] sm:$0xff] }
 0x487   :  { %2738 = vmatmul.mubr.f32.gmra.mxu1 %v2573_v8  ;;  %v2381_v41 = vpop.xlane.xlu1 %2380 }
 0x488   :  { %v2499_v50 = vsub.f32 2.0, %v2467_v31  ;;  %4489 = vrcp.f32 %v2381_v41  ;;  %v2576_v32 = vmul.f32 %v6124_v25, %v2530_v27  ;;  %v2575_v60 = vmul.f32 %v6122_v13, %v2530_v27 }
 0x489   :  { %v4484_v16 = vpop.eup %4483 }
 0x48a   :  { %v2468_v3 = vmul.f32 %v4484_v16, %v2372_v23  ;;  %2742 = vmatprep.mubr.f32.mxu1 %v2576_v32  ;;  %v2531_v15 = vmul.f32 %v4482_v58, %v2499_v50  ;;  %v7223_v23 = vld [vmem:[#allocation50_spill] sm:$0xff] }
 0x48b   :  { %v2384_v28 = vpop.xlane.xlu0 %2383  ;;  %2743 = vmatmul.mubr.f32.gmra.mxu1 %v2575_v60 }
 0x48c   :  { %v2500_v61 = vsub.f32 2.0, %v2468_v3  ;;  %4491 = vrcp.f32 %v2384_v28  ;;  %v2578_v37 = vmul.f32 %v6133_v54, %v2531_v15  ;;  %v2577_v22 = vmul.f32 %v6131_v52, %v2531_v15 }
 0x48d   :  { %v4486_v18 = vpop.eup %4485 }
 0x48e   :  { %v2532_v26 = vmul.f32 %v4484_v16, %v2500_v61  ;;  %v2469_v11 = vmul.f32 %v4486_v18, %v2375_v63  ;;  %2747 = vmatprep.mubr.f32.mxu1 %v2578_v37 }
 0x48f   :  { %2748 = vmatmul.mubr.f32.gmra.mxu1 %v2577_v22 }
 0x490   :  { %v2501_v25 = vsub.f32 2.0, %v2469_v11  ;;  %v2580_v13 = vmul.f32 %v6142_v14, %v2532_v26  ;;  %v2579_v1 = vmul.f32 %v6140_v43, %v2532_v26 }
 0x491   :  { %v4488_v62 = vpop.eup %4487 }
 0x492   :  { %v2533_v7 = vmul.f32 %v4486_v18, %v2501_v25  ;;  %v2470_v10 = vmul.f32 %v4488_v62, %v2378_v56  ;;  %2752 = vmatprep.mubr.f32.mxu1 %v2580_v13  ;;  %v7229_v56 = vld [vmem:[#allocation16_spill] sm:$0xff] }
 0x493   :  { %2753 = vmatmul.mubr.f32.gmra.mxu1 %v2579_v1  ;;  %v2390_v6 = vpop.xlane.xlu0 %2389 }
 0x494   :  { %v2502_v53 = vsub.f32 2.0, %v2470_v10  ;;  %v2582_v54 = vmul.f32 %v7222_v36, %v2533_v7  ;;  %v2581_v52 = vmul.f32 %v7223_v23, %v2533_v7  ;;  %4493 = vrcp.f32 %v2390_v6  ;;  %v7230_v7 = vld [vmem:[#allocation18_spill] sm:$0xff] }
 0x495   :  { %v4490_v38 = vpop.eup %4489  ;;  %v7231_v23 = vld [vmem:[#allocation54_spill] sm:$0xff] }
 0x496   :  { %v2534_v39 = vmul.f32 %v4488_v62, %v2502_v53  ;;  %v2471_v19 = vmul.f32 %v4490_v38, %v2381_v41  ;;  %2757 = vmatprep.mubr.f32.mxu1 %v2582_v54 }
 0x497   :  { %2758 = vmatmul.mubr.f32.gmra.mxu1 %v2581_v52 }
 0x498   :  { %v2503_v24 = vsub.f32 2.0, %v2471_v19  ;;  %v2584_v14 = vmul.f32 %v7224_v21, %v2534_v39  ;;  %v2583_v43 = vmul.f32 %v7225_v51, %v2534_v39 }
 0x499   :  { %v4492_v9 = vpop.eup %4491 }
 0x49a   :  { %v2535_v35 = vmul.f32 %v4490_v38, %v2503_v24  ;;  %v2472_v63 = vmul.f32 %v4492_v9, %v2384_v28  ;;  %2762 = vmatprep.mubr.f32.mxu1 %v2584_v14 }
 0x49b   :  { %2763 = vmatmul.mubr.f32.gmra.mxu1 %v2583_v43 }
 0x49c   :  { %v2504_v20 = vsub.f32 2.0, %v2472_v63  ;;  %v2586_v48 = vmul.f32 %v7226_v4, %v2535_v35  ;;  %v2585_v42 = vmul.f32 %v7227_v59, %v2535_v35 }
 0x49e   :  { %v2536_v44 = vmul.f32 %v4492_v9, %v2504_v20  ;;  %2767 = vmatprep.mubr.f32.mxu1 %v2586_v48 }
 0x49f   :  { %2768 = vmatmul.mubr.f32.gmra.mxu1 %v2585_v42 }
 0x4a0   :  { %v2588_v45 = vmul.f32 %v7228_v57, %v2536_v44  ;;  %v2587_v40 = vmul.f32 %v7229_v56, %v2536_v44 }
 0x4a1   :  { %v4494_v27 = vpop.eup %4493 }
 0x4a2   :  { %2772 = vmatprep.mubr.f32.mxu1 %v2588_v45  ;;  %v2474_v41 = vmul.f32 %v4494_v27, %v2390_v6 }
 0x4a3   :  { %2773 = vmatmul.mubr.f32.gmra.mxu1 %v2587_v40 }
 0x4a4   :  { %v2506_v60 = vsub.f32 2.0, %v2474_v41 }
 0x4a6   :  { %v2538_v61 = vmul.f32 %v4494_v27, %v2506_v60 }
 0x4a8   :  { %v2592_v10 = vmul.f32 %v7230_v7, %v2538_v61  ;;  %v2591_v52 = vmul.f32 %v7231_v23, %v2538_v61 }
 0x4b8   :  { %v2387_v8 = vpop.xlane.xlu1 %2386 }
 0x4b9   :  { %4495 = vrcp.f32 %v2387_v8 }
 0x4bc   :  { %v2393_v58 = vpop.xlane.xlu1 %2392 }
 0x4bd   :  { %4497 = vrcp.f32 %v2393_v58 }
 0x4c0   :  { %v2396_v31 = vpop.xlane.xlu0 %2395 }
 0x4c1   :  { %4499 = vrcp.f32 %v2396_v31 }
 0x4c4   :  { %v2399_v50 = vpop.xlane.xlu1 %2398 }
 0x4c5   :  { %4501 = vrcp.f32 %v2399_v50 }
 0x4c6   :  { %v4496_v32 = vpop.eup %4495 }
 0x4c7   :  { %v2473_v16 = vmul.f32 %v4496_v32, %v2387_v8 }
 0x4c8   :  { %v2402_v3 = vpop.xlane.xlu0 %2401 }
 0x4c9   :  { %v2505_v15 = vsub.f32 2.0, %v2473_v16  ;;  %4503 = vrcp.f32 %v2402_v3 }
 0x4ca   :  { %v4498_v28 = vpop.eup %4497 }
 0x4cb   :  { %v2537_v37 = vmul.f32 %v4496_v32, %v2505_v15  ;;  %v2475_v22 = vmul.f32 %v4498_v28, %v2393_v58  ;;  %v7233_v32 = vld [vmem:[#allocation21_spill] sm:$0xff]  ;;  %v7234_v15 = vld [vmem:[#allocation20_spill] sm:$0xff] }
 0x4cc   :  { %v2405_v18 = vpop.xlane.xlu1 %2404 }
 0x4cd   :  { %v2507_v26 = vsub.f32 2.0, %v2475_v22  ;;  %4505 = vrcp.f32 %v2405_v18  ;;  %v2590_v11 = vmul.f32 %v6191_v17, %v2537_v37  ;;  %v2589_v25 = vmul.f32 %v6189_v30, %v2537_v37  ;;  %v7235_v37 = vld [vmem:[#allocation23_spill] sm:$0xff] }
 0x4ce   :  { %v4500_v13 = vpop.eup %4499 }
 0x4cf   :  { %v2539_v1 = vmul.f32 %v4498_v28, %v2507_v26  ;;  %v2476_v62 = vmul.f32 %v4500_v13, %v2396_v31  ;;  %2777 = vmatprep.mubr.f32.mxu1 %v2590_v11  ;;  %v7232_v31 = vld [vmem:[#allocation19_spill] sm:$0xff]  ;;  %v7236_v26 = vld [vmem:[#allocation22_spill] sm:$0xff] }
 0x4d0   :  { %v2408_v53 = vpop.xlane.xlu0 %2407  ;;  %2778 = vmatmul.mubr.f32.gmra.mxu1 %v2589_v25 }
 0x4d1   :  { %v2508_v36 = vsub.f32 2.0, %v2476_v62  ;;  %4507 = vrcp.f32 %v2408_v53  ;;  %2782 = vmatprep.mubr.f32.mxu1 %v2592_v10  ;;  %v2594_v17 = vmul.f32 %v6199_v0, %v2539_v1  ;;  %v2593_v21 = vmul.f32 %v6197_v55, %v2539_v1  ;;  %v7237_v1 = vld [vmem:[#allocation25_spill] sm:$0xff]  ;;  %v7238_v10 = vld [vmem:[#allocation24_spill] sm:$0xff] }
 0x4d2   :  { %v4502_v54 = vpop.eup %4501 }
 0x4d3   :  { %v2540_v38 = vmul.f32 %v4500_v13, %v2508_v36  ;;  %v2477_v39 = vmul.f32 %v4502_v54, %v2399_v50 }
 0x4d4   :  { %2783 = vmatmul.mubr.f32.gmra.mxu1 %v2591_v52  ;;  %v2411_v30 = vpop.xlane.xlu1 %2410  ;;  %v7240_v52 = vld [vmem:[#allocation26_spill] sm:$0xff] }
 0x4d5   :  { %v2509_v19 = vsub.f32 2.0, %v2477_v39  ;;  %4509 = vrcp.f32 %v2411_v30  ;;  %2787 = vmatprep.mubr.f32.mxu1 %v2594_v17  ;;  %v2596_v43 = vmul.f32 %v6207_v34, %v2540_v38  ;;  %v2595_v0 = vmul.f32 %v6205_v47, %v2540_v38 }
 0x4d6   :  { %v4504_v24 = vpop.eup %4503 }
 0x4d7   :  { %v2541_v14 = vmul.f32 %v4502_v54, %v2509_v19  ;;  %v2478_v51 = vmul.f32 %v4504_v24, %v2402_v3  ;;  %v7239_v54 = vld [vmem:[#allocation27_spill] sm:$0xff] }
 0x4d8   :  { %v2414_v9 = vpop.xlane.xlu0 %2413  ;;  %2788 = vmatmul.mubr.f32.gmra.mxu1 %v2593_v21 }
 0x4d9   :  { %v2510_v35 = vsub.f32 2.0, %v2478_v51  ;;  %4511 = vrcp.f32 %v2414_v9  ;;  %2792 = vmatprep.mubr.f32.mxu1 %v2596_v43  ;;  %v2598_v48 = vmul.f32 %v6215_v29, %v2541_v14  ;;  %v2597_v34 = vmul.f32 %v6213_v12, %v2541_v14 }
 0x4da   :  { %v4506_v63 = vpop.eup %4505 }
 0x4db   :  { %v2542_v20 = vmul.f32 %v4504_v24, %v2510_v35  ;;  %v2479_v4 = vmul.f32 %v4506_v63, %v2405_v18 }
 0x4dc   :  { %2793 = vmatmul.mubr.f32.gmra.mxu1 %v2595_v0  ;;  %v2417_v59 = vpop.xlane.xlu1 %2416 }
 0x4dd   :  { %v2511_v42 = vsub.f32 2.0, %v2479_v4  ;;  %4513 = vrcp.f32 %v2417_v59  ;;  %2797 = vmatprep.mubr.f32.mxu1 %v2598_v48  ;;  %v2600_v45 = vmul.f32 %v6223_v33, %v2542_v20  ;;  %v2599_v29 = vmul.f32 %v6221_v5, %v2542_v20 }
 0x4de   :  { %v4508_v55 = vpop.eup %4507 }
 0x4df   :  { %v2543_v44 = vmul.f32 %v4506_v63, %v2511_v42  ;;  %v2480_v57 = vmul.f32 %v4508_v55, %v2408_v53 }
 0x4e0   :  { %v2420_v56 = vpop.xlane.xlu0 %2419  ;;  %2798 = vmatmul.mubr.f32.gmra.mxu1 %v2597_v34 }
 0x4e1   :  { %v2512_v40 = vsub.f32 2.0, %v2480_v57  ;;  %4515 = vrcp.f32 %v2420_v56  ;;  %2802 = vmatprep.mubr.f32.mxu1 %v2600_v45  ;;  %v2602_v58 = vmul.f32 %v6231_v2, %v2543_v44  ;;  %v2601_v41 = vmul.f32 %v7232_v31, %v2543_v44 }
 0x4e2   :  { %v4510_v47 = vpop.eup %4509 }
 0x4e3   :  { %v2544_v6 = vmul.f32 %v4508_v55, %v2512_v40  ;;  %v2481_v8 = vmul.f32 %v4510_v47, %v2411_v30 }
 0x4e4   :  { %2803 = vmatmul.mubr.f32.gmra.mxu1 %v2599_v29 }
 0x4e5   :  { %v2513_v27 = vsub.f32 2.0, %v2481_v8  ;;  %2807 = vmatprep.mubr.f32.mxu1 %v2602_v58  ;;  %v2604_v60 = vmul.f32 %v7233_v32, %v2544_v6  ;;  %v2603_v5 = vmul.f32 %v7234_v15, %v2544_v6 }
 0x4e6   :  { %v4512_v12 = vpop.eup %4511 }
 0x4e7   :  { %v2545_v50 = vmul.f32 %v4510_v47, %v2513_v27  ;;  %v2482_v33 = vmul.f32 %v4512_v12, %v2414_v9 }
 0x4e8   :  { %2808 = vmatmul.mubr.f32.gmra.mxu1 %v2601_v41 }
 0x4e9   :  { %v2514_v16 = vsub.f32 2.0, %v2482_v33  ;;  %2812 = vmatprep.mubr.f32.mxu1 %v2604_v60  ;;  %v2606_v2 = vmul.f32 %v7235_v37, %v2545_v50  ;;  %v2605_v11 = vmul.f32 %v7236_v26, %v2545_v50  ;;  %v2839_v33 = vld [vmem:[%s7037_s5 + $0x8] sm:$0xff] }
 0x4ea   :  { %v4514_v3 = vpop.eup %4513 }
 0x4eb   :  { %v2546_v28 = vmul.f32 %v4512_v12, %v2514_v16  ;;  %v2483_v61 = vmul.f32 %v4514_v3, %v2417_v59 }
 0x4ec   :  { %2813 = vmatmul.mubr.f32.gmra.mxu1 %v2603_v5 }
 0x4ed   :  { %v2515_v22 = vsub.f32 2.0, %v2483_v61  ;;  %2817 = vmatprep.mubr.f32.mxu1 %v2606_v2  ;;  %v2608_v62 = vmul.f32 %v7237_v1, %v2546_v28  ;;  %v2607_v53 = vmul.f32 %v7238_v10, %v2546_v28 }
 0x4ee   :  { %v4516_v18 = vpop.eup %4515 }
 0x4ef   :  { %v2547_v25 = vmul.f32 %v4514_v3, %v2515_v22  ;;  %v2484_v13 = vmul.f32 %v4516_v18, %v2420_v56 }
 0x4f0   :  { %2818 = vmatmul.mubr.f32.gmra.mxu1 %v2605_v11 }
 0x4f1   :  { %v2516_v7 = vsub.f32 2.0, %v2484_v13  ;;  %2822 = vmatprep.mubr.f32.mxu1 %v2608_v62  ;;  %v2610_v23 = vmul.f32 %v7239_v54, %v2547_v25  ;;  %v2609_v38 = vmul.f32 %v7240_v52, %v2547_v25 }
 0x4f3   :  { %v2548_v36 = vmul.f32 %v4516_v18, %v2516_v7 }
 0x4f4   :  { %2823 = vmatmul.mubr.f32.gmra.mxu1 %v2607_v53 }
 0x4f5   :  { %2827 = vmatprep.mubr.f32.mxu1 %v2610_v23  ;;  %v2612_v39 = vmul.f32 %v6263_v49, %v2548_v36  ;;  %v2611_v17 = vmul.f32 %v6261_v46, %v2548_v36 }
 0x4f8   :  { %2828 = vmatmul.mubr.f32.gmra.mxu1 %v2609_v38 }
 0x4f9   :  { %2832 = vmatprep.mubr.f32.mxu1 %v2612_v39 }
 0x4fc   :  { %2833 = vmatmul.mubr.f32.gmra.mxu1 %v2611_v17 }
 0x4fd   :  { %3030 = vmatprep.mubr.f32.mxu1 %v2839_v33 }
 0x517   :  { %v6379_v30 = vpop.f32.mrf.mxu1 }
 0x519   :  { %v2681_v19 = vpop.f32.mrf.mxu1 }
 0x51b   :  { %v6381_v24 = vpop.f32.mrf.mxu1 }
 0x51d   :  { %v2686_v21 = vpop.f32.mrf.mxu1 }
 0x51e   :  { %v2838_v21 = vld [vmem:[%s7037_s5] sm:$0xff] }
 0x51f   :  { %v6383_v14 = vpop.f32.mrf.mxu1 }
 0x521   :  { %v2691_v51 = vpop.f32.mrf.mxu1 }
 0x522   :  { %v2841_v51 = vld [vmem:[%s7037_s5 + $0x18] sm:$0xff] }
 0x523   :  { %v6385_v43 = vpop.f32.mrf.mxu1 }
 0x525   :  { %v2696_v9 = vpop.f32.mrf.mxu1 }
 0x526   :  { %v2844_v9 = vld [vmem:[%s7037_s5 + $0x30] sm:$0xff] }
 0x527   :  { %v6387_v35 = vpop.f32.mrf.mxu1 }
 0x529   :  { %v2701_v49 = vpop.f32.mrf.mxu1 }
 0x52a   :  { %v2846_v49 = vld [vmem:[%s7037_s5 + $0x40] sm:$0xff] }
 0x52b   :  { %v6389_v63 = vpop.f32.mrf.mxu1 }
 0x52d   :  { %v2706_v0 = vpop.f32.mrf.mxu1 }
 0x52e   :  { %v2848_v0 = vld [vmem:[%s7037_s5 + $0x50] sm:$0xff] }
 0x52f   :  { %v6391_v46 = vpop.f32.mrf.mxu1 }
 0x531   :  { %v2711_v20 = vpop.f32.mrf.mxu1 }
 0x532   :  { %v2850_v20 = vld [vmem:[%s7037_s5 + $0x60] sm:$0xff] }
 0x533   :  { %v6393_v4 = vpop.f32.mrf.mxu1 }
 0x535   :  { %v2716_v48 = vpop.f32.mrf.mxu1 }
 0x536   :  { %v2852_v48 = vld [vmem:[%s7037_s5 + $0x70] sm:$0xff] }
 0x537   :  { %v6395_v59 = vpop.f32.mrf.mxu1 }
 0x539   :  { %v2721_v42 = vpop.f32.mrf.mxu1 }
 0x53a   :  { %v2854_v42 = vld [vmem:[%s7037_s5 + $0x80] sm:$0xff] }
 0x53b   :  { %v2724_v55 = vpop.f32.mrf.mxu1 }
 0x53d   :  { %v2726_v34 = vpop.f32.mrf.mxu1 }
 0x53e   :  { %v2856_v34 = vld [vmem:[%s7037_s5 + $0x90] sm:$0xff] }
 0x53f   :  { %v2729_v44 = vpop.f32.mrf.mxu1 }
 0x541   :  { %v2731_v57 = vpop.f32.mrf.mxu1 }
 0x542   :  { %v2858_v57 = vld [vmem:[%s7037_s5 + $0xa0] sm:$0xff] }
 0x543   :  { %v2734_v45 = vpop.f32.mrf.mxu1 }
 0x545   :  { %v2736_v56 = vpop.f32.mrf.mxu1 }
 0x546   :  { %v2860_v56 = vld [vmem:[%s7037_s5 + $0xb0] sm:$0xff] }
 0x547   :  { %v2739_v40 = vpop.f32.mrf.mxu1 }
 0x549   :  { %v2741_v47 = vpop.f32.mrf.mxu1 }
 0x54a   :  { %v2862_v47 = vld [vmem:[%s7037_s5 + $0xc0] sm:$0xff] }
 0x54b   :  { %v2744_v29 = vpop.f32.mrf.mxu1 }
 0x54d   :  { %v2746_v6 = vpop.f32.mrf.mxu1 }
 0x54e   :  { %v2864_v6 = vld [vmem:[%s7037_s5 + $0xd0] sm:$0xff] }
 0x54f   :  { %v2749_v8 = vpop.f32.mrf.mxu1 }
 0x551   :  { %v2751_v58 = vpop.f32.mrf.mxu1 }
 0x552   :  { %v2866_v58 = vld [vmem:[%s7037_s5 + $0xe0] sm:$0xff] }
 0x553   :  { %v2754_v27 = vpop.f32.mrf.mxu1 }
 0x555   :  { %v2756_v12 = vpop.f32.mrf.mxu1 }
 0x556   :  { %v2868_v12 = vld [vmem:[%s7037_s5 + $0xf0] sm:$0xff] }
 0x557   :  { %v6397_v31 = vpop.f32.mrf.mxu1 }
 0x559   :  { %v2761_v41 = vpop.f32.mrf.mxu1 }
 0x55b   :  { %v2764_v50 = vpop.f32.mrf.mxu1 }
 0x55d   :  { %v2766_v32 = vpop.f32.mrf.mxu1 }
 0x55f   :  { %v2769_v60 = vpop.f32.mrf.mxu1 }
 0x561   :  { %v2771_v16 = vpop.f32.mrf.mxu1 }
 0x563   :  { %v2774_v3 = vpop.f32.mrf.mxu1 }
 0x565   :  { %v2776_v15 = vpop.f32.mrf.mxu1 }
 0x590   :  { %v2779_v5 = vpop.f32.mrf.mxu1 }
 0x592   :  { %v2781_v28 = vpop.f32.mrf.mxu1 }
 0x594   :  { %v2784_v61 = vpop.f32.mrf.mxu1 }
 0x596   :  { %v2786_v37 = vpop.f32.mrf.mxu1 }
 0x598   :  { %v2789_v2 = vpop.f32.mrf.mxu1 }
 0x59a   :  { %v2791_v22 = vpop.f32.mrf.mxu1 }
 0x59c   :  { %v2794_v18 = vpop.f32.mrf.mxu1 }
 0x59e   :  { %v2796_v26 = vpop.f32.mrf.mxu1 }
 0x5a0   :  { %v2799_v11 = vpop.f32.mrf.mxu1 }
 0x5a2   :  { %v2801_v25 = vpop.f32.mrf.mxu1 }
 0x5a4   :  { %v2804_v13 = vpop.f32.mrf.mxu1 }
 0x5a6   :  { %v2806_v1 = vpop.f32.mrf.mxu1 }
 0x5a8   :  { %v2809_v62 = vpop.f32.mrf.mxu1 }
 0x5aa   :  { %v2811_v7 = vpop.f32.mrf.mxu1 }
 0x5ac   :  { %v2814_v10 = vpop.f32.mrf.mxu1 }
 0x5ae   :  { %v2816_v53 = vpop.f32.mrf.mxu1 }
 0x5b0   :  { %v2819_v36 = vpop.f32.mrf.mxu1 }
 0x5b2   :  { %v2821_v54 = vpop.f32.mrf.mxu1 }
 0x5b4   :  { %v2824_v23 = vpop.f32.mrf.mxu1 }
 0x5b6   :  { %v2826_v52 = vpop.f32.mrf.mxu1 }
 0x5b8   :  { %v2829_v38 = vpop.f32.mrf.mxu1 }
 0x5ba   :  { %v2831_v39 = vpop.f32.mrf.mxu1 }
 0x5bc   :  { %v2834_v17 = vpop.f32.mrf.mxu1 }
 0x5bd   :  { %4059 = vmatprep.subr.mxu1 %v2834_v17 }
 0x5be   :  { %v2836_v19 = vpop.f32.mrf.mxu1  ;;  %4060 = vmatpush3.msra.mxu1 %v2754_v27  ;;  %v2869_v27 = vld [vmem:[%s7037_s5 + $0xf8] sm:$0xff] }
 0x5bf   :  { %4061 = vmatprep.subr.mxu1 %v2829_v38  ;;  %v2964_v38 = vpop.permute.xlu1 %2963 }
 0x5c0   :  { %4062 = vmatpush3.msra.mxu1 %v2749_v8  ;;  %v2867_v8 = vld [vmem:[%s7037_s5 + $0xe8] sm:$0xff] }
 0x5c1   :  { %4063 = vmatprep.subr.mxu1 %v2824_v23 }
 0x5c2   :  { %4064 = vmatpush3.msra.mxu1 %v2744_v29  ;;  %v2865_v29 = vld [vmem:[%s7037_s5 + $0xd8] sm:$0xff] }
 0x5c3   :  { %4065 = vmatprep.subr.mxu1 %v2819_v36 }
 0x5c4   :  { %4066 = vmatpush3.msra.mxu1 %v2739_v40  ;;  %v2863_v40 = vld [vmem:[%s7037_s5 + $0xc8] sm:$0xff] }
 0x5c5   :  { %4067 = vmatprep.subr.mxu1 %v2814_v10 }
 0x5c6   :  { %4068 = vmatpush3.msra.mxu1 %v2734_v45  ;;  %v2861_v45 = vld [vmem:[%s7037_s5 + $0xb8] sm:$0xff] }
 0x5c7   :  { %4069 = vmatprep.subr.mxu1 %v2809_v62 }
 0x5c8   :  { %4070 = vmatpush3.msra.mxu1 %v2729_v44  ;;  %v2859_v44 = vld [vmem:[%s7037_s5 + $0xa8] sm:$0xff] }
 0x5c9   :  { %4071 = vmatprep.subr.mxu1 %v2804_v13 }
 0x5ca   :  { %4072 = vmatpush3.msra.mxu1 %v2724_v55  ;;  %v2857_v55 = vld [vmem:[%s7037_s5 + $0x98] sm:$0xff] }
 0x5cb   :  { %4073 = vmatprep.subr.mxu1 %v2799_v11 }
 0x5cc   :  { %4074 = vmatpush3.msra.mxu1 %v6395_v59  ;;  %v2855_v59 = vld [vmem:[%s7037_s5 + $0x88] sm:$0xff] }
 0x5cd   :  { %4075 = vmatprep.subr.mxu1 %v2794_v18 }
 0x5ce   :  { %4076 = vmatpush3.msra.mxu1 %v6393_v4  ;;  %v2853_v4 = vld [vmem:[%s7037_s5 + $0x78] sm:$0xff] }
 0x5cf   :  { %4077 = vmatprep.subr.mxu1 %v2789_v2 }
 0x5d0   :  { %4078 = vmatpush3.msra.mxu1 %v6391_v46  ;;  %v2851_v46 = vld [vmem:[%s7037_s5 + $0x68] sm:$0xff] }
 0x5d1   :  { %4079 = vmatprep.subr.mxu1 %v2784_v61 }
 0x5d2   :  { %4080 = vmatpush3.msra.mxu1 %v6389_v63  ;;  %v2849_v63 = vld [vmem:[%s7037_s5 + $0x58] sm:$0xff] }
 0x5d3   :  { %4081 = vmatprep.subr.mxu1 %v2779_v5 }
 0x5d4   :  { %4082 = vmatpush3.msra.mxu1 %v6387_v35  ;;  %v2847_v35 = vld [vmem:[%s7037_s5 + $0x48] sm:$0xff] }
 0x5d5   :  { %4083 = vmatprep.subr.mxu1 %v2774_v3 }
 0x5d6   :  { %4084 = vmatpush3.msra.mxu1 %v6385_v43  ;;  %v2842_v43 = vld [vmem:[%s7037_s5 + $0x20] sm:$0xff] }
 0x5d7   :  { %4085 = vmatprep.subr.mxu1 %v2769_v60 }
 0x5d8   :  { %4086 = vmatpush3.msra.mxu1 %v6383_v14  ;;  %v2840_v14 = vld [vmem:[%s7037_s5 + $0x10] sm:$0xff] }
 0x5d9   :  { %4087 = vmatprep.subr.mxu1 %v2764_v50 }
 0x5da   :  { %4088 = vmatpush3.msra.mxu1 %v6381_v24  ;;  %v2843_v24 = vld [vmem:[%s7037_s5 + $0x28] sm:$0xff] }
 0x5db   :  { %4089 = vmatprep.subr.mxu1 %v6397_v31  ;;  %v6508_v31 = vld [vmem:[%s7039_s7] sm:$0xff] }
 0x5dc   :  { %4090 = vmatpush3.msra.mxu1 %v6379_v30  ;;  %v2845_v30 = vld [vmem:[%s7037_s5 + $0x38] sm:$0xff] }
 0x5dd   :  { %3031 = vmatmul.mubr.f32.vlgmr.msra.gmra.mxu1 %v2838_v21  ;;  %v2954_v21 = vpop.permute.xlu1 %2953 }
 0x5de   :  { %3035 = vmatprep.mubr.f32.mxu1 %v2841_v51 }
 0x5e1   :  { %3036 = vmatmul.mubr.f32.gmra.mxu1 %v2840_v14 }
 0x5e2   :  { %3040 = vmatprep.mubr.f32.mxu1 %v2843_v24  ;;  %v2959_v24 = vpop.permute.xlu0 %2958 }
 0x5e5   :  { %3041 = vmatmul.mubr.f32.gmra.mxu1 %v2842_v43 }
 0x5e6   :  { %3045 = vmatprep.mubr.f32.mxu1 %v2845_v30  ;;  %v2949_v30 = vpop.permute.xlu1 %2948 }
 0x5e9   :  { %3046 = vmatmul.mubr.f32.gmra.mxu1 %v2844_v9 }
 0x5ea   :  { %3050 = vmatprep.mubr.f32.mxu1 %v2847_v35 }
 0x5ed   :  { %3051 = vmatmul.mubr.f32.gmra.mxu1 %v2846_v49  ;;  %v2944_v49 = vpop.permute.xlu0 %2943 }
 0x5ee   :  { %3055 = vmatprep.mubr.f32.mxu1 %v2849_v63 }
 0x5f1   :  { %3056 = vmatmul.mubr.f32.gmra.mxu1 %v2848_v0 }
 0x5f2   :  { %3060 = vmatprep.mubr.f32.mxu1 %v2851_v46 }
 0x5f5   :  { %3061 = vmatmul.mubr.f32.gmra.mxu1 %v2850_v20  ;;  %v2939_v20 = vpop.permute.xlu1 %2938 }
 0x5f6   :  { %3065 = vmatprep.mubr.f32.mxu1 %v2853_v4 }
 0x5f9   :  { %3066 = vmatmul.mubr.f32.gmra.mxu1 %v2852_v48 }
 0x5fa   :  { %3070 = vmatprep.mubr.f32.mxu1 %v2855_v59 }
 0x5fd   :  { %3071 = vmatmul.mubr.f32.gmra.mxu1 %v2854_v42 }
 0x5fe   :  { %3075 = vmatprep.mubr.f32.mxu1 %v2857_v55  ;;  %v2934_v55 = vpop.permute.xlu0 %2933 }
 0x601   :  { %3076 = vmatmul.mubr.f32.gmra.mxu1 %v2856_v34 }
 0x602   :  { %3080 = vmatprep.mubr.f32.mxu1 %v2859_v44 }
 0x605   :  { %3081 = vmatmul.mubr.f32.gmra.mxu1 %v2858_v57  ;;  %v2929_v57 = vpop.permute.xlu1 %2928 }
 0x606   :  { %3085 = vmatprep.mubr.f32.mxu1 %v2861_v45 }
 0x609   :  { %3086 = vmatmul.mubr.f32.gmra.mxu1 %v2860_v56 }
 0x60a   :  { %3090 = vmatprep.mubr.f32.mxu1 %v2863_v40 }
 0x60d   :  { %3091 = vmatmul.mubr.f32.gmra.mxu1 %v2862_v47 }
 0x60e   :  { %3095 = vmatprep.mubr.f32.mxu1 %v2865_v29  ;;  %v2924_v29 = vpop.permute.xlu0 %2923 }
 0x611   :  { %3096 = vmatmul.mubr.f32.gmra.mxu1 %v2864_v6 }
 0x612   :  { %3100 = vmatprep.mubr.f32.mxu1 %v2867_v8 }
 0x615   :  { %3101 = vmatmul.mubr.f32.gmra.mxu1 %v2866_v58  ;;  %v2919_v58 = vpop.permute.xlu1 %2918 }
 0x616   :  { %3105 = vmatprep.mubr.f32.mxu1 %v2869_v27 }
 0x619   :  { %3106 = vmatmul.mubr.f32.gmra.mxu1 %v2868_v12 }
 0x61a   :  { %4235 = vmatprep.mubr.f32.mxu1 %v6508_v31 }
 0x69d   :  { %v4091_v41 = vpop.f32.mrf.mxu1 }
 0x69f   :  { %v4092_v50 = vpop.f32.mrf.mxu1 }
 0x6a0   :  { %v6511_v33 = vadd.f32 %v4092_v50, %v4091_v41 }
 0x6a1   :  { %v4094_v32 = vpop.f32.mrf.mxu1 }
 0x6a3   :  { %v4095_v60 = vpop.f32.mrf.mxu1 }
 0x6a4   :  { %v6513_v16 = vadd.f32 %v4095_v60, %v4094_v32  ;;  %v2914_v32 = vpop.permute.xlu0 %2913 }
 0x6a5   :  { %v4097_v3 = vpop.f32.mrf.mxu1 }
 0x6a7   :  { %v4098_v15 = vpop.f32.mrf.mxu1 }
 0x6a8   :  { %v6515_v5 = vadd.f32 %v4098_v15, %v4097_v3  ;;  %v2909_v15 = vpop.permute.xlu1 %2908 }
 0x6a9   :  { %v4100_v28 = vpop.f32.mrf.mxu1 }
 0x6ab   :  { %v4101_v61 = vpop.f32.mrf.mxu1 }
 0x6ac   :  { %v6517_v37 = vadd.f32 %v4101_v61, %v4100_v28 }
 0x6ad   :  { %v4103_v2 = vpop.f32.mrf.mxu1 }
 0x6af   :  { %v4104_v22 = vpop.f32.mrf.mxu1 }
 0x6b0   :  { %v6519_v18 = vadd.f32 %v4104_v22, %v4103_v2  ;;  %v2904_v2 = vpop.permute.xlu0 %2903 }
 0x6b1   :  { %v6521_v26 = vpop.f32.mrf.mxu1 }
 0x6b2   :  { %v6570_v22 = vadd.f32 %v6519_v18, %v2909_v15 }
 0x6b3   :  { %v6523_v11 = vpop.f32.mrf.mxu1 }
 0x6b4   :  { %v4108_v60 = vadd.f32 %v6523_v11, %v6521_v26  ;;  %v2899_v26 = vpop.permute.xlu1 %2898  ;;  %v6575_v11 = vadd.f32 %v6517_v37, %v2904_v2 }
 0x6b5   :  { %v4109_v25 = vpop.f32.mrf.mxu1 }
 0x6b6   :  { %v6565_v61 = vadd.f32 %v4108_v60, %v2914_v32 }
 0x6b7   :  { %v4110_v13 = vpop.f32.mrf.mxu1 }
 0x6b8   :  { %v4111_v41 = vadd.f32 %v4110_v13, %v4109_v25  ;;  %v6580_v25 = vadd.f32 %v6515_v5, %v2899_v26  ;;  %v2894_v13 = vpop.permute.xlu0 %2893  ;;  %v6597_v5 = vld [vmem:[%s7039_s7 + $0x8] sm:$0xff] }
 0x6b9   :  { %v4112_v1 = vpop.f32.mrf.mxu1  ;;  %v6585_v18 = vadd.f32 %v6513_v16, %v2894_v13  ;;  %v6603_v16 = vld [vmem:[%s7039_s7 + $0x10] sm:$0xff] }
 0x6ba   :  { %v6561_v28 = vadd.f32 %v4111_v41, %v2919_v58 }
 0x6bb   :  { %v4113_v62 = vpop.f32.mrf.mxu1 }
 0x6bc   :  { %v4114_v27 = vadd.f32 %v4113_v62, %v4112_v1  ;;  %v2889_v1 = vpop.permute.xlu1 %2888  ;;  %v6616_v62 = vld [vmem:[%s7039_s7 + $0x20] sm:$0xff] }
 0x6bd   :  { %v4115_v7 = vpop.f32.mrf.mxu1  ;;  %v6590_v37 = vadd.f32 %v6511_v33, %v2889_v1  ;;  %v6611_v33 = vld [vmem:[%s7039_s7 + $0x18] sm:$0xff]  ;;  %v3626_v1 = vld [vmem:[%s7040_s8] sm:$0xff] }
 0x6be   :  { %v6557_v3 = vadd.f32 %v4114_v27, %v2924_v29 }
 0x6bf   :  { %v4116_v10 = vpop.f32.mrf.mxu1 }
 0x6c0   :  { %v4117_v6 = vadd.f32 %v4116_v10, %v4115_v7  ;;  %v6623_v7 = vld [vmem:[%s7039_s7 + $0x28] sm:$0xff]  ;;  %v6628_v10 = vld [vmem:[%s7039_s7 + $0x30] sm:$0xff] }
 0x6c1   :  { %v4118_v53 = vpop.f32.mrf.mxu1 }
 0x6c2   :  { %v6551_v50 = vadd.f32 %v4117_v6, %v2929_v57 }
 0x6c3   :  { %v4119_v36 = vpop.f32.mrf.mxu1 }
 0x6c4   :  { %v4120_v40 = vadd.f32 %v4119_v36, %v4118_v53  ;;  %v6635_v53 = vld [vmem:[%s7039_s7 + $0x38] sm:$0xff]  ;;  %v6640_v36 = vld [vmem:[%s7039_s7 + $0x40] sm:$0xff] }
 0x6c5   :  { %v4121_v54 = vpop.f32.mrf.mxu1 }
 0x6c6   :  { %v6547_v12 = vadd.f32 %v4120_v40, %v2934_v55 }
 0x6c7   :  { %v4122_v23 = vpop.f32.mrf.mxu1 }
 0x6c8   :  { %v4123_v45 = vadd.f32 %v4122_v23, %v4121_v54  ;;  %v6647_v54 = vld [vmem:[%s7039_s7 + $0x48] sm:$0xff]  ;;  %v6652_v23 = vld [vmem:[%s7039_s7 + $0x50] sm:$0xff] }
 0x6c9   :  { %v4124_v52 = vpop.f32.mrf.mxu1 }
 0x6ca   :  { %v6543_v8 = vadd.f32 %v4123_v45, %v2939_v20 }
 0x6cb   :  { %v4125_v39 = vpop.f32.mrf.mxu1 }
 0x6cc   :  { %v4126_v34 = vadd.f32 %v4125_v39, %v4124_v52  ;;  %v6659_v52 = vld [vmem:[%s7039_s7 + $0x58] sm:$0xff]  ;;  %v6671_v39 = vld [vmem:[%s7039_s7 + $0x68] sm:$0xff] }
 0x6cd   :  { %v4127_v17 = vpop.f32.mrf.mxu1 }
 0x6ce   :  { %v6539_v47 = vadd.f32 %v4126_v34, %v2944_v49 }
 0x6cf   :  { %v4128_v19 = vpop.f32.mrf.mxu1 }
 0x6d0   :  { %v4129_v59 = vadd.f32 %v4128_v19, %v4127_v17  ;;  %v6676_v17 = vld [vmem:[%s7039_s7 + $0x70] sm:$0xff]  ;;  %v6683_v19 = vld [vmem:[%s7039_s7 + $0x78] sm:$0xff] }
 0x6d1   :  { %v4130_v51 = vpop.f32.mrf.mxu1 }
 0x6d2   :  { %v6535_v56 = vadd.f32 %v4129_v59, %v2949_v30 }
 0x6d3   :  { %v4131_v14 = vpop.f32.mrf.mxu1 }
 0x6d4   :  { %v4132_v4 = vadd.f32 %v4131_v14, %v4130_v51 }
 0x6d5   :  { %v4133_v43 = vpop.f32.mrf.mxu1 }
 0x6d6   :  { %v6531_v44 = vadd.f32 %v4132_v4, %v2954_v21 }
 0x6d7   :  { %v4134_v9 = vpop.f32.mrf.mxu1 }
 0x6d8   :  { %v4135_v0 = vadd.f32 %v4134_v9, %v4133_v43 }
 0x6d9   :  { %v4136_v35 = vpop.f32.mrf.mxu1 }
 0x6da   :  { %v6527_v42 = vadd.f32 %v4135_v0, %v2959_v24 }
 0x6db   :  { %v4137_v63 = vpop.f32.mrf.mxu1 }
 0x6dc   :  { %v4138_v46 = vadd.f32 %v4137_v63, %v4136_v35 }
 0x6de   :  { %v6525_v48 = vadd.f32 %v4138_v46, %v2964_v38  ;;  %v6664_v38 = vld [vmem:[%s7039_s7 + $0x60] sm:$0xff] }
 0x6e0   :  { %4203 = vmatprep.subr.mxu1 %v6525_v48 }
 0x6e1   :  { %4204 = vmatpush3.msra.mxu1 %v6525_v48 }
 0x6e2   :  { %4205 = vmatprep.subr.mxu1 %v6527_v42 }
 0x6e3   :  { %4206 = vmatpush3.msra.mxu1 %v6527_v42 }
 0x6e4   :  { %4207 = vmatprep.subr.mxu1 %v6531_v44 }
 0x6e5   :  { %4208 = vmatpush3.msra.mxu1 %v6531_v44 }
 0x6e6   :  { %4209 = vmatprep.subr.mxu1 %v6535_v56 }
 0x6e7   :  { %4210 = vmatpush3.msra.mxu1 %v6535_v56 }
 0x6e8   :  { %4211 = vmatprep.subr.mxu1 %v6539_v47 }
 0x6e9   :  { %4212 = vmatpush3.msra.mxu1 %v6539_v47 }
 0x6ea   :  { %4213 = vmatprep.subr.mxu1 %v6543_v8 }
 0x6eb   :  { %4214 = vmatpush3.msra.mxu1 %v6543_v8 }
 0x6ec   :  { %4215 = vmatprep.subr.mxu1 %v6547_v12 }
 0x6ed   :  { %4216 = vmatpush3.msra.mxu1 %v6547_v12 }
 0x6ee   :  { %4217 = vmatprep.subr.mxu1 %v6551_v50 }
 0x6ef   :  { %4218 = vmatpush3.msra.mxu1 %v6551_v50 }
 0x6f0   :  { %4219 = vmatprep.subr.mxu1 %v6557_v3 }
 0x6f1   :  { %4220 = vmatpush3.msra.mxu1 %v6557_v3 }
 0x6f2   :  { %4221 = vmatprep.subr.mxu1 %v6561_v28 }
 0x6f3   :  { %4222 = vmatpush3.msra.mxu1 %v6561_v28 }
 0x6f4   :  { %4223 = vmatprep.subr.mxu1 %v6565_v61 }
 0x6f5   :  { %4224 = vmatpush3.msra.mxu1 %v6565_v61 }
 0x6f6   :  { %4225 = vmatprep.subr.mxu1 %v6570_v22 }
 0x6f7   :  { %4226 = vmatpush3.msra.mxu1 %v6570_v22 }
 0x6f8   :  { %4227 = vmatprep.subr.mxu1 %v6575_v11 }
 0x6f9   :  { %4228 = vmatpush3.msra.mxu1 %v6575_v11 }
 0x6fa   :  { %4229 = vmatprep.subr.mxu1 %v6580_v25 }
 0x6fb   :  { %4230 = vmatpush3.msra.mxu1 %v6580_v25 }
 0x6fc   :  { %4231 = vmatprep.subr.mxu1 %v6585_v18 }
 0x6fd   :  { %4232 = vmatpush3.msra.mxu1 %v6585_v18 }
 0x6fe   :  { %4233 = vmatprep.subr.mxu1 %v6590_v37 }
 0x6ff   :  { %4234 = vmatpush3.msra.mxu1 %v6590_v37 }
 0x700   :  { %4236 = vmatmul.mubr.f32.vlgmr.msra.gmra.mxu1 %v6597_v5 }
 0x701   :  { %4238 = vmatprep.mubr.f32.mxu1 %v6603_v16 }
 0x704   :  { %4239 = vmatmul.mubr.f32.gmra.mxu1 %v6611_v33 }
 0x705   :  { %4241 = vmatprep.mubr.f32.mxu1 %v6616_v62 }
 0x708   :  { %4242 = vmatmul.mubr.f32.gmra.mxu1 %v6623_v7 }
 0x709   :  { %4244 = vmatprep.mubr.f32.mxu1 %v6628_v10 }
 0x70c   :  { %4245 = vmatmul.mubr.f32.gmra.mxu1 %v6635_v53 }
 0x70d   :  { %4247 = vmatprep.mubr.f32.mxu1 %v6640_v36 }
 0x710   :  { %4248 = vmatmul.mubr.f32.gmra.mxu1 %v6647_v54 }
 0x711   :  { %4250 = vmatprep.mubr.f32.mxu1 %v6652_v23 }
 0x714   :  { %4251 = vmatmul.mubr.f32.gmra.mxu1 %v6659_v52 }
 0x715   :  { %4253 = vmatprep.mubr.f32.mxu1 %v6664_v38 }
 0x718   :  { %4254 = vmatmul.mubr.f32.gmra.mxu1 %v6671_v39 }
 0x719   :  { %4256 = vmatprep.mubr.f32.mxu1 %v6676_v17 }
 0x71c   :  { %4257 = vmatmul.mubr.f32.gmra.mxu1 %v6683_v19 }
 0x71d   :  { %4291 = vmatprep.mubr.f32.mxu1 %v6508_v31 }
 0x7c0   :  { %v4237_v21 = vpop.f32.mrf.mxu1 }
 0x7c1   :  { %v3275_v2 = vsel %vm1395_vm0, %v4237_v21, 0.0  ;;  %v3629_v21 = vld [vmem:[%s7040_s8 + $0x18] sm:$0xff] }
 0x7c2   :  { %v3193_v51 = vpop.f32.mrf.mxu1 }
 0x7c3   :  { %v3272_v13 = vsel %vm1395_vm0, %v3193_v51, 0.0  ;;  %v3627_v51 = vld [vmem:[%s7040_s8 + $0x8] sm:$0xff] }
 0x7c4   :  { %v4240_v14 = vpop.f32.mrf.mxu1 }
 0x7c5   :  { %v3281_v60 = vsel %vm1395_vm0, %v4240_v14, 0.0  ;;  %v3628_v14 = vld [vmem:[%s7040_s8 + $0x10] sm:$0xff] }
 0x7c6   :  { %v3203_v24 = vpop.f32.mrf.mxu1 }
 0x7c7   :  { %v3278_v26 = vsel %vm1395_vm0, %v3203_v24, 0.0  ;;  %v3631_v24 = vld [vmem:[%s7040_s8 + $0x28] sm:$0xff] }
 0x7c8   :  { %v4243_v43 = vpop.f32.mrf.mxu1 }
 0x7c9   :  { %v3287_v41 = vsel %vm1395_vm0, %v4243_v43, 0.0  ;;  %v3630_v43 = vld [vmem:[%s7040_s8 + $0x20] sm:$0xff] }
 0x7ca   :  { %v3213_v30 = vpop.f32.mrf.mxu1 }
 0x7cb   :  { %v3284_v15 = vsel %vm1395_vm0, %v3213_v30, 0.0  ;;  %v3633_v30 = vld [vmem:[%s7040_s8 + $0x38] sm:$0xff] }
 0x7cc   :  { %v4246_v9 = vpop.f32.mrf.mxu1 }
 0x7cd   :  { %v3293_v58 = vsel %vm1395_vm0, %v4246_v9, 0.0  ;;  %v3632_v9 = vld [vmem:[%s7040_s8 + $0x30] sm:$0xff] }
 0x7ce   :  { %v3223_v35 = vpop.f32.mrf.mxu1 }
 0x7cf   :  { %v3290_v32 = vsel %vm1395_vm0, %v3223_v35, 0.0  ;;  %v3635_v35 = vld [vmem:[%s7040_s8 + $0x48] sm:$0xff] }
 0x7d0   :  { %v4249_v49 = vpop.f32.mrf.mxu1 }
 0x7d1   :  { %v3299_v29 = vsel %vm1395_vm0, %v4249_v49, 0.0  ;;  %v3634_v49 = vld [vmem:[%s7040_s8 + $0x40] sm:$0xff] }
 0x7d2   :  { %v3233_v63 = vpop.f32.mrf.mxu1 }
 0x7d3   :  { %v3296_v27 = vsel %vm1395_vm0, %v3233_v63, 0.0  ;;  %v3637_v63 = vld [vmem:[%s7040_s8 + $0x58] sm:$0xff] }
 0x7d4   :  { %v4252_v0 = vpop.f32.mrf.mxu1 }
 0x7d5   :  { %v3305_v45 = vsel %vm1395_vm0, %v4252_v0, 0.0  ;;  %v3636_v0 = vld [vmem:[%s7040_s8 + $0x50] sm:$0xff] }
 0x7d6   :  { %v3243_v46 = vpop.f32.mrf.mxu1 }
 0x7d7   :  { %v3302_v6 = vsel %vm1395_vm0, %v3243_v46, 0.0  ;;  %v3639_v46 = vld [vmem:[%s7040_s8 + $0x68] sm:$0xff] }
 0x7d8   :  { %v4255_v20 = vpop.f32.mrf.mxu1 }
 0x7d9   :  { %v3311_v57 = vsel %vm1395_vm0, %v4255_v20, 0.0  ;;  %v3638_v20 = vld [vmem:[%s7040_s8 + $0x60] sm:$0xff] }
 0x7da   :  { %v3253_v4 = vpop.f32.mrf.mxu1 }
 0x7db   :  { %v3308_v40 = vsel %vm1395_vm0, %v3253_v4, 0.0  ;;  %v3641_v4 = vld [vmem:[%s7040_s8 + $0x78] sm:$0xff] }
 0x7dc   :  { %v4258_v59 = vpop.f32.mrf.mxu1 }
 0x7dd   :  { %v3317_v55 = vsel %vm1395_vm0, %v4258_v59, 0.0  ;;  %v3640_v59 = vld [vmem:[%s7040_s8 + $0x70] sm:$0xff] }
 0x7de   :  { %3318 = vadd.xlane.f32.xlu0 %v3317_v55  ;;  %v3263_v34 = vpop.f32.mrf.mxu1  ;;  %v3739_v55 = vld [vmem:[%s7041_s9 + $0x8] sm:$0xff] }
 0x7df   :  { %v3314_v31 = vsel %vm1395_vm0, %v3263_v34, 0.0  ;;  %v3738_v34 = vld [vmem:[%s7041_s9] sm:$0xff] }
 0x7e0   :  { %3315 = vadd.xlane.f32.xlu1 %v3314_v31  ;;  %v3741_v31 = vld [vmem:[%s7041_s9 + $0x18] sm:$0xff] }
 0x7e2   :  { %3312 = vadd.xlane.f32.xlu0 %v3311_v57  ;;  %v3740_v57 = vld [vmem:[%s7041_s9 + $0x10] sm:$0xff] }
 0x7e4   :  { %3306 = vadd.xlane.f32.xlu1 %v3305_v45  ;;  %v3743_v45 = vld [vmem:[%s7041_s9 + $0x28] sm:$0xff] }
 0x7e6   :  { %3309 = vadd.xlane.f32.xlu0 %v3308_v40  ;;  %v3742_v40 = vld [vmem:[%s7041_s9 + $0x20] sm:$0xff] }
 0x7e8   :  { %3300 = vadd.xlane.f32.xlu1 %v3299_v29  ;;  %v3745_v29 = vld [vmem:[%s7041_s9 + $0x38] sm:$0xff] }
 0x7ea   :  { %3303 = vadd.xlane.f32.xlu0 %v3302_v6  ;;  %v3744_v6 = vld [vmem:[%s7041_s9 + $0x30] sm:$0xff] }
 0x7ec   :  { %3294 = vadd.xlane.f32.xlu1 %v3293_v58  ;;  %v3747_v58 = vld [vmem:[%s7041_s9 + $0x48] sm:$0xff] }
 0x7ee   :  { %3297 = vadd.xlane.f32.xlu0 %v3296_v27  ;;  %v3746_v27 = vld [vmem:[%s7041_s9 + $0x40] sm:$0xff] }
 0x7f0   :  { %3288 = vadd.xlane.f32.xlu1 %v3287_v41  ;;  %v3749_v41 = vld [vmem:[%s7041_s9 + $0x58] sm:$0xff] }
 0x7f2   :  { %3291 = vadd.xlane.f32.xlu0 %v3290_v32  ;;  %v3748_v32 = vld [vmem:[%s7041_s9 + $0x50] sm:$0xff] }
 0x7f4   :  { %3282 = vadd.xlane.f32.xlu1 %v3281_v60  ;;  %v3751_v60 = vld [vmem:[%s7041_s9 + $0x68] sm:$0xff] }
 0x7f6   :  { %3285 = vadd.xlane.f32.xlu0 %v3284_v15  ;;  %v3750_v15 = vld [vmem:[%s7041_s9 + $0x60] sm:$0xff] }
 0x7f8   :  { %3276 = vadd.xlane.f32.xlu1 %v3275_v2 }
 0x7fa   :  { %3279 = vadd.xlane.f32.xlu0 %v3278_v26 }
 0x7fe   :  { %3273 = vadd.xlane.f32.xlu0 %v3272_v13 }
 0x809   :  { %3644 = vperm.xlu1 %4324, %v3626_v1  }
 0x80d   :  { %3654 = vperm.xlu1 %4324, %v3628_v14  }
 0x811   :  { %3659 = vperm.xlu1 %4324, %v3629_v21  }
 0x814   :  { %3649 = vperm.xlu0 %4323, %v3627_v51  }
 0x815   :  { %3669 = vperm.xlu1 %4324, %v3631_v24  }
 0x818   :  { %3664 = vperm.xlu0 %4323, %v3630_v43  }
 0x819   :  { %3679 = vperm.xlu1 %4324, %v3633_v30  }
 0x81c   :  { %3674 = vperm.xlu0 %4323, %v3632_v9  }
 0x81d   :  { %3689 = vperm.xlu1 %4324, %v3635_v35  }
 0x820   :  { %3684 = vperm.xlu0 %4323, %v3634_v49  }
 0x821   :  { %3699 = vperm.xlu1 %4324, %v3637_v63  }
 0x824   :  { %3694 = vperm.xlu0 %4323, %v3636_v0  }
 0x825   :  { %3709 = vperm.xlu1 %4324, %v3639_v46  }
 0x828   :  { %3704 = vperm.xlu0 %4323, %v3638_v20  }
 0x829   :  { %3719 = vperm.xlu1 %4324, %v3641_v4  }
 0x82c   :  { %3714 = vperm.xlu0 %4323, %v3640_v59  }
 0x82d   :  { %3761 = vperm.xlu1 %4324, %v3739_v55  }
 0x830   :  { %3756 = vperm.xlu0 %4323, %v3738_v34  }
 0x831   :  { %3771 = vperm.xlu1 %4324, %v3741_v31  }
 0x834   :  { %3766 = vperm.xlu0 %4323, %v3740_v57  }
 0x835   :  { %3781 = vperm.xlu1 %4324, %v3743_v45  }
 0x838   :  { %3776 = vperm.xlu0 %4323, %v3742_v40  }
 0x839   :  { %3791 = vperm.xlu1 %4324, %v3745_v29  }
 0x83c   :  { %3786 = vperm.xlu0 %4323, %v3744_v6  }
 0x83d   :  { %3801 = vperm.xlu1 %4324, %v3747_v58  }
 0x840   :  { %3796 = vperm.xlu0 %4323, %v3746_v27  }
 0x841   :  { %3811 = vperm.xlu1 %4324, %v3749_v41  }
 0x844   :  { %3806 = vperm.xlu0 %4323, %v3748_v32  }
 0x845   :  { %3821 = vperm.xlu1 %4324, %v3751_v60  }
 0x848   :  { %3816 = vperm.xlu0 %4323, %v3750_v15  }
 0x867   :  { %v3319_v2 = vpop.xlane.xlu0 %3318 }
 0x868   :  { %v3336_v26 = vmul.f32 0.0078125, %v3319_v2 }
 0x869   :  { %v3316_v13 = vpop.xlane.xlu1 %3315 }
 0x86a   :  { %v6794_v1 = vsub.f32 %v6525_v48, %v3336_v26  ;;  %v3335_v14 = vmul.f32 0.0078125, %v3316_v13 }
 0x86b   :  { %v3313_v21 = vpop.xlane.xlu0 %3312 }
 0x86c   :  { %v6797_v51 = vsub.f32 %v6527_v42, %v3335_v14  ;;  %v3334_v24 = vmul.f32 0.0078125, %v3313_v21  ;;  %v3368_v43 = vmul.f32 %v6794_v1, %v6794_v1 }
 0x86d   :  { %v3307_v30 = vpop.xlane.xlu1 %3306 }
 0x86e   :  { %v6802_v9 = vsub.f32 %v6531_v44, %v3334_v24  ;;  %v3332_v35 = vmul.f32 0.0078125, %v3307_v30  ;;  %4259 = vmatprep.subr.mxu1 %v3368_v43  ;;  %v3367_v49 = vmul.f32 %v6797_v51, %v6797_v51 }
 0x86f   :  { %4260 = vmatpush3.msra.mxu1 %v3368_v43  ;;  %v3310_v48 = vpop.xlane.xlu0 %3309 }
 0x870   :  { %v3333_v63 = vmul.f32 0.0078125, %v3310_v48  ;;  %4261 = vmatprep.subr.mxu1 %v3367_v49  ;;  %v3366_v42 = vmul.f32 %v6802_v9, %v6802_v9  ;;  %v6809_v46 = vsub.f32 %v6539_v47, %v3332_v35 }
 0x871   :  { %4262 = vmatpush3.msra.mxu1 %v3367_v49  ;;  %v3301_v0 = vpop.xlane.xlu1 %3300 }
 0x872   :  { %v6812_v44 = vsub.f32 %v6535_v56, %v3333_v63  ;;  %v3330_v20 = vmul.f32 0.0078125, %v3301_v0  ;;  %4263 = vmatprep.subr.mxu1 %v3366_v42  ;;  %v3364_v56 = vmul.f32 %v6809_v46, %v6809_v46 }
 0x873   :  { %v3304_v4 = vpop.xlane.xlu0 %3303  ;;  %4264 = vmatpush3.msra.mxu1 %v3366_v42 }
 0x874   :  { %v3331_v59 = vmul.f32 0.0078125, %v3304_v4  ;;  %v3365_v55 = vmul.f32 %v6812_v44, %v6812_v44  ;;  %v6817_v31 = vsub.f32 %v6547_v12, %v3330_v20 }
 0x875   :  { %v3295_v34 = vpop.xlane.xlu1 %3294 }
 0x876   :  { %v6820_v57 = vsub.f32 %v6543_v8, %v3331_v59  ;;  %v3328_v47 = vmul.f32 0.0078125, %v3295_v34  ;;  %4265 = vmatprep.subr.mxu1 %v3365_v55  ;;  %v3362_v27 = vmul.f32 %v6817_v31, %v6817_v31 }
 0x877   :  { %v3298_v45 = vpop.xlane.xlu0 %3297  ;;  %4266 = vmatpush3.msra.mxu1 %v3365_v55 }
 0x878   :  { %v3329_v40 = vmul.f32 0.0078125, %v3298_v45  ;;  %4267 = vmatprep.subr.mxu1 %v3364_v56  ;;  %v3363_v29 = vmul.f32 %v6820_v57, %v6820_v57  ;;  %v6827_v12 = vsub.f32 %v6557_v3, %v3328_v47 }
 0x879   :  { %4268 = vmatpush3.msra.mxu1 %v3364_v56  ;;  %v3289_v6 = vpop.xlane.xlu1 %3288 }
 0x87a   :  { %v6830_v8 = vsub.f32 %v6551_v50, %v3329_v40  ;;  %v3326_v58 = vmul.f32 0.0078125, %v3289_v6  ;;  %4269 = vmatprep.subr.mxu1 %v3363_v29  ;;  %v3360_v26 = vmul.f32 %v6827_v12, %v6827_v12 }
 0x87b   :  { %v3292_v41 = vpop.xlane.xlu0 %3291  ;;  %4270 = vmatpush3.msra.mxu1 %v3363_v29 }
 0x87c   :  { %v3327_v32 = vmul.f32 0.0078125, %v3292_v41  ;;  %4271 = vmatprep.subr.mxu1 %v3362_v27  ;;  %v3361_v60 = vmul.f32 %v6830_v8, %v6830_v8  ;;  %v6837_v3 = vsub.f32 %v6565_v61, %v3326_v58 }
 0x87d   :  { %4272 = vmatpush3.msra.mxu1 %v3362_v27  ;;  %v3283_v15 = vpop.xlane.xlu1 %3282 }
 0x87e   :  { %v6840_v50 = vsub.f32 %v6561_v28, %v3327_v32  ;;  %v3324_v2 = vmul.f32 0.0078125, %v3283_v15  ;;  %4273 = vmatprep.subr.mxu1 %v3361_v60  ;;  %v3358_v30 = vmul.f32 %v6837_v3, %v6837_v3 }
 0x87f   :  { %v3286_v13 = vpop.xlane.xlu0 %3285  ;;  %4274 = vmatpush3.msra.mxu1 %v3361_v60 }
 0x880   :  { %v3325_v14 = vmul.f32 0.0078125, %v3286_v13  ;;  %4275 = vmatprep.subr.mxu1 %v3360_v26  ;;  %v3359_v21 = vmul.f32 %v6840_v50, %v6840_v50  ;;  %v6847_v61 = vsub.f32 %v6575_v11, %v3324_v2 }
 0x881   :  { %4276 = vmatpush3.msra.mxu1 %v3360_v26  ;;  %v3277_v24 = vpop.xlane.xlu1 %3276  ;;  %v3753_v26 = vld [vmem:[%s7041_s9 + $0x78] sm:$0xff] }
 0x882   :  { %v6850_v28 = vsub.f32 %v6570_v22, %v3325_v14  ;;  %v3322_v43 = vmul.f32 0.0078125, %v3277_v24  ;;  %4277 = vmatprep.subr.mxu1 %v3359_v21  ;;  %v3356_v22 = vmul.f32 %v6847_v61, %v6847_v61  ;;  %v3752_v14 = vld [vmem:[%s7041_s9 + $0x70] sm:$0xff]  ;;  %s4598_s9 = smov [#allocation5]  }
 0x883   :  { %v3280_v35 = vpop.xlane.xlu0 %3279  ;;  %4278 = vmatpush3.msra.mxu1 %v3359_v21  ;;  %s3887_s20 = sshll.u32 %s4598_s9, 4  ;;  %s3888_s20 = int_to_ptr.vmem [resolvable:$true] %s3887_s20 }
 0x884   :  { %v3323_v49 = vmul.f32 0.0078125, %v3280_v35  ;;  %4279 = vmatprep.subr.mxu1 %v3358_v30  ;;  %v3357_v48 = vmul.f32 %v6850_v28, %v6850_v28  ;;  %v6857_v63 = vsub.f32 %v6585_v18, %v3322_v43  ;;  %s4569_s21 = scalar_lea.vmem %s3888_s20, 2048  ;;  %p4574_p6 = scmp.lt.s32.totalorder %s3888_s20, %s3888_s20 }
 0x885   :  { %4280 = vmatpush3.msra.mxu1 %v3358_v30  ;;  %v6907_v13 = vpop.permute.xlu1 %3644  ;;  %p4570_p5 = scmp.ne.s32.totalorder %s3888_s20, %s4569_s21  ;;  %p4575_p7 = scmp.lt.s32.totalorder %s4569_s21, %s4569_s21 }
 0x886   :  { %v6860_v11 = vsub.f32 %v6580_v25, %v3323_v49  ;;  %4281 = vmatprep.subr.mxu1 %v3357_v48  ;;  %v3354_v25 = vmul.f32 %v6857_v63, %v6857_v63 }
 0x887   :  { %v3274_v42 = vpop.xlane.xlu0 %3273  ;;  %4282 = vmatpush3.msra.mxu1 %v3357_v48  ;;  %p4576_p8 = por %p4575_p7, %p4574_p6 }
 0x888   :  { %v3321_v0 = vmul.f32 0.0078125, %v3274_v42  ;;  %4283 = vmatprep.subr.mxu1 %v3356_v22  ;;  %v3355_v20 = vmul.f32 %v6860_v11, %v6860_v11 }
 0x889   :  { %4284 = vmatpush3.msra.mxu1 %v3356_v22  ;;  %v6912_v21 = vpop.permute.xlu1 %3654  ;;  %p4577_p9 = pnand %p4576_p8, %p4570_p5 }
 0x88a   :  { %v6867_v4 = vsub.f32 %v6590_v37, %v3321_v0  ;;  %4285 = vmatprep.subr.mxu1 %v3355_v20 }
 0x88b   :  { %4286 = vmatpush3.msra.mxu1 %v3355_v20 }
 0x88c   :  { %4287 = vmatprep.subr.mxu1 %v3354_v25  ;;  %v3353_v18 = vmul.f32 %v6867_v4, %v6867_v4 }
 0x88d   :  { %4288 = vmatpush3.msra.mxu1 %v3354_v25  ;;  %v6916_v43 = vpop.permute.xlu1 %3659 }
 0x88e   :  { %4289 = vmatprep.subr.mxu1 %v3353_v18 }
 0x88f   :  { %4290 = vmatpush3.msra.mxu1 %v3353_v18  ;;  %v6914_v24 = vpop.permute.xlu0 %3649 }
 0x890   :  { %4292 = vmatmul.mubr.f32.vlgmr.msra.gmra.mxu1 %v6597_v5 }
 0x891   :  { %4294 = vmatprep.mubr.f32.mxu1 %v6603_v16  ;;  %v6920_v35 = vpop.permute.xlu1 %3669 }
 0x893   :  { %v6918_v30 = vpop.permute.xlu0 %3664 }
 0x894   :  { %4295 = vmatmul.mubr.f32.gmra.mxu1 %v6611_v33 }
 0x895   :  { %4297 = vmatprep.mubr.f32.mxu1 %v6616_v62  ;;  %v6924_v48 = vpop.permute.xlu1 %3679 }
 0x897   :  { %v6922_v49 = vpop.permute.xlu0 %3674 }
 0x898   :  { %4298 = vmatmul.mubr.f32.gmra.mxu1 %v6623_v7 }
 0x899   :  { %4300 = vmatprep.mubr.f32.mxu1 %v6628_v10  ;;  %v6928_v42 = vpop.permute.xlu1 %3689 }
 0x89b   :  { %v6926_v22 = vpop.permute.xlu0 %3684 }
 0x89c   :  { %4301 = vmatmul.mubr.f32.gmra.mxu1 %v6635_v53 }
 0x89d   :  { %4303 = vmatprep.mubr.f32.mxu1 %v6640_v36  ;;  %v6932_v20 = vpop.permute.xlu1 %3699 }
 0x89f   :  { %v6930_v0 = vpop.permute.xlu0 %3694 }
 0x8a0   :  { %4304 = vmatmul.mubr.f32.gmra.mxu1 %v6647_v54 }
 0x8a1   :  { %4306 = vmatprep.mubr.f32.mxu1 %v6652_v23  ;;  %v6936_v18 = vpop.permute.xlu1 %3709 }
 0x8a3   :  { %v6934_v25 = vpop.permute.xlu0 %3704 }
 0x8a4   :  { %4307 = vmatmul.mubr.f32.gmra.mxu1 %v6659_v52 }
 0x8a5   :  { %4309 = vmatprep.mubr.f32.mxu1 %v6664_v38 }
 0x8a8   :  { %4310 = vmatmul.mubr.f32.gmra.mxu1 %v6671_v39 }
 0x8a9   :  { %4312 = vmatprep.mubr.f32.mxu1 %v6676_v17 }
 0x8ac   :  { %4313 = vmatmul.mubr.f32.gmra.mxu1 %v6683_v19 }
 0x950   :  { %v4293_v37 = vpop.f32.mrf.mxu1 }
 0x951   :  { %v3517_v5 = vsel %vm1395_vm0, %v4293_v37, 0.0  ;;  %v6938_v37 = vpop.permute.xlu0 %3714 }
 0x952   :  { %3518 = vadd.xlane.f32.xlu0 %v3517_v5  ;;  %v3435_v16 = vpop.f32.mrf.mxu1  ;;  %v6940_v5 = vpop.permute.xlu1 %3719 }
 0x953   :  { %v3514_v33 = vsel %vm1395_vm0, %v3435_v16, 0.0 }
 0x954   :  { %3515 = vadd.xlane.f32.xlu1 %v3514_v33  ;;  %v4296_v62 = vpop.f32.mrf.mxu1 }
 0x955   :  { %v3523_v7 = vsel %vm1395_vm0, %v4296_v62, 0.0  ;;  %v6942_v16 = vpop.permute.xlu0 %3756 }
 0x956   :  { %3524 = vadd.xlane.f32.xlu0 %v3523_v7  ;;  %v3445_v10 = vpop.f32.mrf.mxu1  ;;  %v3762_v33 = vpop.permute.xlu1 %3761 }
 0x957   :  { %v3520_v53 = vsel %vm1395_vm0, %v3445_v10, 0.0 }
 0x958   :  { %3521 = vadd.xlane.f32.xlu1 %v3520_v53  ;;  %v4299_v36 = vpop.f32.mrf.mxu1 }
 0x959   :  { %v3529_v54 = vsel %vm1395_vm0, %v4299_v36, 0.0  ;;  %v6944_v62 = vpop.permute.xlu0 %3766 }
 0x95a   :  { %3530 = vadd.xlane.f32.xlu0 %v3529_v54  ;;  %v3455_v23 = vpop.f32.mrf.mxu1  ;;  %v6946_v7 = vpop.permute.xlu1 %3771 }
 0x95b   :  { %v3526_v52 = vsel %vm1395_vm0, %v3455_v23, 0.0 }
 0x95c   :  { %3527 = vadd.xlane.f32.xlu1 %v3526_v52  ;;  %v4302_v38 = vpop.f32.mrf.mxu1 }
 0x95d   :  { %v3535_v39 = vsel %vm1395_vm0, %v4302_v38, 0.0  ;;  %v6948_v10 = vpop.permute.xlu0 %3776 }
 0x95e   :  { %3536 = vadd.xlane.f32.xlu0 %v3535_v39  ;;  %v3465_v17 = vpop.f32.mrf.mxu1  ;;  %v6950_v53 = vpop.permute.xlu1 %3781 }
 0x95f   :  { %v3532_v19 = vsel %vm1395_vm0, %v3465_v17, 0.0 }
 0x960   :  { %3533 = vadd.xlane.f32.xlu1 %v3532_v19  ;;  %v4305_v59 = vpop.f32.mrf.mxu1 }
 0x961   :  { %v3541_v55 = vsel %vm1395_vm0, %v4305_v59, 0.0  ;;  %v6952_v36 = vpop.permute.xlu0 %3786 }
 0x962   :  { %3542 = vadd.xlane.f32.xlu0 %v3541_v55  ;;  %v3475_v34 = vpop.f32.mrf.mxu1  ;;  %v6954_v54 = vpop.permute.xlu1 %3791 }
 0x963   :  { %v3538_v47 = vsel %vm1395_vm0, %v3475_v34, 0.0 }
 0x964   :  { %3539 = vadd.xlane.f32.xlu1 %v3538_v47  ;;  %v4308_v56 = vpop.f32.mrf.mxu1 }
 0x965   :  { %v3547_v45 = vsel %vm1395_vm0, %v4308_v56, 0.0  ;;  %v6956_v23 = vpop.permute.xlu0 %3796 }
 0x966   :  { %3548 = vadd.xlane.f32.xlu0 %v3547_v45  ;;  %v3485_v40 = vpop.f32.mrf.mxu1  ;;  %v6958_v52 = vpop.permute.xlu1 %3801 }
 0x967   :  { %v3544_v29 = vsel %vm1395_vm0, %v3485_v40, 0.0 }
 0x968   :  { %3545 = vadd.xlane.f32.xlu1 %v3544_v29  ;;  %v4311_v6 = vpop.f32.mrf.mxu1 }
 0x969   :  { %v3553_v58 = vsel %vm1395_vm0, %v4311_v6, 0.0  ;;  %v6960_v38 = vpop.permute.xlu0 %3806 }
 0x96a   :  { %3554 = vadd.xlane.f32.xlu0 %v3553_v58  ;;  %v3495_v27 = vpop.f32.mrf.mxu1  ;;  %v6962_v39 = vpop.permute.xlu1 %3811 }
 0x96b   :  { %v3550_v41 = vsel %vm1395_vm0, %v3495_v27, 0.0 }
 0x96c   :  { %3551 = vadd.xlane.f32.xlu1 %v3550_v41  ;;  %v4314_v32 = vpop.f32.mrf.mxu1 }
 0x96d   :  { %v3559_v60 = vsel %vm1395_vm0, %v4314_v32, 0.0  ;;  %v6964_v17 = vpop.permute.xlu0 %3816 }
 0x96e   :  { %3560 = vadd.xlane.f32.xlu0 %v3559_v60  ;;  %v3505_v15 = vpop.f32.mrf.mxu1  ;;  %v6966_v19 = vpop.permute.xlu1 %3821 }
 0x96f   :  { %v3556_v2 = vsel %vm1395_vm0, %v3505_v15, 0.0 }
 0x970   :  { %3557 = vadd.xlane.f32.xlu1 %v3556_v2 }
 0x981   :  { %3831 = vperm.xlu1 %4324, %v3753_v26  }
 0x984   :  { %3826 = vperm.xlu0 %4323, %v3752_v14  }
 0x9db   :  { %v3519_v59 = vpop.xlane.xlu0 %3518 }
 0x9dc   :  { %v3563_v55 = vmul.f32 0.0078125, %v3519_v59 }
 0x9dd   :  { %v3516_v34 = vpop.xlane.xlu1 %3515 }
 0x9de   :  { %v3579_v47 = vadd.f32 1e-05, %v3563_v55  ;;  %v3562_v56 = vmul.f32 0.0078125, %v3516_v34 }
 0x9df   :  { %v3525_v45 = vpop.xlane.xlu0 %3524 }
 0x9e0   :  { %4517 = vrsqrt.f32 %v3579_v47  ;;  %v3578_v40 = vadd.f32 1e-05, %v3562_v56  ;;  %v3565_v29 = vmul.f32 0.0078125, %v3525_v45 }
 0x9e1   :  { %v3522_v6 = vpop.xlane.xlu1 %3521 }
 0x9e2   :  { %4519 = vrsqrt.f32 %v3578_v40  ;;  %v3581_v58 = vadd.f32 1e-05, %v3565_v29  ;;  %v3564_v27 = vmul.f32 0.0078125, %v3522_v6 }
 0x9e3   :  { %v3531_v41 = vpop.xlane.xlu0 %3530 }
 0x9e4   :  { %4521 = vrsqrt.f32 %v3581_v58  ;;  %v3580_v32 = vadd.f32 1e-05, %v3564_v27  ;;  %v3567_v60 = vmul.f32 0.0078125, %v3531_v41 }
 0x9e5   :  { %v3528_v15 = vpop.xlane.xlu1 %3527 }
 0x9e6   :  { %4523 = vrsqrt.f32 %v3580_v32  ;;  %v3583_v2 = vadd.f32 1e-05, %v3567_v60  ;;  %v3566_v26 = vmul.f32 0.0078125, %v3528_v15 }
 0x9e7   :  { %v3537_v14 = vpop.xlane.xlu0 %3536 }
 0x9e8   :  { %4525 = vrsqrt.f32 %v3583_v2  ;;  %v3582_v59 = vadd.f32 1e-05, %v3566_v26  ;;  %v3569_v55 = vmul.f32 0.0078125, %v3537_v14 }
 0x9e9   :  { %v3534_v34 = vpop.xlane.xlu1 %3533 }
 0x9ea   :  { %4527 = vrsqrt.f32 %v3582_v59  ;;  %v3585_v47 = vadd.f32 1e-05, %v3569_v55  ;;  %v3568_v56 = vmul.f32 0.0078125, %v3534_v34 }
 0x9eb   :  { %v3543_v45 = vpop.xlane.xlu0 %3542 }
 0x9ec   :  { %4529 = vrsqrt.f32 %v3585_v47  ;;  %v3584_v40 = vadd.f32 1e-05, %v3568_v56  ;;  %v3571_v29 = vmul.f32 0.0078125, %v3543_v45 }
 0x9ed   :  { %v4518_v6 = vpop.eup %4517  ;;  %v3540_v58 = vpop.xlane.xlu1 %3539 }
 0x9ee   :  { %v3611_v27 = vmul.f32 %v4518_v6, %v6857_v63  ;;  %4531 = vrsqrt.f32 %v3584_v40  ;;  %v3587_v41 = vadd.f32 1e-05, %v3571_v29  ;;  %v3570_v32 = vmul.f32 0.0078125, %v3540_v58 }
 0x9ef   :  { %v4520_v60 = vpop.eup %4519  ;;  %v3549_v15 = vpop.xlane.xlu0 %3548 }
 0x9f0   :  { %v3723_v2 = vmul.f32 %v6914_v24, %v3611_v27  ;;  %v3610_v26 = vmul.f32 %v4520_v60, %v6867_v4  ;;  %4533 = vrsqrt.f32 %v3587_v41  ;;  %v3586_v14 = vadd.f32 1e-05, %v3570_v32 }
 0x9f1   :  { %v4522_v59 = vpop.eup %4521  ;;  %v3573_v55 = vmul.f32 0.0078125, %v3549_v15  ;;  %v3546_v34 = vpop.xlane.xlu1 %3545 }
 0x9f2   :  { %v3835_v47 = vadd.f32 %v3762_v33, %v3723_v2  ;;  %v3722_v56 = vmul.f32 %v6907_v13, %v3610_v26  ;;  %v3613_v45 = vmul.f32 %v4522_v59, %v6847_v61  ;;  %4535 = vrsqrt.f32 %v3586_v14 }
 0x9f3   :  { %v4524_v63 = vpop.eup %4523  ;;  %v3589_v40 = vadd.f32 1e-05, %v3573_v55  ;;  %v3572_v29 = vmul.f32 0.0078125, %v3546_v34  ;;  %v3555_v6 = vpop.xlane.xlu0 %3554 }
 0x9f4   :  { %v3851_v58 = vmax.f32 %v3835_v47, 0.0  ;;  %v3834_v24 = vadd.f32 %v6942_v16, %v3722_v56  ;;  %v3725_v4 = vmul.f32 %v6916_v43, %v3613_v45  ;;  %v3612_v27 = vmul.f32 %v4524_v63, %v6860_v11 }
 0x9f5   :  { %v4526_v41 = vpop.eup %4525  ;;  %4537 = vrsqrt.f32 %v3589_v40  ;;  %v3588_v32 = vadd.f32 1e-05, %v3572_v29  ;;  %v3575_v33 = vmul.f32 0.0078125, %v3555_v6  ;;  %v3552_v60 = vpop.xlane.xlu1 %3551 }
 0x9f6   :  { %3867 = vst.msk [vmem:[#allocation5 + $0x8] sm:$0xff] %vm1395_vm0, %v3851_v58  ;;  %v3850_v61 = vmax.f32 %v3834_v24, 0.0  ;;  %v3837_v13 = vadd.f32 %v6946_v7, %v3725_v4  ;;  %v3724_v15 = vmul.f32 %v6912_v21, %v3612_v27  ;;  %v3615_v2 = vmul.f32 %v4526_v41, %v6837_v3 }
 0x9f7   :  { %v4528_v26 = vpop.eup %4527  ;;  %4539 = vrsqrt.f32 %v3588_v32  ;;  %v3591_v16 = vadd.f32 1e-05, %v3575_v33  ;;  %v3574_v43 = vmul.f32 0.0078125, %v3552_v60  ;;  %v3561_v14 = vpop.xlane.xlu0 %3560 }
 0x9f8   :  { %3866 = vst.msk [vmem:[#allocation5] sm:$0xff] %vm1395_vm0, %v3850_v61  ;;  %v3853_v11 = vmax.f32 %v3837_v13, 0.0  ;;  %v3836_v59 = vadd.f32 %v6944_v62, %v3724_v15  ;;  %v3727_v55 = vmul.f32 %v6920_v35, %v3615_v2  ;;  %v3614_v34 = vmul.f32 %v4528_v26, %v6850_v28 }
 0x9f9   :  { %v4530_v47 = vpop.eup %4529  ;;  %4541 = vrsqrt.f32 %v3591_v16  ;;  %v3590_v7 = vadd.f32 1e-05, %v3574_v43  ;;  %v3577_v21 = vmul.f32 0.0078125, %v3561_v14  ;;  %v3558_v56 = vpop.xlane.xlu1 %3557 }
 0x9fa   :  { %3869 = vst.msk [vmem:[#allocation5 + $0x18] sm:$0xff] %vm1395_vm0, %v3853_v11  ;;  %v3852_v3 = vmax.f32 %v3836_v59, 0.0  ;;  %v3839_v45 = vadd.f32 %v6950_v53, %v3727_v55  ;;  %v3726_v63 = vmul.f32 %v6918_v30, %v3614_v34  ;;  %v3617_v40 = vmul.f32 %v4530_v47, %v6827_v12 }
 0x9fb   :  { %v4532_v29 = vpop.eup %4531  ;;  %4543 = vrsqrt.f32 %v3590_v7  ;;  %v3593_v62 = vadd.f32 1e-05, %v3577_v21  ;;  %v3576_v35 = vmul.f32 0.0078125, %v3558_v56 }
 0x9fc   :  { %3868 = vst.msk [vmem:[#allocation5 + $0x10] sm:$0xff] %vm1395_vm0, %v3852_v3  ;;  %v3855_v28 = vmax.f32 %v3839_v45, 0.0  ;;  %v3838_v6 = vadd.f32 %v6948_v10, %v3726_v63  ;;  %v3729_v58 = vmul.f32 %v6924_v48, %v3617_v40  ;;  %v3616_v24 = vmul.f32 %v4532_v29, %v6840_v50 }
 0x9fd   :  { %v4534_v4 = vpop.eup %4533  ;;  %4545 = vrsqrt.f32 %v3593_v62  ;;  %v3592_v53 = vadd.f32 1e-05, %v3576_v35  ;;  %v3832_v34 = vpop.permute.xlu1 %3831 }
 0x9fe   :  { %3871 = vst.msk [vmem:[#allocation5 + $0x28] sm:$0xff] %vm1395_vm0, %v3855_v28  ;;  %v3854_v30 = vmax.f32 %v3838_v6, 0.0  ;;  %v3841_v12 = vadd.f32 %v6954_v54, %v3729_v58  ;;  %v3728_v27 = vmul.f32 %v6922_v49, %v3616_v24  ;;  %v3619_v41 = vmul.f32 %v4534_v4, %v6817_v31 }
 0x9ff   :  { %v4536_v32 = vpop.eup %4535  ;;  %4547 = vrsqrt.f32 %v3592_v53 }
 0xa00   :  { %3870 = vst.msk [vmem:[#allocation5 + $0x20] sm:$0xff] %vm1395_vm0, %v3854_v30  ;;  %v3857_v10 = vmax.f32 %v3841_v12, 0.0  ;;  %v3840_v48 = vadd.f32 %v6952_v36, %v3728_v27  ;;  %v3731_v50 = vmul.f32 %v6928_v42, %v3619_v41  ;;  %v3618_v33 = vmul.f32 %v4536_v32, %v6830_v8 }
 0xa02   :  { %v4538_v60 = vpop.eup %4537  ;;  %3873 = vst.msk [vmem:[#allocation5 + $0x38] sm:$0xff] %vm1395_vm0, %v3857_v10  ;;  %v3856_v61 = vmax.f32 %v3840_v48, 0.0  ;;  %v3843_v54 = vadd.f32 %v6958_v52, %v3731_v50  ;;  %v3730_v49 = vmul.f32 %v6926_v22, %v3618_v33 }
 0xa03   :  { %v3621_v31 = vmul.f32 %v4538_v60, %v6809_v46 }
 0xa04   :  { %v4540_v13 = vpop.eup %4539  ;;  %3872 = vst.msk [vmem:[#allocation5 + $0x30] sm:$0xff] %vm1395_vm0, %v3856_v61  ;;  %v3859_v15 = vmax.f32 %v3843_v54, 0.0  ;;  %v3842_v36 = vadd.f32 %v6956_v23, %v3730_v49 }
 0xa05   :  { %v3733_v42 = vmul.f32 %v6932_v20, %v3621_v31  ;;  %v3620_v8 = vmul.f32 %v4540_v13, %v6820_v57 }
 0xa06   :  { %v4542_v2 = vpop.eup %4541  ;;  %3875 = vst.msk [vmem:[#allocation5 + $0x48] sm:$0xff] %vm1395_vm0, %v3859_v15  ;;  %v3858_v26 = vmax.f32 %v3842_v36, 0.0 }
 0xa07   :  { %v3845_v52 = vadd.f32 %v6962_v39, %v3733_v42  ;;  %v3732_v22 = vmul.f32 %v6930_v0, %v3620_v8  ;;  %v3623_v46 = vmul.f32 %v4542_v2, %v6802_v9 }
 0xa08   :  { %v4544_v16 = vpop.eup %4543  ;;  %3874 = vst.msk [vmem:[#allocation5 + $0x40] sm:$0xff] %vm1395_vm0, %v3858_v26 }
 0xa09   :  { %v3861_v43 = vmax.f32 %v3845_v52, 0.0  ;;  %v3844_v23 = vadd.f32 %v6960_v38, %v3732_v22  ;;  %v3735_v20 = vmul.f32 %v6936_v18, %v3623_v46  ;;  %v3622_v57 = vmul.f32 %v4544_v16, %v6812_v44 }
 0xa0a   :  { %v4546_v14 = vpop.eup %4545 }
 0xa0b   :  { %3877 = vst.msk [vmem:[#allocation5 + $0x58] sm:$0xff] %vm1395_vm0, %v3861_v43  ;;  %v3860_v11 = vmax.f32 %v3844_v23, 0.0  ;;  %v3847_v39 = vadd.f32 %v6966_v19, %v3735_v20  ;;  %v3734_v0 = vmul.f32 %v6934_v25, %v3622_v57  ;;  %v3625_v9 = vmul.f32 %v4546_v14, %v6794_v1  ;;  %v3827_v1 = vpop.permute.xlu0 %3826 }
 0xa0c   :  { %v4548_v59 = vpop.eup %4547 }
 0xa0d   :  { %3876 = vst.msk [vmem:[#allocation5 + $0x50] sm:$0xff] %vm1395_vm0, %v3860_v11  ;;  %v3863_v55 = vmax.f32 %v3847_v39, 0.0  ;;  %v3846_v38 = vadd.f32 %v6964_v17, %v3734_v0  ;;  %v3737_v18 = vmul.f32 %v6940_v5, %v3625_v9  ;;  %v3624_v44 = vmul.f32 %v4548_v59, %v6797_v51 }
 0xa0f   :  { %3879 = vst.msk [vmem:[#allocation5 + $0x68] sm:$0xff] %vm1395_vm0, %v3863_v55  ;;  %v3862_v47 = vmax.f32 %v3846_v38, 0.0  ;;  %v3849_v7 = vadd.f32 %v3832_v34, %v3737_v18  ;;  %v3736_v19 = vmul.f32 %v6938_v37, %v3624_v44 }
 0xa11   :  { %3878 = vst.msk [vmem:[#allocation5 + $0x60] sm:$0xff] %vm1395_vm0, %v3862_v47  ;;  %v3865_v25 = vmax.f32 %v3849_v7, 0.0  ;;  %v3848_v21 = vadd.f32 %v3827_v1, %v3736_v19 }
 0xa13   :  { %3881 = vst.msk [vmem:[#allocation5 + $0x78] sm:$0xff] %vm1395_vm0, %v3865_v25  ;;  %v3864_v5 = vmax.f32 %v3848_v21, 0.0 }
 0xa15   :  { %3880 = vst.msk [vmem:[#allocation5 + $0x70] sm:$0xff] %vm1395_vm0, %v3864_v5 }
 0xa16   :  { %4580 = shalt.err (!%p4577_p9)
}
 0xa17   :  { %s4599_s22 = smov 128   ;;  %s4600_s23 = smov 8  }
 0xa18   :  { %3893 = dma.vmem_to_hbm [thread:$0]  %s3888_s20, 2048, %s7042_s10, [#allocation4], %s4599_s22, %s4599_s22, %s4600_s23  }
 0xa19   :  { %4591 = dma.done.wait [#allocation4], 2048  }
 0xa1a   :  { %4592 = vsyncadd [#allocation4], 4294965248 }
 0xa1b   :  { %3897 = vsyncpa [#allocation3], 1 }
 0xa1c   :  { %3898 = vsyncpa [#allocation4], 1 }

</bundles_post_ra>
